<compile_context>
chip_gen: v6e
topology: v6e:2x2x1
jax: 0.10.0
libtpu: 0.0.40
codegen_flags: <defaults>
</compile_context>

<pallas_src>
import functools

import jax
import jax.numpy as jnp
from jax.experimental import pallas as pl
from jax.experimental.pallas import tpu as pltpu

NEG_INF = -1e30
LANE = 128
VMEM_LIMIT_BYTES = 48 * 1024 * 1024  # explicit scoped-VMEM budget (fits v5e/v6e/v7x)


def _round_up(v, m):
    return (v + m - 1) // m * m


# --------------------------- projection kernel ---------------------------
def _project_kernel(x_ref, w_ref, wad_ref, was_ref, h_ref, ad_ref, as_ref):
    """Per row tile: h = x @ W (bf16), a_dst = x @ (W a_dst), a_src = x @ (W a_src^T)."""
    x = x_ref[...]
    h = jnp.dot(x, w_ref[...], preferred_element_type=jnp.float32)
    h_ref[...] = h.astype(h_ref.dtype)
    ad_ref[...] = jnp.dot(x, wad_ref[...], preferred_element_type=jnp.float32)
    as_ref[...] = jnp.dot(x, was_ref[...], preferred_element_type=jnp.float32)


# --------------------------- attention kernel ----------------------------
def _attn_kernel(adj_ref, adst_ref, asrc_ref, h_ref, b_ref, out_ref, *, apply_relu):
    """One TILE_M row-tile of: softmax_row(leaky_relu(a_dst+a_src) masked) @ h + b."""
    # (TILE_M, 1) + (1, N) -> (TILE_M, N) logits.
    e = adst_ref[...] + asrc_ref[...]
    # leaky_relu(x, 0.2) == max(x, 0.2 * x): no cmp+select on the N^2 path.
    e = jnp.maximum(e, 0.2 * e)
    # Apply the adjacency mask (int8 streamed tile; convert once, then select).
    adj = adj_ref[...].astype(jnp.float32)
    e = jnp.where(adj > 0.0, e, NEG_INF)
    # Row softmax with deferred normalization.
    m = jnp.max(e, axis=-1, keepdims=True)
    p = jnp.exp(e - m)                        # masked entries underflow to exactly 0
    s = jnp.sum(p, axis=-1, keepdims=True)    # every row has >=1 unmasked entry (self loop)
    # TODO(synk): on v6e/v7x a bf16 exp would halve EUP pressure; kept f32 for v5e portability.
    agg = jnp.dot(p.astype(jnp.bfloat16), h_ref[...],
                  preferred_element_type=jnp.float32)
    out = agg * pl.reciprocal(s, approx=True) + b_ref[...]
    if apply_relu:
        out = jnp.maximum(out, 0.0)
    out_ref[...] = out
    # TODO(synk): on v7x an fp8(e4m3) cast of p for the aggregation matmul is a
    # possible further MXU win; needs accuracy validation first.


# ------------------------------ one GAT layer ------------------------------
def _gat_layer(adj, feat, w, asrc, adst, bias, *, apply_relu, tile_m):
    """feat: (n_pad, f_in_pad) f32; adj: (n_pad, n_pad) int8; all dims lane-padded."""
    n_pad, f_in = feat.shape
    dim = w.shape[1]
    grid = (n_pad // tile_m,)
    cparams = pltpu.CompilerParams(
        dimension_semantics=("parallel",),          # shard row tiles across v7x's 2 TCs
        vmem_limit_bytes=VMEM_LIMIT_BYTES,
    )

    # Fold the attention vectors through W (wrapper-side, tiny):
    #   a_dst[i] = h_i . adst = feat_i . (W @ adst),  a_src[j] = feat_j . (W @ asrc^T)
    wad = w @ adst            # (f_in, 1)
    was = w @ asrc.T          # (f_in, 1)

    h, ad_col, as_col = pl.pallas_call(
        _project_kernel,
        grid=grid,
        in_specs=[
            pl.BlockSpec((tile_m, f_in), lambda i: (i, 0)),   # feat rows (streamed)
            pl.BlockSpec((f_in, dim), lambda i: (0, 0)),      # W (resident)
            pl.BlockSpec((f_in, 1), lambda i: (0, 0)),
            pl.BlockSpec((f_in, 1), lambda i: (0, 0)),
        ],
        out_specs=[
            pl.BlockSpec((tile_m, dim), lambda i: (i, 0)),
            pl.BlockSpec((tile_m, 1), lambda i: (i, 0)),
            pl.BlockSpec((tile_m, 1), lambda i: (i, 0)),
        ],
        out_shape=[
            jax.ShapeDtypeStruct((n_pad, dim), jnp.bfloat16),  # h in bf16: MXU operand dtype
            jax.ShapeDtypeStruct((n_pad, 1), jnp.float32),     # a_dst (kept f32 for logits)
            jax.ShapeDtypeStruct((n_pad, 1), jnp.float32),     # a_src (kept f32 for logits)
        ],
        compiler_params=cparams,
    )(feat, w, wad, was)

    # Tiny (n_pad, 1) -> (1, n_pad) relayout outside the kernel (avoids any wide
    # in-kernel transpose / lane reduction).
    asrc_row = as_col.reshape(1, n_pad)

    out = pl.pallas_call(
        functools.partial(_attn_kernel, apply_relu=apply_relu),
        grid=grid,
        in_specs=[
            pl.BlockSpec((tile_m, n_pad), lambda i: (i, 0)),  # int8 adjacency rows (streamed)
            pl.BlockSpec((tile_m, 1), lambda i: (i, 0)),      # a_dst tile
            pl.BlockSpec((1, n_pad), lambda i: (0, 0)),       # a_src row (resident)
            pl.BlockSpec((n_pad, dim), lambda i: (0, 0)),     # h bf16 (resident, fetched once)
            pl.BlockSpec((1, dim), lambda i: (0, 0)),         # bias
        ],
        out_specs=pl.BlockSpec((tile_m, dim), lambda i: (i, 0)),
        out_shape=jax.ShapeDtypeStruct((n_pad, dim), jnp.float32),
        compiler_params=cparams,
    )(adj, ad_col, asrc_row, h, bias)
    return out


# ------------------------------ full forward ------------------------------
@jax.jit
def gat_net_forward(x, adj, params):
    """GATNet.forward: conv1(relu(conv0(x))).

    x:   (N, F_in) node features.
    adj: (N, N) int8 adjacency, adj[i, j] = 1 iff edge j -> i (self loops included).
    """
    n, f_in = x.shape
    dim = params["w1"].shape[1]
    f_out = params["w2"].shape[1]

    n_pad = _round_up(n, LANE)
    f_in_pad = _round_up(f_in, LANE)
    dim_pad = _round_up(dim, LANE)
    f_out_pad = _round_up(f_out, LANE)

    # Pad features / adjacency.  Padded nodes get only a self loop so their
    # softmax row stays well defined; padded rows/cols are sliced off at the end.
    xp = jnp.pad(x, ((0, n_pad - n), (0, f_in_pad - f_in)))
    adj_p = jnp.zeros((n_pad, n_pad), jnp.int8).at[:n, :n].set(adj)
    if n_pad != n:
        idx = jnp.arange(n, n_pad)
        adj_p = adj_p.at[idx, idx].set(1)

    # Lane-pad parameters with zeros (exactness preserved: zero rows/cols
    # contribute nothing to projections, attention scores or bias).
    w1 = jnp.pad(params["w1"], ((0, f_in_pad - f_in), (0, dim_pad - dim)))
    asrc1 = jnp.pad(params["asrc1"], ((0, 0), (0, dim_pad - dim)))
    adst1 = jnp.pad(params["adst1"], ((0, dim_pad - dim), (0, 0)))
    b1 = jnp.pad(params["b1"], ((0, 0), (0, dim_pad - dim)))
    w2 = jnp.pad(params["w2"], ((0, dim_pad - dim), (0, f_out_pad - f_out)))
    asrc2 = jnp.pad(params["asrc2"], ((0, 0), (0, f_out_pad - f_out)))
    adst2 = jnp.pad(params["adst2"], ((0, f_out_pad - f_out), (0, 0)))
    b2 = jnp.pad(params["b2"], ((0, 0), (0, f_out_pad - f_out)))

    # Tile budgeting (v7x 64 MiB VMEM): 2 x TILE_M x N int8 adj tiles + resident
    # bf16 h + f32 logit temporaries stay well under VMEM_LIMIT_BYTES.
    tile_m = 256 if n_pad % 256 == 0 else 128

    z1 = _gat_layer(adj_p, xp, w1, asrc1, adst1, b1,
                    apply_relu=True, tile_m=tile_m)
    z2 = _gat_layer(adj_p, z1, w2, asrc2, adst2, b2,
                    apply_relu=False, tile_m=tile_m)
    return z2[:n, :f_out]


def edge_index_to_adjacency(edge_index, num_nodes):
    """Dense int8 adjacency: adj[i, j] = 1 iff edge j -> i, self loops included."""
    src, dst = edge_index[0], edge_index[1]
    adj = jnp.zeros((num_nodes, num_nodes), jnp.int8).at[dst, src].set(1)
    return jnp.maximum(adj, jnp.eye(num_nodes, dtype=jnp.int8))


def _gat_ref(x, adj, params):
    """Pure-JAX reference mirroring PyG GATConv (heads=1) semantics."""
    mask_bias = jnp.where(adj > 0, 0.0, NEG_INF).astype(jnp.float32)

    def layer(x_in, w, asrc, adst, b):
        h = x_in @ w
        e = h @ adst + (h @ asrc.T).T
        e = jnp.where(e > 0, e, 0.2 * e) + mask_bias
        p = jnp.exp(e - e.max(axis=-1, keepdims=True))
        alpha = p / p.sum(axis=-1, keepdims=True)
        return alpha @ h + b

    h1 = jax.nn.relu(layer(x, params["w1"], params["asrc1"],
                           params["adst1"], params["b1"]))
    return layer(h1, params["w2"], params["asrc2"], params["adst2"], params["b2"])


if __name__ == "__main__":
    key = jax.random.PRNGKey(0)
    N, F_IN, DIM, F_OUT = 32, 16, 256, 8   # dim=256 is the module default
    N_EDGES = 64
    keys = jax.random.split(key, 9)

    x = jax.random.normal(keys[0], (N, F_IN), jnp.float32)
    edge_index = jnp.stack([
        jax.random.randint(keys[1], (N_EDGES,), 0, N),
        jax.random.randint(keys[2], (N_EDGES,), 0, N),
    ])
    adj = edge_index_to_adjacency(edge_index, N)

    def glorot(k, shape):
        s = jnp.sqrt(6.0 / (shape[0] + shape[1]))
        return jax.random.uniform(k, shape, jnp.float32, -s, s)

    params = {
        # GATConv(in_channels=F_IN, out_channels=DIM), heads=1
        "w1": glorot(keys[3], (F_IN, DIM)),
        "asrc1": glorot(keys[4], (1, DIM)),
        "adst1": glorot(keys[5], (DIM, 1)),
        "b1": jnp.zeros((1, DIM), jnp.float32),
        # GATConv(in_channels=DIM, out_channels=F_OUT), heads=1
        "w2": glorot(keys[6], (DIM, F_OUT)),
        "asrc2": glorot(keys[7], (1, F_OUT)),
        "adst2": glorot(keys[8], (F_OUT, 1)),
        "b2": jnp.zeros((1, F_OUT), jnp.float32),
    }

    out = gat_net_forward(x, adj, params)
    jax.block_until_ready(out)
    assert out.shape == (N, F_OUT) and out.dtype == jnp.float32

    ref = _gat_ref(x, adj, params)
    err = float(jnp.max(jnp.abs(out - ref)))
    # bf16 aggregation + approx reciprocal -> small, bounded drift.
    assert jnp.isfinite(err) and err < 5e-2, f"max abs err {err}"
    print("KERNEL_OK")
</pallas_src>

<mosaic_0001>
module attributes {stable_mosaic.version = 11 : i64} {
  func.func @_project_kernel(%arg0: i32, %arg1: memref<128x128xf32, #tpu.memory_space<vmem>>, %arg2: memref<128x256xf32, #tpu.memory_space<vmem>>, %arg3: memref<128x1xf32, #tpu.memory_space<vmem>>, %arg4: memref<128x1xf32, #tpu.memory_space<vmem>>, %arg5: memref<128x256xbf16, #tpu.memory_space<vmem>>, %arg6: memref<128x1xf32, #tpu.memory_space<vmem>>, %arg7: memref<128x1xf32, #tpu.memory_space<vmem>>) attributes {dimension_semantics = [#tpu.dimension_semantics<parallel>], iteration_bounds = array<i64: 1>, scalar_prefetch = 0 : i64, scratch_operands = 0 : i64, tpu.core_type = #tpu.core_type<tc>, window_params = [{transform_indices = @transform_0, window_bounds = array<i64: 128, 128>}, {pipeline_mode = #tpu.pipeline_mode<synchronous>, transform_indices = @transform_1, window_bounds = array<i64: 128, 256>}, {pipeline_mode = #tpu.pipeline_mode<synchronous>, transform_indices = @transform_2, window_bounds = array<i64: 128, 1>}, {pipeline_mode = #tpu.pipeline_mode<synchronous>, transform_indices = @transform_3, window_bounds = array<i64: 128, 1>}, {transform_indices = @transform_4, window_bounds = array<i64: 128, 256>}, {transform_indices = @transform_5, window_bounds = array<i64: 128, 1>}, {transform_indices = @transform_6, window_bounds = array<i64: 128, 1>}]} {
    %c0 = arith.constant 0 : index
    %c0_0 = arith.constant 0 : index
    %0 = vector.load %arg1[%c0, %c0_0] : memref<128x128xf32, #tpu.memory_space<vmem>>, vector<128x128xf32>
    %c0_1 = arith.constant 0 : index
    %c0_2 = arith.constant 0 : index
    %1 = vector.load %arg2[%c0_1, %c0_2] : memref<128x256xf32, #tpu.memory_space<vmem>>, vector<128x256xf32>
    %cst = arith.constant dense<0.000000e+00> : vector<128x256xf32>
    %2 = tpu.matmul %0, %1, %cst {dimension_numbers = #tpu.dot_dimension_numbers<[1], [0], [0], [1], [0, 0, 1, 1], [], []>} : vector<128x128xf32>, vector<128x256xf32>, vector<128x256xf32> -> vector<128x256xf32>
    %3 = arith.truncf %2 : vector<128x256xf32> to vector<128x256xbf16>
    %c0_3 = arith.constant 0 : index
    %c0_4 = arith.constant 0 : index
    %4 = vector.load %arg5[%c0_3, %c0_4] : memref<128x256xbf16, #tpu.memory_space<vmem>>, vector<128x256xbf16>
    tpu.vector_store %arg5[%c0_3, %c0_4], %3 {strides = array<i32>} : memref<128x256xbf16, #tpu.memory_space<vmem>>, vector<128x256xbf16>,
    %c0_5 = arith.constant 0 : index
    %c0_6 = arith.constant 0 : index
    %5 = vector.load %arg3[%c0_5, %c0_6] : memref<128x1xf32, #tpu.memory_space<vmem>>, vector<128x1xf32>
    %cst_7 = arith.constant dense<0.000000e+00> : vector<128x1xf32>
    %6 = tpu.matmul %0, %5, %cst_7 {dimension_numbers = #tpu.dot_dimension_numbers<[1], [0], [0], [1], [0, 0, 1, 1], [], []>} : vector<128x128xf32>, vector<128x1xf32>, vector<128x1xf32> -> vector<128x1xf32>
    %c0_8 = arith.constant 0 : index
    %c0_9 = arith.constant 0 : index
    %7 = vector.load %arg6[%c0_8, %c0_9] : memref<128x1xf32, #tpu.memory_space<vmem>>, vector<128x1xf32>
    tpu.vector_store %arg6[%c0_8, %c0_9], %6 {strides = array<i32>} : memref<128x1xf32, #tpu.memory_space<vmem>>, vector<128x1xf32>,
    %c0_10 = arith.constant 0 : index
    %c0_11 = arith.constant 0 : index
    %8 = vector.load %arg4[%c0_10, %c0_11] : memref<128x1xf32, #tpu.memory_space<vmem>>, vector<128x1xf32>
    %cst_12 = arith.constant dense<0.000000e+00> : vector<128x1xf32>
    %9 = tpu.matmul %0, %8, %cst_12 {dimension_numbers = #tpu.dot_dimension_numbers<[1], [0], [0], [1], [0, 0, 1, 1], [], []>} : vector<128x128xf32>, vector<128x1xf32>, vector<128x1xf32> -> vector<128x1xf32>
    %c0_13 = arith.constant 0 : index
    %c0_14 = arith.constant 0 : index
    %10 = vector.load %arg7[%c0_13, %c0_14] : memref<128x1xf32, #tpu.memory_space<vmem>>, vector<128x1xf32>
    tpu.vector_store %arg7[%c0_13, %c0_14], %9 {strides = array<i32>} : memref<128x1xf32, #tpu.memory_space<vmem>>, vector<128x1xf32>,
    return
  }
  func.func @transform_0(%arg0: i32) -> (i32, i32) {
    %c0_i32 = arith.constant 0 : i32
    %c0_i32_0 = arith.constant 0 : i32
    return %arg0, %c0_i32 : i32, i32
  }
  func.func @transform_1(%arg0: i32) -> (i32, i32) {
    %c0_i32 = arith.constant 0 : i32
    %c0_i32_0 = arith.constant 0 : i32
    %c0_i32_1 = arith.constant 0 : i32
    return %c0_i32, %c0_i32_0 : i32, i32
  }
  func.func @transform_2(%arg0: i32) -> (i32, i32) {
    %c0_i32 = arith.constant 0 : i32
    %c0_i32_0 = arith.constant 0 : i32
    %c0_i32_1 = arith.constant 0 : i32
    return %c0_i32, %c0_i32_0 : i32, i32
  }
  func.func @transform_3(%arg0: i32) -> (i32, i32) {
    %c0_i32 = arith.constant 0 : i32
    %c0_i32_0 = arith.constant 0 : i32
    %c0_i32_1 = arith.constant 0 : i32
    return %c0_i32, %c0_i32_0 : i32, i32
  }
  func.func @transform_4(%arg0: i32) -> (i32, i32) {
    %c0_i32 = arith.constant 0 : i32
    %c0_i32_0 = arith.constant 0 : i32
    return %arg0, %c0_i32 : i32, i32
  }
  func.func @transform_5(%arg0: i32) -> (i32, i32) {
    %c0_i32 = arith.constant 0 : i32
    %c0_i32_0 = arith.constant 0 : i32
    return %arg0, %c0_i32 : i32, i32
  }
  func.func @transform_6(%arg0: i32) -> (i32, i32) {
    %c0_i32 = arith.constant 0 : i32
    %c0_i32_0 = arith.constant 0 : i32
    return %arg0, %c0_i32 : i32, i32
  }
}

module attributes {stable_mosaic.version = 11 : i64} {
  func.func @_attn_kernel(%arg0: i32, %arg1: memref<128x128xi8, #tpu.memory_space<vmem>>, %arg2: memref<128x1xf32, #tpu.memory_space<vmem>>, %arg3: memref<1x128xf32, #tpu.memory_space<vmem>>, %arg4: memref<128x256xbf16, #tpu.memory_space<vmem>>, %arg5: memref<1x256xf32, #tpu.memory_space<vmem>>, %arg6: memref<128x256xf32, #tpu.memory_space<vmem>>) attributes {dimension_semantics = [#tpu.dimension_semantics<parallel>], iteration_bounds = array<i64: 1>, scalar_prefetch = 0 : i64, scratch_operands = 0 : i64, tpu.core_type = #tpu.core_type<tc>, window_params = [{transform_indices = @transform_0, window_bounds = array<i64: 128, 128>}, {transform_indices = @transform_1, window_bounds = array<i64: 128, 1>}, {pipeline_mode = #tpu.pipeline_mode<synchronous>, transform_indices = @transform_2, window_bounds = array<i64: 1, 128>}, {pipeline_mode = #tpu.pipeline_mode<synchronous>, transform_indices = @transform_3, window_bounds = array<i64: 128, 256>}, {pipeline_mode = #tpu.pipeline_mode<synchronous>, transform_indices = @transform_4, window_bounds = array<i64: 1, 256>}, {transform_indices = @transform_5, window_bounds = array<i64: 128, 256>}]} {
    %c0 = arith.constant 0 : index
    %c0_0 = arith.constant 0 : index
    %0 = vector.load %arg2[%c0, %c0_0] : memref<128x1xf32, #tpu.memory_space<vmem>>, vector<128x1xf32>
    %c0_1 = arith.constant 0 : index
    %c0_2 = arith.constant 0 : index
    %1 = vector.load %arg3[%c0_1, %c0_2] : memref<1x128xf32, #tpu.memory_space<vmem>>, vector<1x128xf32>
    %2 = vector.broadcast %0 : vector<128x1xf32> to vector<128x128xf32>
    %3 = vector.broadcast %1 : vector<1x128xf32> to vector<128x128xf32>
    %4 = arith.addf %2, %3 : vector<128x128xf32>
    %cst = arith.constant 2.000000e-01 : f32
    %5 = vector.broadcast %cst : f32 to vector<128x128xf32>
    %6 = arith.mulf %5, %4 : vector<128x128xf32>
    %7 = arith.maximumf %4, %6 : vector<128x128xf32>
    %c0_3 = arith.constant 0 : index
    %c0_4 = arith.constant 0 : index
    %8 = vector.load %arg1[%c0_3, %c0_4] : memref<128x128xi8, #tpu.memory_space<vmem>>, vector<128x128xi8>
    %9 = arith.sitofp %8 : vector<128x128xi8> to vector<128x128xf32>
    %cst_5 = arith.constant 0.000000e+00 : f32
    %10 = vector.broadcast %cst_5 : f32 to vector<128x128xf32>
    %11 = arith.cmpf ogt, %9, %10 : vector<128x128xf32>
    %cst_6 = arith.constant -1.000000e+30 : f32
    %12 = vector.broadcast %cst_6 : f32 to vector<128x128xf32>
    %13 = arith.select %11, %7, %12 : vector<128x128xi1>, vector<128x128xf32>
    %cst_7 = arith.constant dense<0xFF800000> : vector<128xf32>
    %14 = vector.multi_reduction <maximumf>, %13, %cst_7 [1] : vector<128x128xf32> to vector<128xf32>
    %15 = vector.shape_cast %14 : vector<128xf32> to vector<128x1xf32>
    %16 = vector.broadcast %15 : vector<128x1xf32> to vector<128x128xf32>
    %17 = arith.subf %13, %16 : vector<128x128xf32>
    %18 = math.exp %17 : vector<128x128xf32>
    %cst_8 = arith.constant dense<0.000000e+00> : vector<128xf32>
    %19 = vector.multi_reduction <add>, %18, %cst_8 [1] : vector<128x128xf32> to vector<128xf32>
    %20 = vector.shape_cast %19 : vector<128xf32> to vector<128x1xf32>
    %21 = arith.truncf %18 : vector<128x128xf32> to vector<128x128xbf16>
    %c0_9 = arith.constant 0 : index
    %c0_10 = arith.constant 0 : index
    %22 = vector.load %arg4[%c0_9, %c0_10] : memref<128x256xbf16, #tpu.memory_space<vmem>>, vector<128x256xbf16>
    %cst_11 = arith.constant dense<0.000000e+00> : vector<128x256xf32>
    %23 = tpu.matmul %21, %22, %cst_11 {dimension_numbers = #tpu.dot_dimension_numbers<[1], [0], [0], [1], [0, 0, 1, 1], [], []>} : vector<128x128xbf16>, vector<128x256xbf16>, vector<128x256xf32> -> vector<128x256xf32>
    %24 = tpu.reciprocal %20 {approx = true} : vector<128x1xf32> -> vector<128x1xf32>
    %25 = vector.broadcast %24 : vector<128x1xf32> to vector<128x256xf32>
    %26 = arith.mulf %23, %25 : vector<128x256xf32>
    %c0_12 = arith.constant 0 : index
    %c0_13 = arith.constant 0 : index
    %27 = vector.load %arg5[%c0_12, %c0_13] : memref<1x256xf32, #tpu.memory_space<vmem>>, vector<1x256xf32>
    %28 = vector.broadcast %27 : vector<1x256xf32> to vector<128x256xf32>
    %29 = arith.addf %26, %28 : vector<128x256xf32>
    %cst_14 = arith.constant 0.000000e+00 : f32
    %30 = vector.broadcast %cst_14 : f32 to vector<128x256xf32>
    %31 = arith.maximumf %29, %30 : vector<128x256xf32>
    %c0_15 = arith.constant 0 : index
    %c0_16 = arith.constant 0 : index
    %32 = vector.load %arg6[%c0_15, %c0_16] : memref<128x256xf32, #tpu.memory_space<vmem>>, vector<128x256xf32>
    tpu.vector_store %arg6[%c0_15, %c0_16], %31 {strides = array<i32>} : memref<128x256xf32, #tpu.memory_space<vmem>>, vector<128x256xf32>,
    return
  }
  func.func @transform_0(%arg0: i32) -> (i32, i32) {
    %c0_i32 = arith.constant 0 : i32
    %c0_i32_0 = arith.constant 0 : i32
    return %arg0, %c0_i32 : i32, i32
  }
  func.func @transform_1(%arg0: i32) -> (i32, i32) {
    %c0_i32 = arith.constant 0 : i32
    %c0_i32_0 = arith.constant 0 : i32
    return %arg0, %c0_i32 : i32, i32
  }
  func.func @transform_2(%arg0: i32) -> (i32, i32) {
    %c0_i32 = arith.constant 0 : i32
    %c0_i32_0 = arith.constant 0 : i32
    %c0_i32_1 = arith.constant 0 : i32
    return %c0_i32, %c0_i32_0 : i32, i32
  }
  func.func @transform_3(%arg0: i32) -> (i32, i32) {
    %c0_i32 = arith.constant 0 : i32
    %c0_i32_0 = arith.constant 0 : i32
    %c0_i32_1 = arith.constant 0 : i32
    return %c0_i32, %c0_i32_0 : i32, i32
  }
  func.func @transform_4(%arg0: i32) -> (i32, i32) {
    %c0_i32 = arith.constant 0 : i32
    %c0_i32_0 = arith.constant 0 : i32
    %c0_i32_1 = arith.constant 0 : i32
    return %c0_i32, %c0_i32_0 : i32, i32
  }
  func.func @transform_5(%arg0: i32) -> (i32, i32) {
    %c0_i32 = arith.constant 0 : i32
    %c0_i32_0 = arith.constant 0 : i32
    return %arg0, %c0_i32 : i32, i32
  }
}

module attributes {stable_mosaic.version = 11 : i64} {
  func.func @_project_kernel(%arg0: i32, %arg1: memref<128x256xf32, #tpu.memory_space<vmem>>, %arg2: memref<256x128xf32, #tpu.memory_space<vmem>>, %arg3: memref<256x1xf32, #tpu.memory_space<vmem>>, %arg4: memref<256x1xf32, #tpu.memory_space<vmem>>, %arg5: memref<128x128xbf16, #tpu.memory_space<vmem>>, %arg6: memref<128x1xf32, #tpu.memory_space<vmem>>, %arg7: memref<128x1xf32, #tpu.memory_space<vmem>>) attributes {dimension_semantics = [#tpu.dimension_semantics<parallel>], iteration_bounds = array<i64: 1>, scalar_prefetch = 0 : i64, scratch_operands = 0 : i64, tpu.core_type = #tpu.core_type<tc>, window_params = [{transform_indices = @transform_0, window_bounds = array<i64: 128, 256>}, {pipeline_mode = #tpu.pipeline_mode<synchronous>, transform_indices = @transform_1, window_bounds = array<i64: 256, 128>}, {pipeline_mode = #tpu.pipeline_mode<synchronous>, transform_indices = @transform_2, window_bounds = array<i64: 256, 1>}, {pipeline_mode = #tpu.pipeline_mode<synchronous>, transform_indices = @transform_3, window_bounds = array<i64: 256, 1>}, {transform_indices = @transform_4, window_bounds = array<i64: 128, 128>}, {transform_indices = @transform_5, window_bounds = array<i64: 128, 1>}, {transform_indices = @transform_6, window_bounds = array<i64: 128, 1>}]} {
    %c0 = arith.constant 0 : index
    %c0_0 = arith.constant 0 : index
    %0 = vector.load %arg1[%c0, %c0_0] : memref<128x256xf32, #tpu.memory_space<vmem>>, vector<128x256xf32>
    %c0_1 = arith.constant 0 : index
    %c0_2 = arith.constant 0 : index
    %1 = vector.load %arg2[%c0_1, %c0_2] : memref<256x128xf32, #tpu.memory_space<vmem>>, vector<256x128xf32>
    %cst = arith.constant dense<0.000000e+00> : vector<128x128xf32>
    %2 = tpu.matmul %0, %1, %cst {dimension_numbers = #tpu.dot_dimension_numbers<[1], [0], [0], [1], [0, 0, 1, 1], [], []>} : vector<128x256xf32>, vector<256x128xf32>, vector<128x128xf32> -> vector<128x128xf32>
    %3 = arith.truncf %2 : vector<128x128xf32> to vector<128x128xbf16>
    %c0_3 = arith.constant 0 : index
    %c0_4 = arith.constant 0 : index
    %4 = vector.load %arg5[%c0_3, %c0_4] : memref<128x128xbf16, #tpu.memory_space<vmem>>, vector<128x128xbf16>
    tpu.vector_store %arg5[%c0_3, %c0_4], %3 {strides = array<i32>} : memref<128x128xbf16, #tpu.memory_space<vmem>>, vector<128x128xbf16>,
    %c0_5 = arith.constant 0 : index
    %c0_6 = arith.constant 0 : index
    %5 = vector.load %arg3[%c0_5, %c0_6] : memref<256x1xf32, #tpu.memory_space<vmem>>, vector<256x1xf32>
    %cst_7 = arith.constant dense<0.000000e+00> : vector<128x1xf32>
    %6 = tpu.matmul %0, %5, %cst_7 {dimension_numbers = #tpu.dot_dimension_numbers<[1], [0], [0], [1], [0, 0, 1, 1], [], []>} : vector<128x256xf32>, vector<256x1xf32>, vector<128x1xf32> -> vector<128x1xf32>
    %c0_8 = arith.constant 0 : index
    %c0_9 = arith.constant 0 : index
    %7 = vector.load %arg6[%c0_8, %c0_9] : memref<128x1xf32, #tpu.memory_space<vmem>>, vector<128x1xf32>
    tpu.vector_store %arg6[%c0_8, %c0_9], %6 {strides = array<i32>} : memref<128x1xf32, #tpu.memory_space<vmem>>, vector<128x1xf32>,
    %c0_10 = arith.constant 0 : index
    %c0_11 = arith.constant 0 : index
    %8 = vector.load %arg4[%c0_10, %c0_11] : memref<256x1xf32, #tpu.memory_space<vmem>>, vector<256x1xf32>
    %cst_12 = arith.constant dense<0.000000e+00> : vector<128x1xf32>
    %9 = tpu.matmul %0, %8, %cst_12 {dimension_numbers = #tpu.dot_dimension_numbers<[1], [0], [0], [1], [0, 0, 1, 1], [], []>} : vector<128x256xf32>, vector<256x1xf32>, vector<128x1xf32> -> vector<128x1xf32>
    %c0_13 = arith.constant 0 : index
    %c0_14 = arith.constant 0 : index
    %10 = vector.load %arg7[%c0_13, %c0_14] : memref<128x1xf32, #tpu.memory_space<vmem>>, vector<128x1xf32>
    tpu.vector_store %arg7[%c0_13, %c0_14], %9 {strides = array<i32>} : memref<128x1xf32, #tpu.memory_space<vmem>>, vector<128x1xf32>,
    return
  }
  func.func @transform_0(%arg0: i32) -> (i32, i32) {
    %c0_i32 = arith.constant 0 : i32
    %c0_i32_0 = arith.constant 0 : i32
    return %arg0, %c0_i32 : i32, i32
  }
  func.func @transform_1(%arg0: i32) -> (i32, i32) {
    %c0_i32 = arith.constant 0 : i32
    %c0_i32_0 = arith.constant 0 : i32
    %c0_i32_1 = arith.constant 0 : i32
    return %c0_i32, %c0_i32_0 : i32, i32
  }
  func.func @transform_2(%arg0: i32) -> (i32, i32) {
    %c0_i32 = arith.constant 0 : i32
    %c0_i32_0 = arith.constant 0 : i32
    %c0_i32_1 = arith.constant 0 : i32
    return %c0_i32, %c0_i32_0 : i32, i32
  }
  func.func @transform_3(%arg0: i32) -> (i32, i32) {
    %c0_i32 = arith.constant 0 : i32
    %c0_i32_0 = arith.constant 0 : i32
    %c0_i32_1 = arith.constant 0 : i32
    return %c0_i32, %c0_i32_0 : i32, i32
  }
  func.func @transform_4(%arg0: i32) -> (i32, i32) {
    %c0_i32 = arith.constant 0 : i32
    %c0_i32_0 = arith.constant 0 : i32
    return %arg0, %c0_i32 : i32, i32
  }
  func.func @transform_5(%arg0: i32) -> (i32, i32) {
    %c0_i32 = arith.constant 0 : i32
    %c0_i32_0 = arith.constant 0 : i32
    return %arg0, %c0_i32 : i32, i32
  }
  func.func @transform_6(%arg0: i32) -> (i32, i32) {
    %c0_i32 = arith.constant 0 : i32
    %c0_i32_0 = arith.constant 0 : i32
    return %arg0, %c0_i32 : i32, i32
  }
}

module attributes {stable_mosaic.version = 11 : i64} {
  func.func @_attn_kernel(%arg0: i32, %arg1: memref<128x128xi8, #tpu.memory_space<vmem>>, %arg2: memref<128x1xf32, #tpu.memory_space<vmem>>, %arg3: memref<1x128xf32, #tpu.memory_space<vmem>>, %arg4: memref<128x128xbf16, #tpu.memory_space<vmem>>, %arg5: memref<1x128xf32, #tpu.memory_space<vmem>>, %arg6: memref<128x128xf32, #tpu.memory_space<vmem>>) attributes {dimension_semantics = [#tpu.dimension_semantics<parallel>], iteration_bounds = array<i64: 1>, scalar_prefetch = 0 : i64, scratch_operands = 0 : i64, tpu.core_type = #tpu.core_type<tc>, window_params = [{transform_indices = @transform_0, window_bounds = array<i64: 128, 128>}, {transform_indices = @transform_1, window_bounds = array<i64: 128, 1>}, {pipeline_mode = #tpu.pipeline_mode<synchronous>, transform_indices = @transform_2, window_bounds = array<i64: 1, 128>}, {pipeline_mode = #tpu.pipeline_mode<synchronous>, transform_indices = @transform_3, window_bounds = array<i64: 128, 128>}, {pipeline_mode = #tpu.pipeline_mode<synchronous>, transform_indices = @transform_4, window_bounds = array<i64: 1, 128>}, {transform_indices = @transform_5, window_bounds = array<i64: 128, 128>}]} {
    %c0 = arith.constant 0 : index
    %c0_0 = arith.constant 0 : index
    %0 = vector.load %arg2[%c0, %c0_0] : memref<128x1xf32, #tpu.memory_space<vmem>>, vector<128x1xf32>
    %c0_1 = arith.constant 0 : index
    %c0_2 = arith.constant 0 : index
    %1 = vector.load %arg3[%c0_1, %c0_2] : memref<1x128xf32, #tpu.memory_space<vmem>>, vector<1x128xf32>
    %2 = vector.broadcast %0 : vector<128x1xf32> to vector<128x128xf32>
    %3 = vector.broadcast %1 : vector<1x128xf32> to vector<128x128xf32>
    %4 = arith.addf %2, %3 : vector<128x128xf32>
    %cst = arith.constant 2.000000e-01 : f32
    %5 = vector.broadcast %cst : f32 to vector<128x128xf32>
    %6 = arith.mulf %5, %4 : vector<128x128xf32>
    %7 = arith.maximumf %4, %6 : vector<128x128xf32>
    %c0_3 = arith.constant 0 : index
    %c0_4 = arith.constant 0 : index
    %8 = vector.load %arg1[%c0_3, %c0_4] : memref<128x128xi8, #tpu.memory_space<vmem>>, vector<128x128xi8>
    %9 = arith.sitofp %8 : vector<128x128xi8> to vector<128x128xf32>
    %cst_5 = arith.constant 0.000000e+00 : f32
    %10 = vector.broadcast %cst_5 : f32 to vector<128x128xf32>
    %11 = arith.cmpf ogt, %9, %10 : vector<128x128xf32>
    %cst_6 = arith.constant -1.000000e+30 : f32
    %12 = vector.broadcast %cst_6 : f32 to vector<128x128xf32>
    %13 = arith.select %11, %7, %12 : vector<128x128xi1>, vector<128x128xf32>
    %cst_7 = arith.constant dense<0xFF800000> : vector<128xf32>
    %14 = vector.multi_reduction <maximumf>, %13, %cst_7 [1] : vector<128x128xf32> to vector<128xf32>
    %15 = vector.shape_cast %14 : vector<128xf32> to vector<128x1xf32>
    %16 = vector.broadcast %15 : vector<128x1xf32> to vector<128x128xf32>
    %17 = arith.subf %13, %16 : vector<128x128xf32>
    %18 = math.exp %17 : vector<128x128xf32>
    %cst_8 = arith.constant dense<0.000000e+00> : vector<128xf32>
    %19 = vector.multi_reduction <add>, %18, %cst_8 [1] : vector<128x128xf32> to vector<128xf32>
    %20 = vector.shape_cast %19 : vector<128xf32> to vector<128x1xf32>
    %21 = arith.truncf %18 : vector<128x128xf32> to vector<128x128xbf16>
    %c0_9 = arith.constant 0 : index
    %c0_10 = arith.constant 0 : index
    %22 = vector.load %arg4[%c0_9, %c0_10] : memref<128x128xbf16, #tpu.memory_space<vmem>>, vector<128x128xbf16>
    %cst_11 = arith.constant dense<0.000000e+00> : vector<128x128xf32>
    %23 = tpu.matmul %21, %22, %cst_11 {dimension_numbers = #tpu.dot_dimension_numbers<[1], [0], [0], [1], [0, 0, 1, 1], [], []>} : vector<128x128xbf16>, vector<128x128xbf16>, vector<128x128xf32> -> vector<128x128xf32>
    %24 = tpu.reciprocal %20 {approx = true} : vector<128x1xf32> -> vector<128x1xf32>
    %25 = vector.broadcast %24 : vector<128x1xf32> to vector<128x128xf32>
    %26 = arith.mulf %23, %25 : vector<128x128xf32>
    %c0_12 = arith.constant 0 : index
    %c0_13 = arith.constant 0 : index
    %27 = vector.load %arg5[%c0_12, %c0_13] : memref<1x128xf32, #tpu.memory_space<vmem>>, vector<1x128xf32>
    %28 = vector.broadcast %27 : vector<1x128xf32> to vector<128x128xf32>
    %29 = arith.addf %26, %28 : vector<128x128xf32>
    %c0_14 = arith.constant 0 : index
    %c0_15 = arith.constant 0 : index
    %30 = vector.load %arg6[%c0_14, %c0_15] : memref<128x128xf32, #tpu.memory_space<vmem>>, vector<128x128xf32>
    tpu.vector_store %arg6[%c0_14, %c0_15], %29 {strides = array<i32>} : memref<128x128xf32, #tpu.memory_space<vmem>>, vector<128x128xf32>,
    return
  }
  func.func @transform_0(%arg0: i32) -> (i32, i32) {
    %c0_i32 = arith.constant 0 : i32
    %c0_i32_0 = arith.constant 0 : i32
    return %arg0, %c0_i32 : i32, i32
  }
  func.func @transform_1(%arg0: i32) -> (i32, i32) {
    %c0_i32 = arith.constant 0 : i32
    %c0_i32_0 = arith.constant 0 : i32
    return %arg0, %c0_i32 : i32, i32
  }
  func.func @transform_2(%arg0: i32) -> (i32, i32) {
    %c0_i32 = arith.constant 0 : i32
    %c0_i32_0 = arith.constant 0 : i32
    %c0_i32_1 = arith.constant 0 : i32
    return %c0_i32, %c0_i32_0 : i32, i32
  }
  func.func @transform_3(%arg0: i32) -> (i32, i32) {
    %c0_i32 = arith.constant 0 : i32
    %c0_i32_0 = arith.constant 0 : i32
    %c0_i32_1 = arith.constant 0 : i32
    return %c0_i32, %c0_i32_0 : i32, i32
  }
  func.func @transform_4(%arg0: i32) -> (i32, i32) {
    %c0_i32 = arith.constant 0 : i32
    %c0_i32_0 = arith.constant 0 : i32
    %c0_i32_1 = arith.constant 0 : i32
    return %c0_i32, %c0_i32_0 : i32, i32
  }
  func.func @transform_5(%arg0: i32) -> (i32, i32) {
    %c0_i32 = arith.constant 0 : i32
    %c0_i32_0 = arith.constant 0 : i32
    return %arg0, %c0_i32 : i32, i32
  }
}

</mosaic_0001>

<bundles_post_ra>
// kernel: gat_net_forward.4
= control target key start
LH: loop header
LB: loop body
LE: loop exit
PB: predicated region body
PF: predicated region fallthrough
CT: control target
= control target key end

     0   :  { %v917_v3 = vmov 0.0   ;;  %vm502_vm0 = vcmask 7168   ;;  %s1435_s1 = inlined_call_operand.vmem [shape: f32[128,256], index: 1, kind: input, shape index: {}]   ;;  %s1436_s2 = inlined_call_operand.vmem [shape: f32[128,1], index: 2, kind: input, shape index: {}]   ;;  %s1437_s0 = inlined_call_operand.vmem [shape: f32[128,128], index: 0, kind: input, shape index: {}]   ;;  %s1438_s3 = inlined_call_operand.vmem [shape: f32[128,1], index: 3, kind: input, shape index: {}]   ;;  %s1439_s5 = inlined_call_operand.vmem [shape: f32[128,1], index: 5, kind: output, shape index: {1}]   ;;  %s1440_s4 = inlined_call_operand.vmem [shape: bf16[128,256], index: 4, kind: output, shape index: {0}]   ;;  %s1441_s6 = inlined_call_operand.vmem [shape: f32[128,1], index: 6, kind: output, shape index: {2}]  }
   0x1   :  { %v67_v0 = vld [vmem:[%s1435_s1 + $0xf8] sm:$0xff]  ;;  %v66_v2 = vld [vmem:[%s1435_s1 + $0xf0] sm:$0xff]  ;;  %132 = vmatprep.mubr.f32.mxu0 %v917_v3  ;;  %v65_v4 = vld [vmem:[%s1435_s1 + $0xe8] sm:$0xff] }
   0x2   :  { %v356_v1 = vld [vmem:[%s1436_s2 + $0x78] sm:$0xff]  ;;  %68 = vmatprep.subr.mxu0 %v67_v0  ;;  %v355_v5 = vld [vmem:[%s1436_s2 + $0x70] sm:$0xff]  ;;  %v64_v6 = vld [vmem:[%s1435_s1 + $0xe0] sm:$0xff] }
   0x3   :  { %804 = vmatprep.subr.mxu1 %v356_v1  ;;  %69 = vmatpush1.msra.mxu0 %v66_v2  ;;  %v63_v7 = vld [vmem:[%s1435_s1 + $0xd8] sm:$0xff]  ;;  %v354_v8 = vld [vmem:[%s1436_s2 + $0x68] sm:$0xff]  ;;  %v62_v9 = vld [vmem:[%s1435_s1 + $0xd0] sm:$0xff] }
   0x4   :  { %805 = vmatpush3.msra.mxu1 %v356_v1  ;;  %70 = vmatprep.subr.mxu0 %v65_v4  ;;  %v61_v10 = vld [vmem:[%s1435_s1 + $0xc8] sm:$0xff]  ;;  %v353_v11 = vld [vmem:[%s1436_s2 + $0x60] sm:$0xff]  ;;  %v59_v13 = vld [vmem:[%s1435_s1 + $0xb8] sm:$0xff] }
   0x5   :  { %806 = vmatprep.subr.mxu1 %v355_v5  ;;  %71 = vmatpush1.msra.mxu0 %v64_v6  ;;  %v60_v12 = vld [vmem:[%s1435_s1 + $0xc0] sm:$0xff]  ;;  %v352_v14 = vld [vmem:[%s1436_s2 + $0x58] sm:$0xff]  ;;  %v58_v15 = vld [vmem:[%s1435_s1 + $0xb0] sm:$0xff] }
   0x6   :  { %807 = vmatpush3.msra.mxu1 %v355_v5  ;;  %72 = vmatprep.subr.mxu0 %v63_v7  ;;  %v57_v16 = vld [vmem:[%s1435_s1 + $0xa8] sm:$0xff]  ;;  %v351_v17 = vld [vmem:[%s1436_s2 + $0x50] sm:$0xff]  ;;  %v56_v18 = vld [vmem:[%s1435_s1 + $0xa0] sm:$0xff] }
   0x7   :  { %808 = vmatprep.subr.mxu1 %v354_v8  ;;  %73 = vmatpush1.msra.mxu0 %v62_v9  ;;  %v55_v19 = vld [vmem:[%s1435_s1 + $0x98] sm:$0xff]  ;;  %v350_v20 = vld [vmem:[%s1436_s2 + $0x48] sm:$0xff]  ;;  %v54_v21 = vld [vmem:[%s1435_s1 + $0x90] sm:$0xff] }
   0x8   :  { %809 = vmatpush3.msra.mxu1 %v354_v8  ;;  %74 = vmatprep.subr.mxu0 %v61_v10  ;;  %v53_v22 = vld [vmem:[%s1435_s1 + $0x88] sm:$0xff]  ;;  %v349_v23 = vld [vmem:[%s1436_s2 + $0x40] sm:$0xff]  ;;  %v51_v25 = vld [vmem:[%s1435_s1 + $0x78] sm:$0xff] }
   0x9   :  { %810 = vmatprep.subr.mxu1 %v353_v11  ;;  %75 = vmatpush1.msra.mxu0 %v60_v12  ;;  %v52_v24 = vld [vmem:[%s1435_s1 + $0x80] sm:$0xff]  ;;  %v348_v26 = vld [vmem:[%s1436_s2 + $0x38] sm:$0xff]  ;;  %v50_v27 = vld [vmem:[%s1435_s1 + $0x70] sm:$0xff] }
   0xa   :  { %811 = vmatpush3.msra.mxu1 %v353_v11  ;;  %76 = vmatprep.subr.mxu0 %v59_v13  ;;  %v49_v28 = vld [vmem:[%s1435_s1 + $0x68] sm:$0xff]  ;;  %v347_v29 = vld [vmem:[%s1436_s2 + $0x30] sm:$0xff]  ;;  %v48_v30 = vld [vmem:[%s1435_s1 + $0x60] sm:$0xff] }
   0xb   :  { %812 = vmatprep.subr.mxu1 %v352_v14  ;;  %77 = vmatpush1.msra.mxu0 %v58_v15  ;;  %v47_v31 = vld [vmem:[%s1435_s1 + $0x58] sm:$0xff]  ;;  %v346_v32 = vld [vmem:[%s1436_s2 + $0x28] sm:$0xff]  ;;  %v46_v33 = vld [vmem:[%s1435_s1 + $0x50] sm:$0xff] }
   0xc   :  { %813 = vmatpush3.msra.mxu1 %v352_v14  ;;  %78 = vmatprep.subr.mxu0 %v57_v16  ;;  %v45_v34 = vld [vmem:[%s1435_s1 + $0x48] sm:$0xff]  ;;  %v345_v35 = vld [vmem:[%s1436_s2 + $0x20] sm:$0xff]  ;;  %v43_v37 = vld [vmem:[%s1435_s1 + $0x38] sm:$0xff] }
   0xd   :  { %814 = vmatprep.subr.mxu1 %v351_v17  ;;  %79 = vmatpush1.msra.mxu0 %v56_v18  ;;  %v44_v36 = vld [vmem:[%s1435_s1 + $0x40] sm:$0xff]  ;;  %v344_v38 = vld [vmem:[%s1436_s2 + $0x18] sm:$0xff]  ;;  %v42_v39 = vld [vmem:[%s1435_s1 + $0x30] sm:$0xff] }
   0xe   :  { %815 = vmatpush3.msra.mxu1 %v351_v17  ;;  %80 = vmatprep.subr.mxu0 %v55_v19  ;;  %v41_v40 = vld [vmem:[%s1435_s1 + $0x28] sm:$0xff]  ;;  %v343_v41 = vld [vmem:[%s1436_s2 + $0x10] sm:$0xff]  ;;  %v40_v42 = vld [vmem:[%s1435_s1 + $0x20] sm:$0xff] }
   0xf   :  { %816 = vmatprep.subr.mxu1 %v350_v20  ;;  %81 = vmatpush1.msra.mxu0 %v54_v21  ;;  %v39_v43 = vld [vmem:[%s1435_s1 + $0x18] sm:$0xff]  ;;  %v342_v44 = vld [vmem:[%s1436_s2 + $0x8] sm:$0xff]  ;;  %v38_v45 = vld [vmem:[%s1435_s1 + $0x10] sm:$0xff] }
  0x10   :  { %817 = vmatpush3.msra.mxu1 %v350_v20  ;;  %82 = vmatprep.subr.mxu0 %v53_v22  ;;  %v37_v46 = vld [vmem:[%s1435_s1 + $0x8] sm:$0xff]  ;;  %v341_v47 = vld [vmem:[%s1436_s2] sm:$0xff]  ;;  %v534_v51 = vld [vmem:[%s1438_s3 + $0x78] sm:$0xff] }
  0x11   :  { %818 = vmatprep.subr.mxu1 %v349_v23  ;;  %83 = vmatpush1.msra.mxu0 %v52_v24  ;;  %v36_v48 = vld [vmem:[%s1435_s1] sm:$0xff]  ;;  %v1106_v50 = vld [vmem:[%s1437_s0 + $0x8] sm:$0xff]  ;;  %v533_v52 = vld [vmem:[%s1438_s3 + $0x70] sm:$0xff] }
  0x12   :  { %819 = vmatpush3.msra.mxu1 %v349_v23  ;;  %84 = vmatprep.subr.mxu0 %v51_v25  ;;  %v1101_v49 = vld [vmem:[%s1437_s0] sm:$0xff]  ;;  %v1119_v53 = vld [vmem:[%s1437_s0 + $0x10] sm:$0xff]  ;;  %v1126_v54 = vld [vmem:[%s1437_s0 + $0x18] sm:$0xff] }
  0x13   :  { %820 = vmatprep.subr.mxu1 %v348_v26  ;;  %85 = vmatpush1.msra.mxu0 %v50_v27  ;;  %v532_v55 = vld [vmem:[%s1438_s3 + $0x68] sm:$0xff]  ;;  %v531_v56 = vld [vmem:[%s1438_s3 + $0x60] sm:$0xff]  ;;  %v530_v59 = vld [vmem:[%s1438_s3 + $0x58] sm:$0xff] }
  0x14   :  { %821 = vmatpush3.msra.mxu1 %v348_v26  ;;  %86 = vmatprep.subr.mxu0 %v49_v28  ;;  %v1139_v57 = vld [vmem:[%s1437_s0 + $0x20] sm:$0xff]  ;;  %v1146_v58 = vld [vmem:[%s1437_s0 + $0x28] sm:$0xff]  ;;  %v529_v60 = vld [vmem:[%s1438_s3 + $0x50] sm:$0xff] }
  0x15   :  { %822 = vmatprep.subr.mxu1 %v347_v29  ;;  %87 = vmatpush1.msra.mxu0 %v48_v30  ;;  %v1159_v61 = vld [vmem:[%s1437_s0 + $0x30] sm:$0xff]  ;;  %v1166_v62 = vld [vmem:[%s1437_s0 + $0x38] sm:$0xff]  ;;  %v528_v63 = vld [vmem:[%s1438_s3 + $0x48] sm:$0xff] }
  0x16   :  { %823 = vmatpush3.msra.mxu1 %v347_v29  ;;  %88 = vmatprep.subr.mxu0 %v47_v31  ;;  %v527_v0 = vld [vmem:[%s1438_s3 + $0x40] sm:$0xff]  ;;  %v1186_v2 = vld [vmem:[%s1437_s0 + $0x48] sm:$0xff]  ;;  %v526_v4 = vld [vmem:[%s1438_s3 + $0x38] sm:$0xff] }
  0x17   :  { %824 = vmatprep.subr.mxu1 %v346_v32  ;;  %89 = vmatpush1.msra.mxu0 %v46_v33  ;;  %v1179_v1 = vld [vmem:[%s1437_s0 + $0x40] sm:$0xff]  ;;  %v525_v5 = vld [vmem:[%s1438_s3 + $0x30] sm:$0xff]  ;;  %v31_v7 = vld [vmem:[%s1437_s0 + $0x58] sm:$0xff] }
  0x18   :  { %825 = vmatpush3.msra.mxu1 %v346_v32  ;;  %90 = vmatprep.subr.mxu0 %v45_v34  ;;  %v30_v6 = vld [vmem:[%s1437_s0 + $0x50] sm:$0xff]  ;;  %v524_v8 = vld [vmem:[%s1438_s3 + $0x28] sm:$0xff]  ;;  %v523_v9 = vld [vmem:[%s1438_s3 + $0x20] sm:$0xff] }
  0x19   :  { %826 = vmatprep.subr.mxu1 %v345_v35  ;;  %91 = vmatpush1.msra.mxu0 %v44_v36  ;;  %v32_v10 = vld [vmem:[%s1437_s0 + $0x60] sm:$0xff]  ;;  %v33_v11 = vld [vmem:[%s1437_s0 + $0x68] sm:$0xff]  ;;  %v522_v12 = vld [vmem:[%s1438_s3 + $0x18] sm:$0xff] }
  0x1a   :  { %827 = vmatpush3.msra.mxu1 %v345_v35  ;;  %92 = vmatprep.subr.mxu0 %v43_v37  ;;  %v521_v13 = vld [vmem:[%s1438_s3 + $0x10] sm:$0xff]  ;;  %v35_v15 = vld [vmem:[%s1437_s0 + $0x78] sm:$0xff]  ;;  %v520_v16 = vld [vmem:[%s1438_s3 + $0x8] sm:$0xff] }
  0x1b   :  { %828 = vmatprep.subr.mxu1 %v344_v38  ;;  %93 = vmatpush1.msra.mxu0 %v42_v39  ;;  %v34_v14 = vld [vmem:[%s1437_s0 + $0x70] sm:$0xff]  ;;  %v519_v17 = vld [vmem:[%s1438_s3] sm:$0xff] }
  0x1c   :  { %829 = vmatpush3.msra.mxu1 %v344_v38  ;;  %94 = vmatprep.subr.mxu0 %v41_v40 }
  0x1d   :  { %830 = vmatprep.subr.mxu1 %v343_v41  ;;  %95 = vmatpush1.msra.mxu0 %v40_v42 }
  0x1e   :  { %831 = vmatpush3.msra.mxu1 %v343_v41  ;;  %96 = vmatprep.subr.mxu0 %v39_v43 }
  0x1f   :  { %832 = vmatprep.subr.mxu1 %v342_v44  ;;  %97 = vmatpush1.msra.mxu0 %v38_v45 }
  0x20   :  { %833 = vmatpush3.msra.mxu1 %v342_v44  ;;  %98 = vmatprep.subr.mxu0 %v37_v46 }
  0x21   :  { %834 = vmatprep.subr.mxu1 %v341_v47  ;;  %99 = vmatpush1.msra.mxu0 %v36_v48 }
  0x22   :  { %835 = vmatpush3.msra.mxu1 %v341_v47  ;;  %836 = vmatprep.mubr.f32.mxu1 %v1101_v49 }
  0x23   :  { %133 = vmatmul.mubr.f32.vlgmr.msra.gmra.mxu0 %v1101_v49  ;;  %837 = vmatmul.mubr.f32.vlgmr.msra.gmra.mxu1 %v1106_v50 }
  0x24   :  { %860 = vmatprep.subr.mxu1 %v534_v51  ;;  %138 = vmatprep.mubr.f32.mxu0 %v917_v3 }
  0x25   :  { %861 = vmatpush3.msra.mxu1 %v534_v51  ;;  %839 = vmatprep.mubr.f32.mxu1 %v1119_v53 }
  0x26   :  { %862 = vmatprep.subr.mxu1 %v533_v52 }
  0x27   :  { %863 = vmatpush3.msra.mxu1 %v533_v52  ;;  %139 = vmatmul.mubr.f32.gmra.mxu0 %v1106_v50 }
  0x28   :  { %840 = vmatmul.mubr.f32.gmra.mxu1 %v1126_v54  ;;  %864 = vmatprep.subr.mxu1 %v532_v55 }
  0x29   :  { %865 = vmatpush3.msra.mxu1 %v532_v55  ;;  %144 = vmatprep.mubr.f32.mxu0 %v917_v3 }
  0x2a   :  { %866 = vmatprep.subr.mxu1 %v531_v56  ;;  %842 = vmatprep.mubr.f32.mxu1 %v1139_v57 }
  0x2b   :  { %867 = vmatpush3.msra.mxu1 %v531_v56  ;;  %145 = vmatmul.mubr.f32.gmra.mxu0 %v1119_v53 }
  0x2c   :  { %843 = vmatmul.mubr.f32.gmra.mxu1 %v1146_v58  ;;  %868 = vmatprep.subr.mxu1 %v530_v59 }
  0x2d   :  { %869 = vmatpush3.msra.mxu1 %v530_v59  ;;  %150 = vmatprep.mubr.f32.mxu0 %v917_v3 }
  0x2e   :  { %870 = vmatprep.subr.mxu1 %v529_v60  ;;  %845 = vmatprep.mubr.f32.mxu1 %v1159_v61 }
  0x2f   :  { %871 = vmatpush3.msra.mxu1 %v529_v60  ;;  %151 = vmatmul.mubr.f32.gmra.mxu0 %v1126_v54 }
  0x30   :  { %846 = vmatmul.mubr.f32.gmra.mxu1 %v1166_v62  ;;  %872 = vmatprep.subr.mxu1 %v528_v63 }
  0x31   :  { %873 = vmatpush3.msra.mxu1 %v528_v63  ;;  %156 = vmatprep.mubr.f32.mxu0 %v917_v3 }
  0x32   :  { %874 = vmatprep.subr.mxu1 %v527_v0  ;;  %848 = vmatprep.mubr.f32.mxu1 %v1179_v1 }
  0x33   :  { %875 = vmatpush3.msra.mxu1 %v527_v0  ;;  %157 = vmatmul.mubr.f32.gmra.mxu0 %v1139_v57 }
  0x34   :  { %849 = vmatmul.mubr.f32.gmra.mxu1 %v1186_v2  ;;  %876 = vmatprep.subr.mxu1 %v526_v4 }
  0x35   :  { %877 = vmatpush3.msra.mxu1 %v526_v4  ;;  %162 = vmatprep.mubr.f32.mxu0 %v917_v3 }
  0x36   :  { %878 = vmatprep.subr.mxu1 %v525_v5  ;;  %851 = vmatprep.mubr.f32.mxu1 %v30_v6 }
  0x37   :  { %879 = vmatpush3.msra.mxu1 %v525_v5  ;;  %163 = vmatmul.mubr.f32.gmra.mxu0 %v1146_v58 }
  0x38   :  { %852 = vmatmul.mubr.f32.gmra.mxu1 %v31_v7  ;;  %880 = vmatprep.subr.mxu1 %v524_v8 }
  0x39   :  { %881 = vmatpush3.msra.mxu1 %v524_v8  ;;  %168 = vmatprep.mubr.f32.mxu0 %v917_v3 }
  0x3a   :  { %882 = vmatprep.subr.mxu1 %v523_v9  ;;  %854 = vmatprep.mubr.f32.mxu1 %v32_v10 }
  0x3b   :  { %883 = vmatpush3.msra.mxu1 %v523_v9  ;;  %169 = vmatmul.mubr.f32.gmra.mxu0 %v1159_v61 }
  0x3c   :  { %855 = vmatmul.mubr.f32.gmra.mxu1 %v33_v11  ;;  %884 = vmatprep.subr.mxu1 %v522_v12 }
  0x3d   :  { %885 = vmatpush3.msra.mxu1 %v522_v12  ;;  %174 = vmatprep.mubr.f32.mxu0 %v917_v3 }
  0x3e   :  { %886 = vmatprep.subr.mxu1 %v521_v13  ;;  %857 = vmatprep.mubr.f32.mxu1 %v34_v14 }
  0x3f   :  { %887 = vmatpush3.msra.mxu1 %v521_v13  ;;  %175 = vmatmul.mubr.f32.gmra.mxu0 %v1166_v62 }
  0x40   :  { %858 = vmatmul.mubr.f32.gmra.mxu1 %v35_v15  ;;  %888 = vmatprep.subr.mxu1 %v520_v16 }
  0x41   :  { %889 = vmatpush3.msra.mxu1 %v520_v16  ;;  %180 = vmatprep.mubr.f32.mxu0 %v917_v3 }
  0x42   :  { %890 = vmatprep.subr.mxu1 %v519_v17  ;;  %892 = vmatprep.mubr.f32.mxu1 %v1101_v49 }
  0x43   :  { %891 = vmatpush3.msra.mxu1 %v519_v17  ;;  %181 = vmatmul.mubr.f32.gmra.mxu0 %v1179_v1 }
  0x44   :  { %893 = vmatmul.mubr.f32.vlgmr.msra.gmra.mxu1 %v1106_v50  ;;  %186 = vmatprep.mubr.f32.mxu0 %v917_v3 }
  0x45   :  { %895 = vmatprep.mubr.f32.mxu1 %v1119_v53 }
  0x47   :  { %187 = vmatmul.mubr.f32.gmra.mxu0 %v1186_v2 }
  0x48   :  { %896 = vmatmul.mubr.f32.gmra.mxu1 %v1126_v54  ;;  %192 = vmatprep.mubr.f32.mxu0 %v917_v3 }
  0x49   :  { %898 = vmatprep.mubr.f32.mxu1 %v1139_v57 }
  0x4b   :  { %193 = vmatmul.mubr.f32.gmra.mxu0 %v30_v6 }
  0x4c   :  { %899 = vmatmul.mubr.f32.gmra.mxu1 %v1146_v58  ;;  %198 = vmatprep.mubr.f32.mxu0 %v917_v3 }
  0x4d   :  { %901 = vmatprep.mubr.f32.mxu1 %v1159_v61 }
  0x4f   :  { %199 = vmatmul.mubr.f32.gmra.mxu0 %v31_v7 }
  0x50   :  { %902 = vmatmul.mubr.f32.gmra.mxu1 %v1166_v62  ;;  %204 = vmatprep.mubr.f32.mxu0 %v917_v3 }
  0x51   :  { %904 = vmatprep.mubr.f32.mxu1 %v1179_v1 }
  0x53   :  { %205 = vmatmul.mubr.f32.gmra.mxu0 %v32_v10 }
  0x54   :  { %905 = vmatmul.mubr.f32.gmra.mxu1 %v1186_v2  ;;  %210 = vmatprep.mubr.f32.mxu0 %v917_v3 }
  0x55   :  { %907 = vmatprep.mubr.f32.mxu1 %v30_v6 }
  0x57   :  { %211 = vmatmul.mubr.f32.gmra.mxu0 %v33_v11 }
  0x58   :  { %908 = vmatmul.mubr.f32.gmra.mxu1 %v31_v7  ;;  %216 = vmatprep.mubr.f32.mxu0 %v917_v3 }
  0x59   :  { %910 = vmatprep.mubr.f32.mxu1 %v32_v10 }
  0x5b   :  { %217 = vmatmul.mubr.f32.gmra.mxu0 %v34_v14 }
  0x5c   :  { %911 = vmatmul.mubr.f32.gmra.mxu1 %v33_v11  ;;  %222 = vmatprep.mubr.f32.mxu0 %v917_v3 }
  0x5d   :  { %913 = vmatprep.mubr.f32.mxu1 %v34_v14 }
  0x5f   :  { %223 = vmatmul.mubr.f32.gmra.mxu0 %v35_v15 }
  0x60   :  { %914 = vmatmul.mubr.f32.gmra.mxu1 %v35_v15 }
  0xe3   :  { %v134_v18 = vpop.f32.mrf.mxu0  ;;  %v838_v19 = vpop.f32.mrf.mxu1 }
  0xe4   :  { %504 = vst.msk [vmem:[%s1439_s5 + $0x8] sm:$0xff] %vm502_vm0, %v838_v19 }
  0xe5   :  { %v136_v20 = vpop.f32.mrf.mxu0  ;;  %v423_v22 = vpop.f32.mrf.mxu1 }
  0xe6   :  { %v724_v21 = vpack.c.bf16 %v136_v20, %v134_v18  ;;  %503 = vst.msk [vmem:[%s1439_s5] sm:$0xff] %vm502_vm0, %v423_v22 }
  0xe7   :  { %v140_v3 = vpop.f32.mrf.mxu0 }
  0xe8   :  { %325 = vst [vmem:[%s1440_s4] sm:$0xff] %v724_v21  ;;  %v841_v23 = vpop.f32.mrf.mxu1 }
  0xe9   :  { %506 = vst.msk [vmem:[%s1439_s5 + $0x18] sm:$0xff] %vm502_vm0, %v841_v23  ;;  %v142_v24 = vpop.f32.mrf.mxu0 }
  0xea   :  { %v725_v25 = vpack.c.bf16 %v142_v24, %v140_v3  ;;  %v433_v26 = vpop.f32.mrf.mxu1 }
  0xeb   :  { %505 = vst.msk [vmem:[%s1439_s5 + $0x10] sm:$0xff] %vm502_vm0, %v433_v26  ;;  %v146_v27 = vpop.f32.mrf.mxu0 }
  0xec   :  { %326 = vst [vmem:[%s1440_s4 + $0x8] sm:$0xff] %v725_v25  ;;  %v844_v28 = vpop.f32.mrf.mxu1 }
  0xed   :  { %508 = vst.msk [vmem:[%s1439_s5 + $0x28] sm:$0xff] %vm502_vm0, %v844_v28  ;;  %v148_v29 = vpop.f32.mrf.mxu0 }
  0xee   :  { %v726_v30 = vpack.c.bf16 %v148_v29, %v146_v27  ;;  %v443_v31 = vpop.f32.mrf.mxu1 }
  0xef   :  { %507 = vst.msk [vmem:[%s1439_s5 + $0x20] sm:$0xff] %vm502_vm0, %v443_v31  ;;  %v152_v32 = vpop.f32.mrf.mxu0 }
  0xf0   :  { %327 = vst [vmem:[%s1440_s4 + $0x10] sm:$0xff] %v726_v30  ;;  %v847_v33 = vpop.f32.mrf.mxu1 }
  0xf1   :  { %510 = vst.msk [vmem:[%s1439_s5 + $0x38] sm:$0xff] %vm502_vm0, %v847_v33  ;;  %v154_v34 = vpop.f32.mrf.mxu0 }
  0xf2   :  { %v727_v35 = vpack.c.bf16 %v154_v34, %v152_v32  ;;  %v453_v36 = vpop.f32.mrf.mxu1 }
  0xf3   :  { %509 = vst.msk [vmem:[%s1439_s5 + $0x30] sm:$0xff] %vm502_vm0, %v453_v36  ;;  %v158_v37 = vpop.f32.mrf.mxu0 }
  0xf4   :  { %328 = vst [vmem:[%s1440_s4 + $0x18] sm:$0xff] %v727_v35  ;;  %v850_v38 = vpop.f32.mrf.mxu1 }
  0xf5   :  { %512 = vst.msk [vmem:[%s1439_s5 + $0x48] sm:$0xff] %vm502_vm0, %v850_v38  ;;  %v160_v39 = vpop.f32.mrf.mxu0 }
  0xf6   :  { %v728_v40 = vpack.c.bf16 %v160_v39, %v158_v37  ;;  %v463_v41 = vpop.f32.mrf.mxu1 }
  0xf7   :  { %511 = vst.msk [vmem:[%s1439_s5 + $0x40] sm:$0xff] %vm502_vm0, %v463_v41  ;;  %v164_v42 = vpop.f32.mrf.mxu0 }
  0xf8   :  { %329 = vst [vmem:[%s1440_s4 + $0x20] sm:$0xff] %v728_v40  ;;  %v853_v43 = vpop.f32.mrf.mxu1 }
  0xf9   :  { %514 = vst.msk [vmem:[%s1439_s5 + $0x58] sm:$0xff] %vm502_vm0, %v853_v43  ;;  %v166_v44 = vpop.f32.mrf.mxu0 }
  0xfa   :  { %v729_v45 = vpack.c.bf16 %v166_v44, %v164_v42  ;;  %v473_v46 = vpop.f32.mrf.mxu1 }
  0xfb   :  { %513 = vst.msk [vmem:[%s1439_s5 + $0x50] sm:$0xff] %vm502_vm0, %v473_v46  ;;  %v170_v47 = vpop.f32.mrf.mxu0 }
  0xfc   :  { %330 = vst [vmem:[%s1440_s4 + $0x28] sm:$0xff] %v729_v45  ;;  %v856_v48 = vpop.f32.mrf.mxu1 }
  0xfd   :  { %516 = vst.msk [vmem:[%s1439_s5 + $0x68] sm:$0xff] %vm502_vm0, %v856_v48  ;;  %v172_v49 = vpop.f32.mrf.mxu0 }
  0xfe   :  { %v730_v50 = vpack.c.bf16 %v172_v49, %v170_v47  ;;  %v483_v51 = vpop.f32.mrf.mxu1 }
  0xff   :  { %515 = vst.msk [vmem:[%s1439_s5 + $0x60] sm:$0xff] %vm502_vm0, %v483_v51  ;;  %v176_v52 = vpop.f32.mrf.mxu0 }
 0x100   :  { %331 = vst [vmem:[%s1440_s4 + $0x30] sm:$0xff] %v730_v50  ;;  %v859_v53 = vpop.f32.mrf.mxu1 }
 0x101   :  { %518 = vst.msk [vmem:[%s1439_s5 + $0x78] sm:$0xff] %vm502_vm0, %v859_v53  ;;  %v178_v54 = vpop.f32.mrf.mxu0 }
 0x102   :  { %v731_v55 = vpack.c.bf16 %v178_v54, %v176_v52  ;;  %v493_v56 = vpop.f32.mrf.mxu1 }
 0x103   :  { %517 = vst.msk [vmem:[%s1439_s5 + $0x70] sm:$0xff] %vm502_vm0, %v493_v56  ;;  %v182_v57 = vpop.f32.mrf.mxu0 }
 0x104   :  { %332 = vst [vmem:[%s1440_s4 + $0x38] sm:$0xff] %v731_v55  ;;  %v894_v58 = vpop.f32.mrf.mxu1 }
 0x105   :  { %681 = vst.msk [vmem:[%s1441_s6 + $0x8] sm:$0xff] %vm502_vm0, %v894_v58  ;;  %v184_v59 = vpop.f32.mrf.mxu0 }
 0x106   :  { %v732_v60 = vpack.c.bf16 %v184_v59, %v182_v57  ;;  %v601_v61 = vpop.f32.mrf.mxu1 }
 0x107   :  { %680 = vst.msk [vmem:[%s1441_s6] sm:$0xff] %vm502_vm0, %v601_v61  ;;  %v188_v62 = vpop.f32.mrf.mxu0 }
 0x108   :  { %333 = vst [vmem:[%s1440_s4 + $0x40] sm:$0xff] %v732_v60  ;;  %v897_v63 = vpop.f32.mrf.mxu1 }
 0x109   :  { %683 = vst.msk [vmem:[%s1441_s6 + $0x18] sm:$0xff] %vm502_vm0, %v897_v63  ;;  %v190_v0 = vpop.f32.mrf.mxu0 }
 0x10a   :  { %v733_v1 = vpack.c.bf16 %v190_v0, %v188_v62  ;;  %v611_v2 = vpop.f32.mrf.mxu1 }
 0x10b   :  { %682 = vst.msk [vmem:[%s1441_s6 + $0x10] sm:$0xff] %vm502_vm0, %v611_v2  ;;  %v194_v4 = vpop.f32.mrf.mxu0 }
 0x10c   :  { %334 = vst [vmem:[%s1440_s4 + $0x48] sm:$0xff] %v733_v1  ;;  %v900_v5 = vpop.f32.mrf.mxu1 }
 0x10d   :  { %685 = vst.msk [vmem:[%s1441_s6 + $0x28] sm:$0xff] %vm502_vm0, %v900_v5  ;;  %v196_v6 = vpop.f32.mrf.mxu0 }
 0x10e   :  { %v734_v7 = vpack.c.bf16 %v196_v6, %v194_v4  ;;  %v621_v8 = vpop.f32.mrf.mxu1 }
 0x10f   :  { %684 = vst.msk [vmem:[%s1441_s6 + $0x20] sm:$0xff] %vm502_vm0, %v621_v8  ;;  %v200_v9 = vpop.f32.mrf.mxu0 }
 0x110   :  { %335 = vst [vmem:[%s1440_s4 + $0x50] sm:$0xff] %v734_v7  ;;  %v903_v10 = vpop.f32.mrf.mxu1 }
 0x111   :  { %687 = vst.msk [vmem:[%s1441_s6 + $0x38] sm:$0xff] %vm502_vm0, %v903_v10  ;;  %v202_v11 = vpop.f32.mrf.mxu0 }
 0x112   :  { %v735_v12 = vpack.c.bf16 %v202_v11, %v200_v9  ;;  %v631_v13 = vpop.f32.mrf.mxu1 }
 0x113   :  { %686 = vst.msk [vmem:[%s1441_s6 + $0x30] sm:$0xff] %vm502_vm0, %v631_v13  ;;  %v206_v14 = vpop.f32.mrf.mxu0 }
 0x114   :  { %336 = vst [vmem:[%s1440_s4 + $0x58] sm:$0xff] %v735_v12  ;;  %v906_v15 = vpop.f32.mrf.mxu1 }
 0x115   :  { %689 = vst.msk [vmem:[%s1441_s6 + $0x48] sm:$0xff] %vm502_vm0, %v906_v15  ;;  %v208_v16 = vpop.f32.mrf.mxu0 }
 0x116   :  { %v736_v17 = vpack.c.bf16 %v208_v16, %v206_v14  ;;  %v641_v18 = vpop.f32.mrf.mxu1 }
 0x117   :  { %688 = vst.msk [vmem:[%s1441_s6 + $0x40] sm:$0xff] %vm502_vm0, %v641_v18  ;;  %v212_v19 = vpop.f32.mrf.mxu0 }
 0x118   :  { %337 = vst [vmem:[%s1440_s4 + $0x60] sm:$0xff] %v736_v17  ;;  %v909_v20 = vpop.f32.mrf.mxu1 }
 0x119   :  { %691 = vst.msk [vmem:[%s1441_s6 + $0x58] sm:$0xff] %vm502_vm0, %v909_v20  ;;  %v214_v21 = vpop.f32.mrf.mxu0 }
 0x11a   :  { %v737_v22 = vpack.c.bf16 %v214_v21, %v212_v19  ;;  %v651_v3 = vpop.f32.mrf.mxu1 }
 0x11b   :  { %690 = vst.msk [vmem:[%s1441_s6 + $0x50] sm:$0xff] %vm502_vm0, %v651_v3  ;;  %v218_v23 = vpop.f32.mrf.mxu0 }
 0x11c   :  { %338 = vst [vmem:[%s1440_s4 + $0x68] sm:$0xff] %v737_v22  ;;  %v912_v24 = vpop.f32.mrf.mxu1 }
 0x11d   :  { %693 = vst.msk [vmem:[%s1441_s6 + $0x68] sm:$0xff] %vm502_vm0, %v912_v24  ;;  %v220_v25 = vpop.f32.mrf.mxu0 }
 0x11e   :  { %v738_v26 = vpack.c.bf16 %v220_v25, %v218_v23  ;;  %v661_v27 = vpop.f32.mrf.mxu1 }
 0x11f   :  { %692 = vst.msk [vmem:[%s1441_s6 + $0x60] sm:$0xff] %vm502_vm0, %v661_v27  ;;  %v224_v28 = vpop.f32.mrf.mxu0 }
 0x120   :  { %339 = vst [vmem:[%s1440_s4 + $0x70] sm:$0xff] %v738_v26  ;;  %v915_v29 = vpop.f32.mrf.mxu1 }
 0x121   :  { %695 = vst.msk [vmem:[%s1441_s6 + $0x78] sm:$0xff] %vm502_vm0, %v915_v29  ;;  %v226_v30 = vpop.f32.mrf.mxu0 }
 0x122   :  { %v739_v31 = vpack.c.bf16 %v226_v30, %v224_v28  ;;  %v671_v32 = vpop.f32.mrf.mxu1 }
 0x123   :  { %694 = vst.msk [vmem:[%s1441_s6 + $0x70] sm:$0xff] %vm502_vm0, %v671_v32 }
 0x124   :  { %340 = vst [vmem:[%s1440_s4 + $0x78] sm:$0xff] %v739_v31 }

// kernel: gat_net_forward.5
= control target key start
LH: loop header
LB: loop body
LE: loop exit
PB: predicated region body
PF: predicated region fallthrough
CT: control target
= control target key end

     0   :  { %v904_v0 = vmov 0   ;;  %s1296_s1 = inlined_call_operand.vmem [shape: f32[128,1], index: 1, kind: input, shape index: {}]   ;;  %s1297_s3 = inlined_call_operand.vmem [shape: bf16[128,256], index: 3, kind: input, shape index: {}]   ;;  %s1298_s0 = inlined_call_operand.vmem [shape: s8[128,128], index: 0, kind: input, shape index: {}]   ;;  %s1299_s2 = inlined_call_operand.vmem [shape: f32[1,128], index: 2, kind: input, shape index: {}]   ;;  %s1300_s4 = inlined_call_operand.vmem [shape: f32[1,256], index: 4, kind: input, shape index: {}]   ;;  %s1301_s5 = inlined_call_operand.vmem [shape: f32[128,256], index: 5, kind: output, shape index: {}]  }
   0x1   :  { %815 = vset.pattern.permute.xlu1 %v904_v0  ;;  %814 = vset.pattern.permute.xlu0 %v904_v0  ;;  %v29_v1 = vld [vmem:[%s1296_s1 + $0x40] sm:$0xff]  ;;  %v30_v3 = vld [vmem:[%s1296_s1 + $0x48] sm:$0xff]  ;;  %v24_v5 = vld [vmem:[%s1296_s1 + $0x18] sm:$0xff] }
   0x2   :  { %v21_v2 = vld [vmem:[%s1296_s1] sm:$0xff]  ;;  %80 = vperm.xlu1 %815, %v29_v1   ;;  %v22_v4 = vld [vmem:[%s1296_s1 + $0x8] sm:$0xff]  ;;  %500 = vmatprep.mubr.bf16.mxu0 %v904_v0  ;;  %v23_v6 = vld [vmem:[%s1296_s1 + $0x10] sm:$0xff] }
   0x3   :  { %40 = vperm.xlu0 %814, %v21_v2   ;;  %540 = vmatprep.mubr.bf16.mxu1 %v904_v0  ;;  %v32_v7 = vld [vmem:[%s1296_s1 + $0x58] sm:$0xff]  ;;  %v31_v8 = vld [vmem:[%s1296_s1 + $0x50] sm:$0xff]  ;;  %v26_v9 = vld [vmem:[%s1296_s1 + $0x28] sm:$0xff] }
   0x4   :  { %v25_v10 = vld [vmem:[%s1296_s1 + $0x20] sm:$0xff]  ;;  %v34_v11 = vld [vmem:[%s1296_s1 + $0x68] sm:$0xff]  ;;  %v28_v13 = vld [vmem:[%s1296_s1 + $0x38] sm:$0xff] }
   0x5   :  { %v33_v12 = vld [vmem:[%s1296_s1 + $0x60] sm:$0xff]  ;;  %v27_v14 = vld [vmem:[%s1296_s1 + $0x30] sm:$0xff]  ;;  %v36_v15 = vld [vmem:[%s1296_s1 + $0x78] sm:$0xff] }
   0x6   :  { %85 = vperm.xlu1 %815, %v30_v3   ;;  %v35_v16 = vld [vmem:[%s1296_s1 + $0x70] sm:$0xff]  ;;  %v819_v19 = vld [vmem:[%s1297_s3 + $0x64] ss:$8 sps:$4 sm:$0xff]   ;;  %v821_v20 = vld [vmem:[%s1297_s3 + $0x60] ss:$8 sps:$4 sm:$0xff]  }
   0x7   :  { %45 = vperm.xlu0 %814, %v22_v4   ;;  %v816_v17 = vld [vmem:[%s1297_s3 + $0x74] ss:$8 sps:$4 sm:$0xff]   ;;  %v818_v18 = vld [vmem:[%s1297_s3 + $0x70] ss:$8 sps:$4 sm:$0xff]   ;;  %v759_v21 = vld [vmem:[%s1298_s0] sm:$0xff]  }
   0x8   :  { %468 = vmatprep.subr.bf16.mxu0 %v816_v17  ;;  %790 = vmatprep.subr.bf16.mxu1 %v816_v17  ;;  %v809_v22 = vld [vmem:[%s1298_s0 + $0x10] sm:$0xff]   ;;  %v760_v23 = vunpack.c.0.s8 %v759_v21  ;;  %v1008_v24 = vld [vmem:[%s1299_s2] ss:$0 sm:$0xff]  ;;  %v761_v29 = vunpack.c.1.s8 %v759_v21  ;;  %v764_v39 = vunpack.c.2.s8 %v759_v21  ;;  %v765_v45 = vunpack.c.3.s8 %v759_v21  ;;  %v1022_v56 = vld [vmem:[%s1298_s0 + $0x8] sm:$0xff]  }
   0x9   :  { %469 = vmatpush1.bf16.msra.mxu0 %v818_v18  ;;  %798 = vmatpush1.bf16.msra.mxu1 %v818_v18  ;;  %v776_v25 = vunpack.c.0.s8 %v809_v22  ;;  %v777_v33 = vunpack.c.1.s8 %v809_v22  ;;  %v780_v52 = vunpack.c.2.s8 %v809_v22  ;;  %v781_v57 = vunpack.c.3.s8 %v809_v22 }
   0xa   :  { %55 = vperm.xlu1 %815, %v24_v5   ;;  %470 = vmatprep.subr.bf16.mxu0 %v819_v19  ;;  %v204_v28 = vcvt.s32.f32 %v760_v23  ;;  %v205_v38 = vcvt.s32.f32 %v761_v29  ;;  %v206_v51 = vcvt.s32.f32 %v764_v39  ;;  %v207_v60 = vcvt.s32.f32 %v765_v45  ;;  %v822_v23 = vld [vmem:[%s1297_s3 + $0x54] ss:$8 sps:$4 sm:$0xff]   ;;  %v824_v29 = vld [vmem:[%s1297_s3 + $0x50] ss:$8 sps:$4 sm:$0xff]  }
   0xb   :  { %50 = vperm.xlu0 %814, %v23_v6   ;;  %791 = vmatprep.subr.bf16.mxu1 %v819_v19  ;;  %v212_v32 = vcvt.s32.f32 %v776_v25  ;;  %v213_v44 = vcvt.s32.f32 %v777_v33  ;;  %v214_v3 = vcvt.s32.f32 %v780_v52  ;;  %v768_v4 = vunpack.c.0.s8 %v1022_v56 }
   0xc   :  { %vm220_vm0 = vcmp.gt.f32.partialorder %v204_v28, 0.0  ;;  %vm221_vm2 = vcmp.gt.f32.partialorder %v205_v38, 0.0  ;;  %vm222_vm4 = vcmp.gt.f32.partialorder %v206_v51, 0.0  ;;  %vm223_vm5 = vcmp.gt.f32.partialorder %v207_v60, 0.0 }
   0xd   :  { %471 = vmatpush1.bf16.msra.mxu0 %v821_v20  ;;  %799 = vmatpush1.bf16.msra.mxu1 %v821_v20  ;;  %vm228_vm1 = vcmp.gt.f32.partialorder %v212_v32, 0.0  ;;  %vm229_vm3 = vcmp.gt.f32.partialorder %v213_v44, 0.0  ;;  %vm230_vm6 = vcmp.gt.f32.partialorder %v214_v3, 0.0  ;;  %v208_v18 = vcvt.s32.f32 %v768_v4  ;;  %v827_v44 = vld [vmem:[%s1297_s3 + $0x40] ss:$8 sps:$4 sm:$0xff]  }
   0xe   :  { %95 = vperm.xlu1 %815, %v32_v7   ;;  %472 = vmatprep.subr.bf16.mxu0 %v822_v23 }
   0xf   :  { %90 = vperm.xlu0 %814, %v31_v8   ;;  %v215_v8 = vcvt.s32.f32 %v781_v57  ;;  %792 = vmatprep.subr.bf16.mxu1 %v822_v23  ;;  %vm224_vm8 = vcmp.gt.f32.partialorder %v208_v18, 0.0 }
  0x11   :  { %vm231_vm7 = vcmp.gt.f32.partialorder %v215_v8, 0.0  ;;  %473 = vmatpush1.bf16.msra.mxu0 %v824_v29  ;;  %800 = vmatpush1.bf16.msra.mxu1 %v824_v29  ;;  %v839_v29 = vld [vmem:[%s1297_s3] ss:$8 sps:$4 sm:$0xff]  }
  0x12   :  { %65 = vperm.xlu1 %815, %v26_v9   ;;  %v1037_v9 = vld [vmem:[%s1298_s0 + $0x18] sm:$0xff]  }
  0x13   :  { %60 = vperm.xlu0 %814, %v25_v10   ;;  %v784_v19 = vunpack.c.0.s8 %v1037_v9  ;;  %v785_v28 = vunpack.c.1.s8 %v1037_v9  ;;  %v788_v52 = vunpack.c.2.s8 %v1037_v9 }
  0x16   :  { %105 = vperm.xlu1 %815, %v34_v11  }
  0x17   :  { %100 = vperm.xlu0 %814, %v33_v12   ;;  %v769_v12 = vunpack.c.1.s8 %v1022_v56 }
  0x1a   :  { %75 = vperm.xlu1 %815, %v28_v13  }
  0x1b   :  { %70 = vperm.xlu0 %814, %v27_v14  }
  0x1e   :  { %115 = vperm.xlu1 %815, %v36_v15  }
  0x1f   :  { %110 = vperm.xlu0 %814, %v35_v16  }
  0x7d   :  { %v81_v26 = vpop.permute.xlu1 %80 }
  0x7e   :  { %v41_v27 = vpop.permute.xlu0 %40  ;;  %v132_v30 = vadd.f32 %v1008_v24, %v81_v26 }
  0x7f   :  { %v124_v31 = vadd.f32 %v1008_v24, %v41_v27  ;;  %v209_v27 = vcvt.s32.f32 %v769_v12 }
  0x80   :  { %v148_v34 = vmul.f32 0.2, %v132_v30 }
  0x81   :  { %v140_v35 = vmul.f32 0.2, %v124_v31  ;;  %v86_v36 = vpop.permute.xlu1 %85  ;;  %vm225_vm9 = vcmp.gt.f32.partialorder %v209_v27, 0.0 }
  0x82   :  { %v46_v37 = vpop.permute.xlu0 %45  ;;  %v133_v40 = vadd.f32 %v1008_v24, %v86_v36  ;;  %v164_v43 = vmax.f32 %v132_v30, %v148_v34  ;;  %v772_v36 = vunpack.c.2.s8 %v1022_v56 }
  0x83   :  { %v125_v41 = vadd.f32 %v1008_v24, %v46_v37  ;;  %v156_v42 = vmax.f32 %v124_v31, %v140_v35  ;;  %v216_v35 = vcvt.s32.f32 %v784_v19 }
  0x84   :  { %v149_v46 = vmul.f32 0.2, %v133_v40  ;;  %v1025_v58 = vsel %vm228_vm1, %v164_v43, -1e+30  ;;  %v217_v43 = vcvt.s32.f32 %v785_v28  ;;  %v210_v51 = vcvt.s32.f32 %v772_v36  ;;  %v837_v28 = vld [vmem:[%s1297_s3 + $0x4] ss:$8 sps:$4 sm:$0xff]  }
  0x85   :  { %v141_v47 = vmul.f32 0.2, %v125_v41  ;;  %v1014_v48 = vsel %vm220_vm0, %v156_v42, -1e+30  ;;  %v56_v49 = vpop.permute.xlu1 %55  ;;  %vm232_vm10 = vcmp.gt.f32.partialorder %v216_v35, 0.0 }
  0x86   :  { %v51_v50 = vpop.permute.xlu0 %50  ;;  %252 = vmax.xlane.f32.xlu0 %v1014_v48  ;;  %v127_v53 = vadd.f32 %v1008_v24, %v56_v49  ;;  %v165_v59 = vmax.f32 %v133_v40, %v149_v46  ;;  %v825_v40 = vld [vmem:[%s1297_s3 + $0x44] ss:$8 sps:$4 sm:$0xff]   ;;  %vm233_vm11 = vcmp.gt.f32.partialorder %v217_v43, 0.0  ;;  %vm226_vm12 = vcmp.gt.f32.partialorder %v210_v51, 0.0 }
  0x87   :  { %v126_v54 = vadd.f32 %v1008_v24, %v51_v50  ;;  %v157_v55 = vmax.f32 %v125_v41, %v141_v47  ;;  %474 = vmatprep.subr.bf16.mxu0 %v825_v40  ;;  %793 = vmatprep.subr.bf16.mxu1 %v825_v40 }
  0x88   :  { %v143_v61 = vmul.f32 0.2, %v127_v53  ;;  %v1040_v10 = vsel %vm229_vm3, %v165_v59, -1e+30  ;;  %475 = vmatpush1.bf16.msra.mxu0 %v827_v44  ;;  %v828_v59 = vld [vmem:[%s1297_s3 + $0x34] ss:$8 sps:$4 sm:$0xff]   ;;  %801 = vmatpush1.bf16.msra.mxu1 %v827_v44 }
  0x89   :  { %v142_v62 = vmul.f32 0.2, %v126_v54  ;;  %v1027_v63 = vsel %vm221_vm2, %v157_v55, -1e+30  ;;  %v96_v1 = vpop.permute.xlu1 %95  ;;  %476 = vmatprep.subr.bf16.mxu0 %v828_v59  ;;  %794 = vmatprep.subr.bf16.mxu1 %v828_v59 }
  0x8a   :  { %v91_v2 = vpop.permute.xlu0 %90  ;;  %254 = vmax.xlane.f32.xlu1 %v1027_v63  ;;  %268 = vmax.xlane.f32.xlu0 %v1025_v58  ;;  %v135_v5 = vadd.f32 %v1008_v24, %v96_v1  ;;  %v159_v11 = vmax.f32 %v127_v53, %v143_v61  ;;  %v773_v53 = vunpack.c.3.s8 %v1022_v56  ;;  %v830_v56 = vld [vmem:[%s1297_s3 + $0x30] ss:$8 sps:$4 sm:$0xff]  }
  0x8b   :  { %v134_v6 = vadd.f32 %v1008_v24, %v91_v2  ;;  %v158_v7 = vmax.f32 %v126_v54, %v142_v62 }
  0x8c   :  { %v151_v13 = vmul.f32 0.2, %v135_v5  ;;  %v1054_v25 = vsel %vm223_vm5, %v159_v11, -1e+30  ;;  %477 = vmatpush1.bf16.msra.mxu0 %v830_v56  ;;  %802 = vmatpush1.bf16.msra.mxu1 %v830_v56 }
  0x8d   :  { %v150_v14 = vmul.f32 0.2, %v134_v6  ;;  %v1043_v15 = vsel %vm222_vm4, %v158_v7, -1e+30  ;;  %v66_v16 = vpop.permute.xlu1 %65  ;;  %v789_v7 = vunpack.c.3.s8 %v1037_v9 }
  0x8e   :  { %v61_v17 = vpop.permute.xlu0 %60  ;;  %256 = vmax.xlane.f32.xlu1 %v1043_v15  ;;  %270 = vmax.xlane.f32.xlu0 %v1040_v10  ;;  %v129_v20 = vadd.f32 %v1008_v24, %v66_v16  ;;  %v167_v26 = vmax.f32 %v135_v5, %v151_v13  ;;  %v218_v5 = vcvt.s32.f32 %v788_v52  ;;  %v831_v13 = vld [vmem:[%s1297_s3 + $0x24] ss:$8 sps:$4 sm:$0xff]   ;;  %v833_v16 = vld [vmem:[%s1297_s3 + $0x20] ss:$8 sps:$4 sm:$0xff]  }
  0x8f   :  { %v128_v21 = vadd.f32 %v1008_v24, %v61_v17  ;;  %v166_v22 = vmax.f32 %v134_v6, %v150_v14  ;;  %v211_v6 = vcvt.s32.f32 %v773_v53  ;;  %478 = vmatprep.subr.bf16.mxu0 %v831_v13  ;;  %795 = vmatprep.subr.bf16.mxu1 %v831_v13 }
  0x90   :  { %v145_v30 = vmul.f32 0.2, %v129_v20  ;;  %v1071_v41 = vsel %vm231_vm7, %v167_v26, -1e+30  ;;  %vm234_vm13 = vcmp.gt.f32.partialorder %v218_v5, 0.0  ;;  %479 = vmatpush1.bf16.msra.mxu0 %v833_v16  ;;  %803 = vmatpush1.bf16.msra.mxu1 %v833_v16 }
  0x91   :  { %v144_v31 = vmul.f32 0.2, %v128_v21  ;;  %v1060_v32 = vsel %vm230_vm6, %v166_v22, -1e+30  ;;  %v106_v33 = vpop.permute.xlu1 %105  ;;  %vm227_vm14 = vcmp.gt.f32.partialorder %v211_v6, 0.0 }
  0x92   :  { %v101_v34 = vpop.permute.xlu0 %100  ;;  %272 = vmax.xlane.f32.xlu1 %v1060_v32  ;;  %258 = vmax.xlane.f32.xlu0 %v1054_v25  ;;  %v137_v37 = vadd.f32 %v1008_v24, %v106_v33  ;;  %v161_v42 = vmax.f32 %v129_v20, %v145_v30  ;;  %v836_v22 = vld [vmem:[%s1297_s3 + $0x10] ss:$8 sps:$4 sm:$0xff]  }
  0x93   :  { %v136_v38 = vadd.f32 %v1008_v24, %v101_v34  ;;  %v160_v39 = vmax.f32 %v128_v21, %v144_v31  ;;  %v834_v21 = vld [vmem:[%s1297_s3 + $0x14] ss:$8 sps:$4 sm:$0xff]  }
  0x94   :  { %v153_v45 = vmul.f32 0.2, %v137_v37  ;;  %v1089_v60 = vsel %vm225_vm9, %v161_v42, -1e+30  ;;  %480 = vmatprep.subr.bf16.mxu0 %v834_v21  ;;  %796 = vmatprep.subr.bf16.mxu1 %v834_v21 }
  0x95   :  { %v152_v46 = vmul.f32 0.2, %v136_v38  ;;  %v1077_v47 = vsel %vm224_vm8, %v160_v39, -1e+30  ;;  %v76_v49 = vpop.permute.xlu1 %75  ;;  %481 = vmatpush1.bf16.msra.mxu0 %v836_v22  ;;  %804 = vmatpush1.bf16.msra.mxu1 %v836_v22 }
  0x96   :  { %v71_v50 = vpop.permute.xlu0 %70  ;;  %260 = vmax.xlane.f32.xlu1 %v1077_v47  ;;  %274 = vmax.xlane.f32.xlu0 %v1071_v41  ;;  %v131_v54 = vadd.f32 %v1008_v24, %v76_v49  ;;  %v169_v61 = vmax.f32 %v137_v37, %v153_v45 }
  0x97   :  { %v130_v55 = vadd.f32 %v1008_v24, %v71_v50  ;;  %v168_v57 = vmax.f32 %v136_v38, %v152_v46  ;;  %482 = vmatprep.subr.bf16.mxu0 %v837_v28  ;;  %797 = vmatprep.subr.bf16.mxu1 %v837_v28 }
  0x98   :  { %v147_v62 = vmul.f32 0.2, %v131_v54  ;;  %v1106_v14 = vsel %vm233_vm11, %v169_v61, -1e+30 }
  0x99   :  { %v146_v1 = vmul.f32 0.2, %v130_v55  ;;  %v1095_v2 = vsel %vm232_vm10, %v168_v57, -1e+30  ;;  %v116_v3 = vpop.permute.xlu1 %115  ;;  %483 = vmatpush1.bf16.msra.mxu0 %v839_v29  ;;  %805 = vmatpush1.bf16.msra.mxu1 %v839_v29 }
  0x9a   :  { %v111_v4 = vpop.permute.xlu0 %110  ;;  %276 = vmax.xlane.f32.xlu1 %v1095_v2  ;;  %262 = vmax.xlane.f32.xlu0 %v1089_v60  ;;  %v139_v8 = vadd.f32 %v1008_v24, %v116_v3  ;;  %v163_v19 = vmax.f32 %v131_v54, %v147_v62 }
  0x9b   :  { %v138_v11 = vadd.f32 %v1008_v24, %v111_v4  ;;  %v162_v12 = vmax.f32 %v130_v55, %v146_v1  ;;  %v219_v24 = vcvt.s32.f32 %v789_v7 }
  0x9c   :  { %v155_v17 = vmul.f32 0.2, %v139_v8  ;;  %v1123_v26 = vsel %vm227_vm14, %v163_v19, -1e+30 }
  0x9d   :  { %v154_v9 = vmul.f32 0.2, %v138_v11  ;;  %v1111_v18 = vsel %vm226_vm12, %v162_v12, -1e+30  ;;  %vm235_vm15 = vcmp.gt.f32.partialorder %v219_v24, 0.0 }
  0x9e   :  { %264 = vmax.xlane.f32.xlu1 %v1111_v18  ;;  %278 = vmax.xlane.f32.xlu0 %v1106_v14  ;;  %v171_v27 = vmax.f32 %v139_v8, %v155_v17 }
  0x9f   :  { %v170_v20 = vmax.f32 %v138_v11, %v154_v9 }
  0xa0   :  { %v1133_v30 = vsel %vm235_vm15, %v171_v27, -1e+30 }
  0xa1   :  { %v1121_v23 = vsel %vm234_vm13, %v170_v20, -1e+30 }
  0xa2   :  { %280 = vmax.xlane.f32.xlu1 %v1121_v23  ;;  %266 = vmax.xlane.f32.xlu0 %v1123_v26 }
  0xa6   :  { %282 = vmax.xlane.f32.xlu0 %v1133_v30 }
 0x10f   :  { %v253_v31 = vpop.xlane.xlu0 %252 }
 0x110   :  { %v284_v33 = vsub.f32 %v1014_v48, %v253_v31 }
 0x112   :  { %v300_v34 = vmul.f32 1.442695, %v284_v33 }
 0x113   :  { %v255_v35 = vpop.xlane.xlu1 %254  ;;  %v269_v36 = vpop.xlane.xlu0 %268 }
 0x114   :  { %840 = vpow2.f32 %v300_v34  ;;  %v285_v37 = vsub.f32 %v1027_v63, %v255_v35  ;;  %v292_v38 = vsub.f32 %v1025_v58, %v269_v36 }
 0x116   :  { %v302_v39 = vmul.f32 1.442695, %v285_v37  ;;  %v316_v40 = vmul.f32 1.442695, %v292_v38 }
 0x117   :  { %v257_v42 = vpop.xlane.xlu1 %256  ;;  %v271_v43 = vpop.xlane.xlu0 %270 }
 0x118   :  { %842 = vpow2.f32 %v302_v39  ;;  %v286_v44 = vsub.f32 %v1043_v15, %v257_v42  ;;  %v293_v45 = vsub.f32 %v1040_v10, %v271_v43 }
 0x119   :  { %844 = vpow2.f32 %v316_v40 }
 0x11a   :  { %v304_v46 = vmul.f32 1.442695, %v286_v44  ;;  %v318_v49 = vmul.f32 1.442695, %v293_v45 }
 0x11b   :  { %v273_v48 = vpop.xlane.xlu1 %272  ;;  %v259_v50 = vpop.xlane.xlu0 %258 }
 0x11c   :  { %846 = vpow2.f32 %v304_v46  ;;  %v294_v51 = vsub.f32 %v1060_v32, %v273_v48  ;;  %v287_v63 = vsub.f32 %v1054_v25, %v259_v50  ;;  %v631_v50 = vlaneseq }
 0x11d   :  { %848 = vpow2.f32 %v318_v49 }
 0x11e   :  { %v306_v58 = vmul.f32 1.442695, %v287_v63  ;;  %v320_v52 = vmul.f32 1.442695, %v294_v51  ;;  %v632_v63 = vshrl.u32 %v631_v50, 7 }
 0x11f   :  { %v261_v53 = vpop.xlane.xlu1 %260  ;;  %v275_v54 = vpop.xlane.xlu0 %274 }
 0x120   :  { %v288_v55 = vsub.f32 %v1077_v47, %v261_v53  ;;  %v295_v15 = vsub.f32 %v1071_v41, %v275_v54  ;;  %850 = vpow2.f32 %v306_v58  ;;  %v629_v53 = vld [vmem:[%s1300_s4] sm:$0x3]  ;;  %v637_v54 = vsub.s32 1, %v632_v63 }
 0x121   :  { %v841_v10 = vpop.eup %840  ;;  %852 = vpow2.f32 %v320_v52  ;;  %v633_v52 = vsub.s32 0, %v632_v63 }
 0x122   :  { %v308_v57 = vmul.f32 1.442695, %v288_v55  ;;  %v322_v59 = vmul.f32 1.442695, %v295_v15  ;;  %332 = vadd.xlane.f32.xlu1 %v841_v10 }
 0x123   :  { %v277_v61 = vpop.xlane.xlu1 %276  ;;  %v263_v56 = vpop.xlane.xlu0 %262  ;;  %v1163_v15 = vrot.slane %v629_v53, %v633_v52 }
 0x124   :  { %854 = vpow2.f32 %v308_v57  ;;  %v296_v25 = vsub.f32 %v1095_v2, %v277_v61  ;;  %v289_v32 = vsub.f32 %v1089_v60, %v263_v56  ;;  %v1165_v61 = vrot.slane %v629_v53, %v637_v54 }
 0x125   :  { %v843_v62 = vpop.eup %842  ;;  %856 = vpow2.f32 %v322_v59 }
 0x126   :  { %v310_v1 = vmul.f32 1.442695, %v289_v32  ;;  %334 = vadd.xlane.f32.xlu0 %v843_v62  ;;  %v364_v47 = vpack.c.bf16 %v843_v62, %v841_v10  ;;  %v324_v3 = vmul.f32 1.442695, %v296_v25  ;;  %v845_v5 = vpop.eup %844 }
 0x127   :  { %v265_v41 = vpop.xlane.xlu1 %264  ;;  %v279_v4 = vpop.xlane.xlu0 %278 }
 0x128   :  { %v290_v6 = vsub.f32 %v1111_v18, %v265_v41  ;;  %v297_v7 = vsub.f32 %v1106_v14, %v279_v4  ;;  %501 = vmatmul.mubr.bf16.vlgmr.msra.gmra.mxu0 %v364_v47  ;;  %858 = vpow2.f32 %v310_v1 }
 0x129   :  { %v847_v8 = vpop.eup %846  ;;  %510 = vmatprep.mubr.bf16.mxu0 %v904_v0  ;;  %860 = vpow2.f32 %v324_v3 }
 0x12a   :  { %v849_v2 = vpop.eup %848  ;;  %v312_v60 = vmul.f32 1.442695, %v290_v6  ;;  %v326_v11 = vmul.f32 1.442695, %v297_v7  ;;  %336 = vadd.xlane.f32.xlu1 %v847_v8 }
 0x12b   :  { %v281_v12 = vpop.xlane.xlu1 %280  ;;  %v267_v13 = vpop.xlane.xlu0 %266  ;;  %v368_v16 = vpack.c.bf16 %v849_v2, %v845_v5 }
 0x12c   :  { %862 = vpow2.f32 %v312_v60  ;;  %v298_v17 = vsub.f32 %v1121_v23, %v281_v12  ;;  %v291_v9 = vsub.f32 %v1123_v26, %v267_v13 }
 0x12d   :  { %864 = vpow2.f32 %v326_v11  ;;  %541 = vmatmul.mubr.bf16.vlgmr.msra.gmra.mxu1 %v368_v16  ;;  %v851_v14 = vpop.eup %850 }
 0x12e   :  { %v314_v18 = vmul.f32 1.442695, %v291_v9  ;;  %550 = vmatprep.mubr.bf16.mxu1 %v904_v0  ;;  %v328_v19 = vmul.f32 1.442695, %v298_v17  ;;  %338 = vadd.xlane.f32.xlu0 %v851_v14  ;;  %v365_v20 = vpack.c.bf16 %v851_v14, %v847_v8  ;;  %v853_v21 = vpop.eup %852 }
 0x12f   :  { %v283_v24 = vpop.xlane.xlu0 %282 }
 0x130   :  { %v299_v22 = vsub.f32 %v1133_v30, %v283_v24  ;;  %866 = vpow2.f32 %v314_v18  ;;  %511 = vmatmul.mubr.bf16.gmra.mxu0 %v365_v20 }
 0x131   :  { %v855_v27 = vpop.eup %854  ;;  %520 = vmatprep.mubr.bf16.mxu0 %v904_v0  ;;  %868 = vpow2.f32 %v328_v19 }
 0x132   :  { %v857_v28 = vpop.eup %856  ;;  %v330_v23 = vmul.f32 1.442695, %v299_v22  ;;  %340 = vadd.xlane.f32.xlu1 %v855_v27 }
 0x133   :  { %v369_v26 = vpack.c.bf16 %v857_v28, %v853_v21 }
 0x134   :  { %870 = vpow2.f32 %v330_v23 }
 0x135   :  { %551 = vmatmul.mubr.bf16.gmra.mxu1 %v369_v26  ;;  %v859_v29 = vpop.eup %858 }
 0x136   :  { %560 = vmatprep.mubr.bf16.mxu1 %v904_v0  ;;  %342 = vadd.xlane.f32.xlu0 %v859_v29  ;;  %v366_v31 = vpack.c.bf16 %v859_v29, %v855_v27  ;;  %v861_v33 = vpop.eup %860 }
 0x138   :  { %521 = vmatmul.mubr.bf16.gmra.mxu0 %v366_v31 }
 0x139   :  { %v863_v34 = vpop.eup %862  ;;  %530 = vmatprep.mubr.bf16.mxu0 %v904_v0 }
 0x13a   :  { %v865_v30 = vpop.eup %864  ;;  %344 = vadd.xlane.f32.xlu1 %v863_v34 }
 0x13b   :  { %v370_v35 = vpack.c.bf16 %v865_v30, %v861_v33 }
 0x13d   :  { %561 = vmatmul.mubr.bf16.gmra.mxu1 %v370_v35  ;;  %v867_v36 = vpop.eup %866 }
 0x13e   :  { %348 = vadd.xlane.f32.xlu1 %v845_v5  ;;  %570 = vmatprep.mubr.bf16.mxu1 %v904_v0  ;;  %v367_v37 = vpack.c.bf16 %v867_v36, %v863_v34  ;;  %v869_v38 = vpop.eup %868 }
 0x13f   :  { %346 = vadd.xlane.f32.xlu0 %v867_v36 }
 0x140   :  { %531 = vmatmul.mubr.bf16.gmra.mxu0 %v367_v37 }
 0x141   :  { %v871_v39 = vpop.eup %870 }
 0x142   :  { %352 = vadd.xlane.f32.xlu1 %v853_v21  ;;  %v371_v40 = vpack.c.bf16 %v871_v39, %v869_v38 }
 0x143   :  { %350 = vadd.xlane.f32.xlu0 %v849_v2 }
 0x145   :  { %571 = vmatmul.mubr.bf16.gmra.mxu1 %v371_v40 }
 0x146   :  { %356 = vadd.xlane.f32.xlu1 %v861_v33 }
 0x147   :  { %354 = vadd.xlane.f32.xlu0 %v857_v28 }
 0x14a   :  { %360 = vadd.xlane.f32.xlu1 %v869_v38 }
 0x14b   :  { %358 = vadd.xlane.f32.xlu0 %v865_v30 }
 0x14f   :  { %362 = vadd.xlane.f32.xlu0 %v871_v39 }
 0x1ab   :  { %v333_v42 = vpop.xlane.xlu1 %332 }
 0x1ac   :  { %872 = vrcp.f32 %v333_v42 }
 0x1af   :  { %v335_v43 = vpop.xlane.xlu0 %334 }
 0x1b0   :  { %874 = vrcp.f32 %v335_v43 }
 0x1b3   :  { %v337_v44 = vpop.xlane.xlu1 %336 }
 0x1b7   :  { %v339_v45 = vpop.xlane.xlu0 %338 }
 0x1b9   :  { %v873_v10 = vpop.eup %872 }
 0x1bb   :  { %v341_v46 = vpop.xlane.xlu1 %340 }
 0x1bd   :  { %v875_v1 = vpop.eup %874 }
 0x1bf   :  { %v343_v0 = vpop.xlane.xlu0 %342 }
 0x1c3   :  { %v345_v49 = vpop.xlane.xlu1 %344 }
 0x1c7   :  { %v349_v51 = vpop.xlane.xlu1 %348 }
 0x1c8   :  { %v1158_v48 = vpop.xlane.xlu0 %346  ;;  %876 = vrcp.f32 %v349_v51 }
 0x1c9   :  { %878 = vrcp.f32 %v337_v44 }
 0x1cb   :  { %v353_v55 = vpop.xlane.xlu1 %352 }
 0x1cc   :  { %v351_v58 = vpop.xlane.xlu0 %350 }
 0x1cd   :  { %880 = vrcp.f32 %v351_v58 }
 0x1ce   :  { %882 = vrcp.f32 %v339_v45 }
 0x1cf   :  { %884 = vrcp.f32 %v353_v55  ;;  %v357_v41 = vpop.xlane.xlu1 %356 }
 0x1d0   :  { %v355_v56 = vpop.xlane.xlu0 %354  ;;  %886 = vrcp.f32 %v341_v46 }
 0x1d1   :  { %888 = vrcp.f32 %v355_v56 }
 0x1d2   :  { %890 = vrcp.f32 %v343_v0 }
 0x1d3   :  { %892 = vrcp.f32 %v357_v41  ;;  %v361_v42 = vpop.xlane.xlu1 %360 }
 0x1d4   :  { %v359_v21 = vpop.xlane.xlu0 %358  ;;  %894 = vrcp.f32 %v345_v49 }
 0x1d5   :  { %v877_v3 = vpop.eup %876  ;;  %896 = vrcp.f32 %v359_v21 }
 0x1d6   :  { %v879_v16 = vpop.eup %878  ;;  %898 = vrcp.f32 %v1158_v48 }
 0x1d7   :  { %900 = vrcp.f32 %v361_v42 }
 0x1d8   :  { %v363_v63 = vpop.xlane.xlu0 %362 }
 0x1d9   :  { %902 = vrcp.f32 %v363_v63 }
 0x1da   :  { %v881_v14 = vpop.eup %880 }
 0x1db   :  { %v883_v36 = vpop.eup %882 }
 0x1dc   :  { %v885_v40 = vpop.eup %884 }
 0x1dd   :  { %v887_v48 = vpop.eup %886 }
 0x1de   :  { %v889_v56 = vpop.eup %888 }
 0x1e8   :  { %v502_v57 = vpop.f32.mrf.mxu0 }
 0x1e9   :  { %v597_v59 = vmul.f32 %v873_v10, %v502_v57 }
 0x1ea   :  { %v504_v25 = vpop.f32.mrf.mxu0 }
 0x1eb   :  { %v641_v32 = vadd.f32 %v1163_v15, %v597_v59  ;;  %v598_v62 = vmul.f32 %v873_v10, %v504_v25 }
 0x1ec   :  { %v506_v47 = vpop.f32.mrf.mxu0 }
 0x1ed   :  { %v673_v4 = vmax.f32 %v641_v32, 0.0  ;;  %v642_v5 = vadd.f32 %v1165_v61, %v598_v62  ;;  %v599_v6 = vmul.f32 %v875_v1, %v506_v47  ;;  %v542_v7 = vpop.f32.mrf.mxu1 }
 0x1ee   :  { %v613_v8 = vmul.f32 %v877_v3, %v542_v7  ;;  %v508_v2 = vpop.f32.mrf.mxu0 }
 0x1ef   :  { %705 = vst [vmem:[%s1301_s5] sm:$0xff] %v673_v4  ;;  %v674_v60 = vmax.f32 %v642_v5, 0.0  ;;  %v643_v11 = vadd.f32 %v1163_v15, %v599_v6  ;;  %v600_v12 = vmul.f32 %v875_v1, %v508_v2  ;;  %v544_v13 = vpop.f32.mrf.mxu1  ;;  %v891_v5 = vpop.eup %890 }
 0x1f0   :  { %v657_v17 = vadd.f32 %v1163_v15, %v613_v8  ;;  %v614_v9 = vmul.f32 %v877_v3, %v544_v13  ;;  %v512_v24 = vpop.f32.mrf.mxu0 }
 0x1f1   :  { %706 = vst [vmem:[%s1301_s5 + $0x8] sm:$0xff] %v674_v60  ;;  %v675_v18 = vmax.f32 %v643_v11, 0.0  ;;  %v644_v19 = vadd.f32 %v1165_v61, %v600_v12  ;;  %v546_v20 = vpop.f32.mrf.mxu1  ;;  %v601_v28 = vmul.f32 %v879_v16, %v512_v24  ;;  %v893_v60 = vpop.eup %892 }
 0x1f2   :  { %v689_v22 = vmax.f32 %v657_v17, 0.0  ;;  %v658_v27 = vadd.f32 %v1165_v61, %v614_v9  ;;  %v615_v23 = vmul.f32 %v881_v14, %v546_v20  ;;  %v514_v29 = vpop.f32.mrf.mxu0 }
 0x1f3   :  { %707 = vst [vmem:[%s1301_s5 + $0x10] sm:$0xff] %v675_v18  ;;  %v676_v26 = vmax.f32 %v644_v19, 0.0  ;;  %v548_v31 = vpop.f32.mrf.mxu1  ;;  %v645_v34 = vadd.f32 %v1163_v15, %v601_v28  ;;  %v602_v35 = vmul.f32 %v879_v16, %v514_v29 }
 0x1f4   :  { %721 = vst [vmem:[%s1301_s5 + $0x80] sm:$0xff] %v689_v22  ;;  %v690_v33 = vmax.f32 %v658_v27, 0.0  ;;  %v659_v30 = vadd.f32 %v1163_v15, %v615_v23  ;;  %v616_v37 = vmul.f32 %v881_v14, %v548_v31  ;;  %v516_v38 = vpop.f32.mrf.mxu0  ;;  %v895_v22 = vpop.eup %894 }
 0x1f5   :  { %708 = vst [vmem:[%s1301_s5 + $0x18] sm:$0xff] %v676_v26  ;;  %v552_v39 = vpop.f32.mrf.mxu1  ;;  %v677_v43 = vmax.f32 %v645_v34, 0.0  ;;  %v646_v45 = vadd.f32 %v1165_v61, %v602_v35  ;;  %v603_v46 = vmul.f32 %v883_v36, %v516_v38 }
 0x1f6   :  { %722 = vst [vmem:[%s1301_s5 + $0x88] sm:$0xff] %v690_v33  ;;  %v691_v44 = vmax.f32 %v659_v30, 0.0  ;;  %v660_v0 = vadd.f32 %v1165_v61, %v616_v37  ;;  %v617_v49 = vmul.f32 %v885_v40, %v552_v39  ;;  %v518_v50 = vpop.f32.mrf.mxu0  ;;  %v897_v30 = vpop.eup %896 }
 0x1f7   :  { %v554_v51 = vpop.f32.mrf.mxu1  ;;  %709 = vst [vmem:[%s1301_s5 + $0x20] sm:$0xff] %v677_v43  ;;  %v678_v58 = vmax.f32 %v646_v45, 0.0  ;;  %v647_v52 = vadd.f32 %v1163_v15, %v603_v46  ;;  %v604_v53 = vmul.f32 %v883_v36, %v518_v50 }
 0x1f8   :  { %723 = vst [vmem:[%s1301_s5 + $0x90] sm:$0xff] %v691_v44  ;;  %v618_v54 = vmul.f32 %v885_v40, %v554_v51  ;;  %v692_v55 = vmax.f32 %v660_v0, 0.0  ;;  %v661_v10 = vadd.f32 %v1163_v15, %v617_v49  ;;  %v522_v57 = vpop.f32.mrf.mxu0  ;;  %v899_v44 = vpop.eup %898 }
 0x1f9   :  { %v556_v59 = vpop.f32.mrf.mxu1  ;;  %710 = vst [vmem:[%s1301_s5 + $0x28] sm:$0xff] %v678_v58  ;;  %v679_v25 = vmax.f32 %v647_v52, 0.0  ;;  %v648_v32 = vadd.f32 %v1165_v61, %v604_v53  ;;  %v605_v1 = vmul.f32 %v887_v48, %v522_v57  ;;  %v901_v52 = vpop.eup %900 }
 0x1fa   :  { %v662_v62 = vadd.f32 %v1165_v61, %v618_v54  ;;  %724 = vst [vmem:[%s1301_s5 + $0x98] sm:$0xff] %v692_v55  ;;  %v693_v47 = vmax.f32 %v661_v10, 0.0  ;;  %v619_v3 = vmul.f32 %v889_v56, %v556_v59  ;;  %v524_v41 = vpop.f32.mrf.mxu0 }
 0x1fb   :  { %v558_v4 = vpop.f32.mrf.mxu1  ;;  %711 = vst [vmem:[%s1301_s5 + $0x30] sm:$0xff] %v679_v25  ;;  %v680_v6 = vmax.f32 %v648_v32, 0.0  ;;  %v649_v8 = vadd.f32 %v1163_v15, %v605_v1  ;;  %v606_v2 = vmul.f32 %v887_v48, %v524_v41  ;;  %v903_v25 = vpop.eup %902 }
 0x1fc   :  { %v694_v7 = vmax.f32 %v662_v62, 0.0  ;;  %725 = vst [vmem:[%s1301_s5 + $0xa0] sm:$0xff] %v693_v47  ;;  %v663_v11 = vadd.f32 %v1163_v15, %v619_v3  ;;  %v620_v12 = vmul.f32 %v889_v56, %v558_v4  ;;  %v526_v13 = vpop.f32.mrf.mxu0 }
 0x1fd   :  { %v562_v16 = vpop.f32.mrf.mxu1  ;;  %712 = vst [vmem:[%s1301_s5 + $0x38] sm:$0xff] %v680_v6  ;;  %v681_v17 = vmax.f32 %v649_v8, 0.0  ;;  %v650_v9 = vadd.f32 %v1165_v61, %v606_v2  ;;  %v607_v14 = vmul.f32 %v891_v5, %v526_v13 }
 0x1fe   :  { %726 = vst [vmem:[%s1301_s5 + $0xa8] sm:$0xff] %v694_v7  ;;  %v621_v18 = vmul.f32 %v893_v60, %v562_v16  ;;  %v695_v19 = vmax.f32 %v663_v11, 0.0  ;;  %v664_v24 = vadd.f32 %v1165_v61, %v620_v12  ;;  %v528_v20 = vpop.f32.mrf.mxu0 }
 0x1ff   :  { %v564_v21 = vpop.f32.mrf.mxu1  ;;  %713 = vst [vmem:[%s1301_s5 + $0x40] sm:$0xff] %v681_v17  ;;  %v682_v27 = vmax.f32 %v650_v9, 0.0  ;;  %v651_v28 = vadd.f32 %v1163_v15, %v607_v14  ;;  %v608_v26 = vmul.f32 %v891_v5, %v528_v20 }
 0x200   :  { %v665_v23 = vadd.f32 %v1163_v15, %v621_v18  ;;  %727 = vst [vmem:[%s1301_s5 + $0xb0] sm:$0xff] %v695_v19  ;;  %v696_v29 = vmax.f32 %v664_v24, 0.0  ;;  %v622_v31 = vmul.f32 %v893_v60, %v564_v21  ;;  %v532_v33 = vpop.f32.mrf.mxu0 }
 0x201   :  { %v566_v34 = vpop.f32.mrf.mxu1  ;;  %714 = vst [vmem:[%s1301_s5 + $0x48] sm:$0xff] %v682_v27  ;;  %v683_v35 = vmax.f32 %v651_v28, 0.0  ;;  %v652_v37 = vadd.f32 %v1165_v61, %v608_v26  ;;  %v609_v38 = vmul.f32 %v895_v22, %v532_v33 }
 0x202   :  { %v697_v36 = vmax.f32 %v665_v23, 0.0  ;;  %728 = vst [vmem:[%s1301_s5 + $0xb8] sm:$0xff] %v696_v29  ;;  %v666_v39 = vadd.f32 %v1165_v61, %v622_v31  ;;  %v623_v40 = vmul.f32 %v897_v30, %v566_v34  ;;  %v534_v42 = vpop.f32.mrf.mxu0 }
 0x203   :  { %v568_v43 = vpop.f32.mrf.mxu1  ;;  %715 = vst [vmem:[%s1301_s5 + $0x50] sm:$0xff] %v683_v35  ;;  %v684_v45 = vmax.f32 %v652_v37, 0.0  ;;  %v653_v46 = vadd.f32 %v1163_v15, %v609_v38  ;;  %v610_v0 = vmul.f32 %v895_v22, %v534_v42 }
 0x204   :  { %729 = vst [vmem:[%s1301_s5 + $0xc0] sm:$0xff] %v697_v36  ;;  %v624_v49 = vmul.f32 %v897_v30, %v568_v43  ;;  %v698_v50 = vmax.f32 %v666_v39, 0.0  ;;  %v667_v51 = vadd.f32 %v1163_v15, %v623_v40  ;;  %v536_v63 = vpop.f32.mrf.mxu0 }
 0x205   :  { %v572_v58 = vpop.f32.mrf.mxu1  ;;  %716 = vst [vmem:[%s1301_s5 + $0x58] sm:$0xff] %v684_v45  ;;  %v685_v53 = vmax.f32 %v653_v46, 0.0  ;;  %v654_v54 = vadd.f32 %v1165_v61, %v610_v0  ;;  %v611_v55 = vmul.f32 %v899_v44, %v536_v63 }
 0x206   :  { %v668_v48 = vadd.f32 %v1165_v61, %v624_v49  ;;  %730 = vst [vmem:[%s1301_s5 + $0xc8] sm:$0xff] %v698_v50  ;;  %v699_v10 = vmax.f32 %v667_v51, 0.0  ;;  %v625_v57 = vmul.f32 %v901_v52, %v572_v58  ;;  %v538_v59 = vpop.f32.mrf.mxu0 }
 0x207   :  { %v574_v56 = vpop.f32.mrf.mxu1  ;;  %717 = vst [vmem:[%s1301_s5 + $0x60] sm:$0xff] %v685_v53  ;;  %v686_v32 = vmax.f32 %v654_v54, 0.0  ;;  %v655_v1 = vadd.f32 %v1163_v15, %v611_v55  ;;  %v612_v47 = vmul.f32 %v899_v44, %v538_v59 }
 0x208   :  { %v700_v62 = vmax.f32 %v668_v48, 0.0  ;;  %731 = vst [vmem:[%s1301_s5 + $0xd0] sm:$0xff] %v699_v10  ;;  %v669_v3 = vadd.f32 %v1163_v15, %v625_v57  ;;  %v626_v41 = vmul.f32 %v901_v52, %v574_v56 }
 0x209   :  { %v576_v4 = vpop.f32.mrf.mxu1  ;;  %718 = vst [vmem:[%s1301_s5 + $0x68] sm:$0xff] %v686_v32  ;;  %v687_v5 = vmax.f32 %v655_v1, 0.0  ;;  %v656_v6 = vadd.f32 %v1165_v61, %v612_v47 }
 0x20a   :  { %732 = vst [vmem:[%s1301_s5 + $0xd8] sm:$0xff] %v700_v62  ;;  %v627_v7 = vmul.f32 %v903_v25, %v576_v4  ;;  %v701_v8 = vmax.f32 %v669_v3, 0.0  ;;  %v670_v2 = vadd.f32 %v1165_v61, %v626_v41 }
 0x20b   :  { %v578_v60 = vpop.f32.mrf.mxu1  ;;  %719 = vst [vmem:[%s1301_s5 + $0x70] sm:$0xff] %v687_v5  ;;  %v688_v11 = vmax.f32 %v656_v6, 0.0 }
 0x20c   :  { %v671_v12 = vadd.f32 %v1163_v15, %v627_v7  ;;  %v628_v13 = vmul.f32 %v903_v25, %v578_v60  ;;  %733 = vst [vmem:[%s1301_s5 + $0xe0] sm:$0xff] %v701_v8  ;;  %v702_v16 = vmax.f32 %v670_v2, 0.0 }
 0x20d   :  { %720 = vst [vmem:[%s1301_s5 + $0x78] sm:$0xff] %v688_v11 }
 0x20e   :  { %v703_v17 = vmax.f32 %v671_v12, 0.0  ;;  %v672_v9 = vadd.f32 %v1165_v61, %v628_v13  ;;  %734 = vst [vmem:[%s1301_s5 + $0xe8] sm:$0xff] %v702_v16 }
 0x210   :  { %735 = vst [vmem:[%s1301_s5 + $0xf0] sm:$0xff] %v703_v17  ;;  %v704_v15 = vmax.f32 %v672_v9, 0.0 }
 0x212   :  { %736 = vst [vmem:[%s1301_s5 + $0xf8] sm:$0xff] %v704_v15 }

// kernel: gat_net_forward.6
= control target key start
LH: loop header
LB: loop body
LE: loop exit
PB: predicated region body
PF: predicated region fallthrough
CT: control target
= control target key end

     0   :  { %vm486_vm0 = vcmask 7168   ;;  %s1780_s1 = inlined_call_operand.vmem [shape: f32[256,128], index: 1, kind: input, shape index: {}]   ;;  %s1781_s0 = inlined_call_operand.vmem [shape: f32[128,256], index: 0, kind: input, shape index: {}]   ;;  %s1782_s2 = inlined_call_operand.vmem [shape: f32[256,1], index: 2, kind: input, shape index: {}]   ;;  %s1783_s3 = inlined_call_operand.vmem [shape: f32[256,1], index: 3, kind: input, shape index: {}]   ;;  %s1784_s4 = inlined_call_operand.vmem [shape: bf16[128,128], index: 4, kind: output, shape index: {0}]   ;;  %s1785_s5 = inlined_call_operand.vmem [shape: f32[128,1], index: 5, kind: output, shape index: {1}]   ;;  %s1786_s6 = inlined_call_operand.vmem [shape: f32[128,1], index: 6, kind: output, shape index: {2}]  }
   0x1   :  { %v83_v0 = vld [vmem:[%s1780_s1 + $0xf8] sm:$0xff]  ;;  %v82_v2 = vld [vmem:[%s1780_s1 + $0xf0] sm:$0xff]  ;;  %v81_v4 = vld [vmem:[%s1780_s1 + $0xe8] sm:$0xff] }
   0x2   :  { %v67_v1 = vld [vmem:[%s1780_s1 + $0x78] sm:$0xff]  ;;  %787 = vmatprep.subr.mxu0 %v83_v0  ;;  %1027 = vmatprep.subr.mxu1 %v83_v0  ;;  %v66_v3 = vld [vmem:[%s1780_s1 + $0x70] sm:$0xff]  ;;  %v65_v5 = vld [vmem:[%s1780_s1 + $0x68] sm:$0xff] }
   0x3   :  { %788 = vmatpush3.msra.mxu0 %v67_v1  ;;  %1043 = vmatpush3.msra.mxu1 %v67_v1  ;;  %v80_v6 = vld [vmem:[%s1780_s1 + $0xe0] sm:$0xff]  ;;  %v79_v8 = vld [vmem:[%s1780_s1 + $0xd8] sm:$0xff]  ;;  %v78_v10 = vld [vmem:[%s1780_s1 + $0xd0] sm:$0xff] }
   0x4   :  { %789 = vmatprep.subr.mxu0 %v82_v2  ;;  %1028 = vmatprep.subr.mxu1 %v82_v2  ;;  %v64_v7 = vld [vmem:[%s1780_s1 + $0x60] sm:$0xff]  ;;  %v63_v9 = vld [vmem:[%s1780_s1 + $0x58] sm:$0xff]  ;;  %v62_v11 = vld [vmem:[%s1780_s1 + $0x50] sm:$0xff] }
   0x5   :  { %790 = vmatpush3.msra.mxu0 %v66_v3  ;;  %1044 = vmatpush3.msra.mxu1 %v66_v3  ;;  %v77_v12 = vld [vmem:[%s1780_s1 + $0xc8] sm:$0xff]  ;;  %v76_v14 = vld [vmem:[%s1780_s1 + $0xc0] sm:$0xff]  ;;  %v75_v16 = vld [vmem:[%s1780_s1 + $0xb8] sm:$0xff] }
   0x6   :  { %791 = vmatprep.subr.mxu0 %v81_v4  ;;  %1029 = vmatprep.subr.mxu1 %v81_v4  ;;  %v61_v13 = vld [vmem:[%s1780_s1 + $0x48] sm:$0xff]  ;;  %v60_v15 = vld [vmem:[%s1780_s1 + $0x40] sm:$0xff]  ;;  %v59_v17 = vld [vmem:[%s1780_s1 + $0x38] sm:$0xff] }
   0x7   :  { %792 = vmatpush3.msra.mxu0 %v65_v5  ;;  %1045 = vmatpush3.msra.mxu1 %v65_v5  ;;  %v74_v18 = vld [vmem:[%s1780_s1 + $0xb0] sm:$0xff]  ;;  %v73_v20 = vld [vmem:[%s1780_s1 + $0xa8] sm:$0xff]  ;;  %v72_v22 = vld [vmem:[%s1780_s1 + $0xa0] sm:$0xff] }
   0x8   :  { %793 = vmatprep.subr.mxu0 %v80_v6  ;;  %1030 = vmatprep.subr.mxu1 %v80_v6  ;;  %v58_v19 = vld [vmem:[%s1780_s1 + $0x30] sm:$0xff]  ;;  %v57_v21 = vld [vmem:[%s1780_s1 + $0x28] sm:$0xff]  ;;  %v56_v23 = vld [vmem:[%s1780_s1 + $0x20] sm:$0xff] }
   0x9   :  { %794 = vmatpush3.msra.mxu0 %v64_v7  ;;  %1046 = vmatpush3.msra.mxu1 %v64_v7  ;;  %v71_v24 = vld [vmem:[%s1780_s1 + $0x98] sm:$0xff]  ;;  %v70_v26 = vld [vmem:[%s1780_s1 + $0x90] sm:$0xff]  ;;  %v69_v28 = vld [vmem:[%s1780_s1 + $0x88] sm:$0xff] }
   0xa   :  { %795 = vmatprep.subr.mxu0 %v79_v8  ;;  %1031 = vmatprep.subr.mxu1 %v79_v8  ;;  %v55_v25 = vld [vmem:[%s1780_s1 + $0x18] sm:$0xff]  ;;  %v54_v27 = vld [vmem:[%s1780_s1 + $0x10] sm:$0xff]  ;;  %v53_v29 = vld [vmem:[%s1780_s1 + $0x8] sm:$0xff] }
   0xb   :  { %796 = vmatpush3.msra.mxu0 %v63_v9  ;;  %1047 = vmatpush3.msra.mxu1 %v63_v9  ;;  %v68_v30 = vld [vmem:[%s1780_s1 + $0x80] sm:$0xff]  ;;  %v1193_v32 = vld [vmem:[%s1781_s0 + $0x8] sm:$0xff]  ;;  %v340_v36 = vld [vmem:[%s1782_s2 + $0xf8] sm:$0xff] }
   0xc   :  { %797 = vmatprep.subr.mxu0 %v78_v10  ;;  %1032 = vmatprep.subr.mxu1 %v78_v10  ;;  %v52_v31 = vld [vmem:[%s1780_s1] sm:$0xff]  ;;  %v1198_v33 = vld [vmem:[%s1781_s0 + $0x88] sm:$0xff]  ;;  %v534_v37 = vld [vmem:[%s1783_s3 + $0xf8] sm:$0xff] }
   0xd   :  { %798 = vmatpush3.msra.mxu0 %v62_v11  ;;  %1048 = vmatpush3.msra.mxu1 %v62_v11  ;;  %v1203_v34 = vld [vmem:[%s1781_s0] sm:$0xff]  ;;  %v324_v38 = vld [vmem:[%s1782_s2 + $0x78] sm:$0xff]  ;;  %v339_v40 = vld [vmem:[%s1782_s2 + $0xf0] sm:$0xff] }
   0xe   :  { %799 = vmatprep.subr.mxu0 %v77_v12  ;;  %1033 = vmatprep.subr.mxu1 %v77_v12  ;;  %v1208_v35 = vld [vmem:[%s1781_s0 + $0x80] sm:$0xff]  ;;  %v518_v39 = vld [vmem:[%s1783_s3 + $0x78] sm:$0xff]  ;;  %v533_v41 = vld [vmem:[%s1783_s3 + $0xf0] sm:$0xff] }
   0xf   :  { %800 = vmatpush3.msra.mxu0 %v61_v13  ;;  %1049 = vmatpush3.msra.mxu1 %v61_v13  ;;  %v1235_v42 = vld [vmem:[%s1781_s0 + $0x18] sm:$0xff]  ;;  %v323_v44 = vld [vmem:[%s1782_s2 + $0x70] sm:$0xff]  ;;  %v338_v48 = vld [vmem:[%s1782_s2 + $0xe8] sm:$0xff] }
  0x10   :  { %801 = vmatprep.subr.mxu0 %v76_v14  ;;  %1034 = vmatprep.subr.mxu1 %v76_v14  ;;  %v1240_v43 = vld [vmem:[%s1781_s0 + $0x98] sm:$0xff]  ;;  %v517_v45 = vld [vmem:[%s1783_s3 + $0x70] sm:$0xff]  ;;  %v532_v49 = vld [vmem:[%s1783_s3 + $0xe8] sm:$0xff] }
  0x11   :  { %802 = vmatpush3.msra.mxu0 %v60_v15  ;;  %1050 = vmatpush3.msra.mxu1 %v60_v15  ;;  %v1251_v46 = vld [vmem:[%s1781_s0 + $0x10] sm:$0xff]  ;;  %v322_v50 = vld [vmem:[%s1782_s2 + $0x68] sm:$0xff]  ;;  %v337_v52 = vld [vmem:[%s1782_s2 + $0xe0] sm:$0xff] }
  0x12   :  { %803 = vmatprep.subr.mxu0 %v75_v16  ;;  %1035 = vmatprep.subr.mxu1 %v75_v16  ;;  %v1256_v47 = vld [vmem:[%s1781_s0 + $0x90] sm:$0xff]  ;;  %v516_v51 = vld [vmem:[%s1783_s3 + $0x68] sm:$0xff]  ;;  %v531_v53 = vld [vmem:[%s1783_s3 + $0xe0] sm:$0xff] }
  0x13   :  { %804 = vmatpush3.msra.mxu0 %v59_v17  ;;  %1051 = vmatpush3.msra.mxu1 %v59_v17  ;;  %v1283_v54 = vld [vmem:[%s1781_s0 + $0x28] sm:$0xff]  ;;  %v321_v56 = vld [vmem:[%s1782_s2 + $0x60] sm:$0xff]  ;;  %v336_v60 = vld [vmem:[%s1782_s2 + $0xd8] sm:$0xff] }
  0x14   :  { %805 = vmatprep.subr.mxu0 %v74_v18  ;;  %1036 = vmatprep.subr.mxu1 %v74_v18  ;;  %v1288_v55 = vld [vmem:[%s1781_s0 + $0xa8] sm:$0xff]  ;;  %v515_v57 = vld [vmem:[%s1783_s3 + $0x60] sm:$0xff]  ;;  %v530_v61 = vld [vmem:[%s1783_s3 + $0xd8] sm:$0xff] }
  0x15   :  { %806 = vmatpush3.msra.mxu0 %v58_v19  ;;  %1052 = vmatpush3.msra.mxu1 %v58_v19  ;;  %v1299_v58 = vld [vmem:[%s1781_s0 + $0x20] sm:$0xff]  ;;  %v320_v62 = vld [vmem:[%s1782_s2 + $0x58] sm:$0xff]  ;;  %v335_v0 = vld [vmem:[%s1782_s2 + $0xd0] sm:$0xff] }
  0x16   :  { %807 = vmatprep.subr.mxu0 %v73_v20  ;;  %1037 = vmatprep.subr.mxu1 %v73_v20  ;;  %v1304_v59 = vld [vmem:[%s1781_s0 + $0xa0] sm:$0xff]  ;;  %v514_v63 = vld [vmem:[%s1783_s3 + $0x58] sm:$0xff]  ;;  %v529_v1 = vld [vmem:[%s1783_s3 + $0xd0] sm:$0xff] }
  0x17   :  { %808 = vmatpush3.msra.mxu0 %v57_v21  ;;  %1053 = vmatpush3.msra.mxu1 %v57_v21  ;;  %v1331_v2 = vld [vmem:[%s1781_s0 + $0x38] sm:$0xff]  ;;  %v319_v4 = vld [vmem:[%s1782_s2 + $0x50] sm:$0xff]  ;;  %v334_v8 = vld [vmem:[%s1782_s2 + $0xc8] sm:$0xff] }
  0x18   :  { %809 = vmatprep.subr.mxu0 %v72_v22  ;;  %1038 = vmatprep.subr.mxu1 %v72_v22  ;;  %v1336_v3 = vld [vmem:[%s1781_s0 + $0xb8] sm:$0xff]  ;;  %v513_v5 = vld [vmem:[%s1783_s3 + $0x50] sm:$0xff]  ;;  %v528_v9 = vld [vmem:[%s1783_s3 + $0xc8] sm:$0xff] }
  0x19   :  { %810 = vmatpush3.msra.mxu0 %v56_v23  ;;  %1054 = vmatpush3.msra.mxu1 %v56_v23  ;;  %v1347_v6 = vld [vmem:[%s1781_s0 + $0x30] sm:$0xff]  ;;  %v318_v10 = vld [vmem:[%s1782_s2 + $0x48] sm:$0xff]  ;;  %v333_v12 = vld [vmem:[%s1782_s2 + $0xc0] sm:$0xff] }
  0x1a   :  { %811 = vmatprep.subr.mxu0 %v71_v24  ;;  %1039 = vmatprep.subr.mxu1 %v71_v24  ;;  %v1352_v7 = vld [vmem:[%s1781_s0 + $0xb0] sm:$0xff]  ;;  %v512_v11 = vld [vmem:[%s1783_s3 + $0x48] sm:$0xff]  ;;  %v527_v13 = vld [vmem:[%s1783_s3 + $0xc0] sm:$0xff] }
  0x1b   :  { %812 = vmatpush3.msra.mxu0 %v55_v25  ;;  %1055 = vmatpush3.msra.mxu1 %v55_v25  ;;  %v1379_v14 = vld [vmem:[%s1781_s0 + $0x48] sm:$0xff]  ;;  %v317_v16 = vld [vmem:[%s1782_s2 + $0x40] sm:$0xff]  ;;  %v332_v20 = vld [vmem:[%s1782_s2 + $0xb8] sm:$0xff] }
  0x1c   :  { %813 = vmatprep.subr.mxu0 %v70_v26  ;;  %1040 = vmatprep.subr.mxu1 %v70_v26  ;;  %v1384_v15 = vld [vmem:[%s1781_s0 + $0xc8] sm:$0xff]  ;;  %v511_v17 = vld [vmem:[%s1783_s3 + $0x40] sm:$0xff]  ;;  %v526_v21 = vld [vmem:[%s1783_s3 + $0xb8] sm:$0xff] }
  0x1d   :  { %814 = vmatpush3.msra.mxu0 %v54_v27  ;;  %1056 = vmatpush3.msra.mxu1 %v54_v27  ;;  %v1395_v18 = vld [vmem:[%s1781_s0 + $0x40] sm:$0xff]  ;;  %v316_v22 = vld [vmem:[%s1782_s2 + $0x38] sm:$0xff]  ;;  %v331_v24 = vld [vmem:[%s1782_s2 + $0xb0] sm:$0xff] }
  0x1e   :  { %815 = vmatprep.subr.mxu0 %v69_v28  ;;  %1041 = vmatprep.subr.mxu1 %v69_v28  ;;  %v1400_v19 = vld [vmem:[%s1781_s0 + $0xc0] sm:$0xff]  ;;  %v510_v23 = vld [vmem:[%s1783_s3 + $0x38] sm:$0xff]  ;;  %v525_v25 = vld [vmem:[%s1783_s3 + $0xb0] sm:$0xff] }
  0x1f   :  { %816 = vmatpush3.msra.mxu0 %v53_v29  ;;  %1057 = vmatpush3.msra.mxu1 %v53_v29  ;;  %v1427_v26 = vld [vmem:[%s1781_s0 + $0x58] sm:$0xff]  ;;  %v315_v28 = vld [vmem:[%s1782_s2 + $0x30] sm:$0xff] }
  0x20   :  { %817 = vmatprep.subr.mxu0 %v68_v30  ;;  %1042 = vmatprep.subr.mxu1 %v68_v30  ;;  %v1432_v27 = vld [vmem:[%s1781_s0 + $0xd8] sm:$0xff]  ;;  %v509_v29 = vld [vmem:[%s1783_s3 + $0x30] sm:$0xff] }
  0x21   :  { %818 = vmatpush3.msra.mxu0 %v52_v31  ;;  %1058 = vmatpush3.msra.mxu1 %v52_v31  ;;  %v1443_v30 = vld [vmem:[%s1781_s0 + $0x50] sm:$0xff] }
  0x22   :  { %148 = vmatprep.mubr.f32.mxu0 %v1193_v32  ;;  %188 = vmatprep.mubr.f32.mxu1 %v1198_v33  ;;  %v1448_v31 = vld [vmem:[%s1781_s0 + $0xd0] sm:$0xff] }
  0x23   :  { %149 = vmatmul.mubr.f32.vlgmr.msra.gmra.mxu0 %v1203_v34  ;;  %189 = vmatmul.mubr.f32.vlgmr.msra.gmra.mxu1 %v1208_v35 }
  0x24   :  { %867 = vmatprep.subr.mxu1 %v340_v36  ;;  %947 = vmatprep.subr.mxu0 %v534_v37  ;;  %v330_v36 = vld [vmem:[%s1782_s2 + $0xa8] sm:$0xff] }
  0x25   :  { %868 = vmatpush3.msra.mxu1 %v324_v38  ;;  %948 = vmatpush3.msra.mxu0 %v518_v39  ;;  %v524_v37 = vld [vmem:[%s1783_s3 + $0xa8] sm:$0xff] }
  0x26   :  { %869 = vmatprep.subr.mxu1 %v339_v40  ;;  %949 = vmatprep.subr.mxu0 %v533_v41  ;;  %v314_v38 = vld [vmem:[%s1782_s2 + $0x28] sm:$0xff]  ;;  %v329_v40 = vld [vmem:[%s1782_s2 + $0xa0] sm:$0xff] }
  0x27   :  { %153 = vmatprep.mubr.f32.mxu0 %v1235_v42  ;;  %193 = vmatprep.mubr.f32.mxu1 %v1240_v43  ;;  %v508_v39 = vld [vmem:[%s1783_s3 + $0x28] sm:$0xff]  ;;  %v523_v41 = vld [vmem:[%s1783_s3 + $0xa0] sm:$0xff] }
  0x28   :  { %870 = vmatpush3.msra.mxu1 %v323_v44  ;;  %950 = vmatpush3.msra.mxu0 %v517_v45  ;;  %v1475_v44 = vld [vmem:[%s1781_s0 + $0x68] sm:$0xff] }
  0x29   :  { %154 = vmatmul.mubr.f32.gmra.mxu0 %v1251_v46  ;;  %194 = vmatmul.mubr.f32.gmra.mxu1 %v1256_v47  ;;  %v1480_v45 = vld [vmem:[%s1781_s0 + $0xe8] sm:$0xff] }
  0x2a   :  { %871 = vmatprep.subr.mxu1 %v338_v48  ;;  %951 = vmatprep.subr.mxu0 %v532_v49  ;;  %v313_v48 = vld [vmem:[%s1782_s2 + $0x20] sm:$0xff] }
  0x2b   :  { %872 = vmatpush3.msra.mxu1 %v322_v50  ;;  %952 = vmatpush3.msra.mxu0 %v516_v51  ;;  %v507_v49 = vld [vmem:[%s1783_s3 + $0x20] sm:$0xff] }
  0x2c   :  { %873 = vmatprep.subr.mxu1 %v337_v52  ;;  %953 = vmatprep.subr.mxu0 %v531_v53  ;;  %v1491_v50 = vld [vmem:[%s1781_s0 + $0x60] sm:$0xff]  ;;  %v328_v52 = vld [vmem:[%s1782_s2 + $0x98] sm:$0xff] }
  0x2d   :  { %158 = vmatprep.mubr.f32.mxu0 %v1283_v54  ;;  %198 = vmatprep.mubr.f32.mxu1 %v1288_v55  ;;  %v1496_v51 = vld [vmem:[%s1781_s0 + $0xe0] sm:$0xff]  ;;  %v522_v53 = vld [vmem:[%s1783_s3 + $0x98] sm:$0xff] }
  0x2e   :  { %874 = vmatpush3.msra.mxu1 %v321_v56  ;;  %954 = vmatpush3.msra.mxu0 %v515_v57  ;;  %v312_v56 = vld [vmem:[%s1782_s2 + $0x18] sm:$0xff] }
  0x2f   :  { %159 = vmatmul.mubr.f32.gmra.mxu0 %v1299_v58  ;;  %199 = vmatmul.mubr.f32.gmra.mxu1 %v1304_v59  ;;  %v506_v57 = vld [vmem:[%s1783_s3 + $0x18] sm:$0xff] }
  0x30   :  { %875 = vmatprep.subr.mxu1 %v336_v60  ;;  %955 = vmatprep.subr.mxu0 %v530_v61  ;;  %v327_v60 = vld [vmem:[%s1782_s2 + $0x90] sm:$0xff] }
  0x31   :  { %876 = vmatpush3.msra.mxu1 %v320_v62  ;;  %956 = vmatpush3.msra.mxu0 %v514_v63  ;;  %v521_v61 = vld [vmem:[%s1783_s3 + $0x90] sm:$0xff]  ;;  %v35_v62 = vld [vmem:[%s1781_s0 + $0x78] sm:$0xff] }
  0x32   :  { %877 = vmatprep.subr.mxu1 %v335_v0  ;;  %957 = vmatprep.subr.mxu0 %v529_v1  ;;  %v1526_v63 = vld [vmem:[%s1781_s0 + $0xf8] sm:$0xff]  ;;  %v311_v0 = vld [vmem:[%s1782_s2 + $0x10] sm:$0xff] }
  0x33   :  { %163 = vmatprep.mubr.f32.mxu0 %v1331_v2  ;;  %203 = vmatprep.mubr.f32.mxu1 %v1336_v3  ;;  %v505_v1 = vld [vmem:[%s1783_s3 + $0x10] sm:$0xff] }
  0x34   :  { %878 = vmatpush3.msra.mxu1 %v319_v4  ;;  %958 = vmatpush3.msra.mxu0 %v513_v5  ;;  %v34_v4 = vld [vmem:[%s1781_s0 + $0x70] sm:$0xff] }
  0x35   :  { %164 = vmatmul.mubr.f32.gmra.mxu0 %v1347_v6  ;;  %204 = vmatmul.mubr.f32.gmra.mxu1 %v1352_v7  ;;  %v1540_v5 = vld [vmem:[%s1781_s0 + $0xf0] sm:$0xff] }
  0x36   :  { %879 = vmatprep.subr.mxu1 %v334_v8  ;;  %959 = vmatprep.subr.mxu0 %v528_v9  ;;  %v326_v8 = vld [vmem:[%s1782_s2 + $0x88] sm:$0xff] }
  0x37   :  { %880 = vmatpush3.msra.mxu1 %v318_v10  ;;  %960 = vmatpush3.msra.mxu0 %v512_v11  ;;  %v520_v9 = vld [vmem:[%s1783_s3 + $0x88] sm:$0xff] }
  0x38   :  { %881 = vmatprep.subr.mxu1 %v333_v12  ;;  %961 = vmatprep.subr.mxu0 %v527_v13  ;;  %v310_v10 = vld [vmem:[%s1782_s2 + $0x8] sm:$0xff]  ;;  %v325_v12 = vld [vmem:[%s1782_s2 + $0x80] sm:$0xff] }
  0x39   :  { %168 = vmatprep.mubr.f32.mxu0 %v1379_v14  ;;  %208 = vmatprep.mubr.f32.mxu1 %v1384_v15  ;;  %v504_v11 = vld [vmem:[%s1783_s3 + $0x8] sm:$0xff]  ;;  %v519_v13 = vld [vmem:[%s1783_s3 + $0x80] sm:$0xff] }
  0x3a   :  { %882 = vmatpush3.msra.mxu1 %v317_v16  ;;  %962 = vmatpush3.msra.mxu0 %v511_v17  ;;  %v309_v16 = vld [vmem:[%s1782_s2] sm:$0xff] }
  0x3b   :  { %169 = vmatmul.mubr.f32.gmra.mxu0 %v1395_v18  ;;  %209 = vmatmul.mubr.f32.gmra.mxu1 %v1400_v19  ;;  %v503_v17 = vld [vmem:[%s1783_s3] sm:$0xff] }
  0x3c   :  { %883 = vmatprep.subr.mxu1 %v332_v20  ;;  %963 = vmatprep.subr.mxu0 %v526_v21 }
  0x3d   :  { %884 = vmatpush3.msra.mxu1 %v316_v22  ;;  %964 = vmatpush3.msra.mxu0 %v510_v23 }
  0x3e   :  { %885 = vmatprep.subr.mxu1 %v331_v24  ;;  %965 = vmatprep.subr.mxu0 %v525_v25 }
  0x3f   :  { %173 = vmatprep.mubr.f32.mxu0 %v1427_v26  ;;  %213 = vmatprep.mubr.f32.mxu1 %v1432_v27 }
  0x40   :  { %886 = vmatpush3.msra.mxu1 %v315_v28  ;;  %966 = vmatpush3.msra.mxu0 %v509_v29 }
  0x41   :  { %174 = vmatmul.mubr.f32.gmra.mxu0 %v1443_v30  ;;  %214 = vmatmul.mubr.f32.gmra.mxu1 %v1448_v31 }
  0x42   :  { %887 = vmatprep.subr.mxu1 %v330_v36  ;;  %967 = vmatprep.subr.mxu0 %v524_v37 }
  0x43   :  { %888 = vmatpush3.msra.mxu1 %v314_v38  ;;  %968 = vmatpush3.msra.mxu0 %v508_v39 }
  0x44   :  { %889 = vmatprep.subr.mxu1 %v329_v40  ;;  %969 = vmatprep.subr.mxu0 %v523_v41 }
  0x45   :  { %178 = vmatprep.mubr.f32.mxu0 %v1475_v44  ;;  %218 = vmatprep.mubr.f32.mxu1 %v1480_v45 }
  0x46   :  { %890 = vmatpush3.msra.mxu1 %v313_v48  ;;  %970 = vmatpush3.msra.mxu0 %v507_v49 }
  0x47   :  { %179 = vmatmul.mubr.f32.gmra.mxu0 %v1491_v50  ;;  %219 = vmatmul.mubr.f32.gmra.mxu1 %v1496_v51 }
  0x48   :  { %891 = vmatprep.subr.mxu1 %v328_v52  ;;  %971 = vmatprep.subr.mxu0 %v522_v53 }
  0x49   :  { %892 = vmatpush3.msra.mxu1 %v312_v56  ;;  %972 = vmatpush3.msra.mxu0 %v506_v57 }
  0x4a   :  { %893 = vmatprep.subr.mxu1 %v327_v60  ;;  %973 = vmatprep.subr.mxu0 %v521_v61 }
  0x4b   :  { %183 = vmatprep.mubr.f32.mxu0 %v35_v62  ;;  %223 = vmatprep.mubr.f32.mxu1 %v1526_v63 }
  0x4c   :  { %894 = vmatpush3.msra.mxu1 %v311_v0  ;;  %974 = vmatpush3.msra.mxu0 %v505_v1 }
  0x4d   :  { %184 = vmatmul.mubr.f32.gmra.mxu0 %v34_v4  ;;  %224 = vmatmul.mubr.f32.gmra.mxu1 %v1540_v5 }
  0x4e   :  { %895 = vmatprep.subr.mxu1 %v326_v8  ;;  %975 = vmatprep.subr.mxu0 %v520_v9 }
  0x4f   :  { %896 = vmatpush3.msra.mxu1 %v310_v10  ;;  %976 = vmatpush3.msra.mxu0 %v504_v11 }
  0x50   :  { %897 = vmatprep.subr.mxu1 %v325_v12  ;;  %977 = vmatprep.subr.mxu0 %v519_v13 }
  0x51   :  { %898 = vmatpush3.msra.mxu1 %v309_v16  ;;  %405 = vmatprep.mubr.f32.mxu1 %v1193_v32 }
  0x52   :  { %978 = vmatpush3.msra.mxu0 %v503_v17  ;;  %599 = vmatprep.mubr.f32.mxu0 %v1193_v32 }
  0x53   :  { %406 = vmatmul.mubr.f32.vlgmr.msra.gmra.mxu1 %v1203_v34  ;;  %600 = vmatmul.mubr.f32.vlgmr.msra.gmra.mxu0 %v1203_v34 }
  0x54   :  { %410 = vmatprep.mubr.f32.mxu1 %v1235_v42  ;;  %604 = vmatprep.mubr.f32.mxu0 %v1235_v42 }
  0x57   :  { %411 = vmatmul.mubr.f32.gmra.mxu1 %v1251_v46  ;;  %605 = vmatmul.mubr.f32.gmra.mxu0 %v1251_v46 }
  0x58   :  { %415 = vmatprep.mubr.f32.mxu1 %v1283_v54  ;;  %609 = vmatprep.mubr.f32.mxu0 %v1283_v54 }
  0x5b   :  { %416 = vmatmul.mubr.f32.gmra.mxu1 %v1299_v58  ;;  %610 = vmatmul.mubr.f32.gmra.mxu0 %v1299_v58 }
  0x5c   :  { %420 = vmatprep.mubr.f32.mxu1 %v1331_v2  ;;  %614 = vmatprep.mubr.f32.mxu0 %v1331_v2 }
  0x5f   :  { %421 = vmatmul.mubr.f32.gmra.mxu1 %v1347_v6  ;;  %615 = vmatmul.mubr.f32.gmra.mxu0 %v1347_v6 }
  0x60   :  { %425 = vmatprep.mubr.f32.mxu1 %v1379_v14  ;;  %619 = vmatprep.mubr.f32.mxu0 %v1379_v14 }
  0x63   :  { %426 = vmatmul.mubr.f32.gmra.mxu1 %v1395_v18  ;;  %620 = vmatmul.mubr.f32.gmra.mxu0 %v1395_v18 }
  0x64   :  { %430 = vmatprep.mubr.f32.mxu1 %v1427_v26  ;;  %624 = vmatprep.mubr.f32.mxu0 %v1427_v26 }
  0x67   :  { %431 = vmatmul.mubr.f32.gmra.mxu1 %v1443_v30  ;;  %625 = vmatmul.mubr.f32.gmra.mxu0 %v1443_v30 }
  0x68   :  { %435 = vmatprep.mubr.f32.mxu1 %v1475_v44  ;;  %629 = vmatprep.mubr.f32.mxu0 %v1475_v44 }
  0x6b   :  { %436 = vmatmul.mubr.f32.gmra.mxu1 %v1491_v50  ;;  %630 = vmatmul.mubr.f32.gmra.mxu0 %v1491_v50 }
  0x6c   :  { %440 = vmatprep.mubr.f32.mxu1 %v35_v62  ;;  %634 = vmatprep.mubr.f32.mxu0 %v35_v62 }
  0x6f   :  { %441 = vmatmul.mubr.f32.gmra.mxu1 %v34_v4  ;;  %635 = vmatmul.mubr.f32.gmra.mxu0 %v34_v4 }
  0x70   :  { %445 = vmatprep.mubr.f32.mxu1 %v1198_v33  ;;  %639 = vmatprep.mubr.f32.mxu0 %v1198_v33 }
  0x73   :  { %446 = vmatmul.mubr.f32.gmra.mxu1 %v1208_v35  ;;  %640 = vmatmul.mubr.f32.gmra.mxu0 %v1208_v35 }
  0x74   :  { %450 = vmatprep.mubr.f32.mxu1 %v1240_v43  ;;  %644 = vmatprep.mubr.f32.mxu0 %v1240_v43 }
  0x77   :  { %451 = vmatmul.mubr.f32.gmra.mxu1 %v1256_v47  ;;  %645 = vmatmul.mubr.f32.gmra.mxu0 %v1256_v47 }
  0x78   :  { %455 = vmatprep.mubr.f32.mxu1 %v1288_v55  ;;  %649 = vmatprep.mubr.f32.mxu0 %v1288_v55 }
  0x7b   :  { %456 = vmatmul.mubr.f32.gmra.mxu1 %v1304_v59  ;;  %650 = vmatmul.mubr.f32.gmra.mxu0 %v1304_v59 }
  0x7c   :  { %460 = vmatprep.mubr.f32.mxu1 %v1336_v3  ;;  %654 = vmatprep.mubr.f32.mxu0 %v1336_v3 }
  0x7f   :  { %461 = vmatmul.mubr.f32.gmra.mxu1 %v1352_v7  ;;  %655 = vmatmul.mubr.f32.gmra.mxu0 %v1352_v7 }
  0x80   :  { %465 = vmatprep.mubr.f32.mxu1 %v1384_v15  ;;  %659 = vmatprep.mubr.f32.mxu0 %v1384_v15 }
  0x83   :  { %466 = vmatmul.mubr.f32.gmra.mxu1 %v1400_v19  ;;  %660 = vmatmul.mubr.f32.gmra.mxu0 %v1400_v19 }
  0x84   :  { %470 = vmatprep.mubr.f32.mxu1 %v1432_v27  ;;  %664 = vmatprep.mubr.f32.mxu0 %v1432_v27 }
  0x87   :  { %471 = vmatmul.mubr.f32.gmra.mxu1 %v1448_v31  ;;  %665 = vmatmul.mubr.f32.gmra.mxu0 %v1448_v31 }
  0x88   :  { %475 = vmatprep.mubr.f32.mxu1 %v1480_v45  ;;  %669 = vmatprep.mubr.f32.mxu0 %v1480_v45 }
  0x8b   :  { %476 = vmatmul.mubr.f32.gmra.mxu1 %v1496_v51  ;;  %670 = vmatmul.mubr.f32.gmra.mxu0 %v1496_v51 }
  0x8c   :  { %480 = vmatprep.mubr.f32.mxu1 %v1526_v63  ;;  %674 = vmatprep.mubr.f32.mxu0 %v1526_v63 }
  0x8f   :  { %481 = vmatmul.mubr.f32.gmra.mxu1 %v1540_v5  ;;  %675 = vmatmul.mubr.f32.gmra.mxu0 %v1540_v5 }
  0xe3   :  { %v819_v32 = vpop.f32.mrf.mxu0  ;;  %v843_v33 = vpop.f32.mrf.mxu1 }
  0xe5   :  { %v820_v34 = vpop.f32.mrf.mxu0  ;;  %v844_v35 = vpop.f32.mrf.mxu1 }
  0xe6   :  { %v821_v54 = vadd.f32 %v820_v34, %v819_v32  ;;  %v845_v55 = vadd.f32 %v844_v35, %v843_v33 }
  0xe9   :  { %v822_v42 = vpop.f32.mrf.mxu0  ;;  %v846_v43 = vpop.f32.mrf.mxu1 }
  0xeb   :  { %v823_v46 = vpop.f32.mrf.mxu0  ;;  %v847_v47 = vpop.f32.mrf.mxu1 }
  0xec   :  { %v824_v58 = vadd.f32 %v823_v46, %v822_v42  ;;  %v848_v59 = vadd.f32 %v847_v47, %v846_v43 }
  0xee   :  { %v743_v2 = vpack.c.bf16 %v824_v58, %v821_v54  ;;  %v763_v3 = vpack.c.bf16 %v848_v59, %v845_v55 }
  0xef   :  { %v825_v6 = vpop.f32.mrf.mxu0  ;;  %v849_v7 = vpop.f32.mrf.mxu1 }
  0xf0   :  { %744 = vst [vmem:[%s1784_s4] sm:$0xff] %v743_v2   ;;  %783 = vst [vmem:[%s1784_s4 + $0x20] sm:$0xff] %v763_v3  }
  0xf1   :  { %v826_v14 = vpop.f32.mrf.mxu0  ;;  %v850_v15 = vpop.f32.mrf.mxu1 }
  0xf2   :  { %v827_v22 = vadd.f32 %v826_v14, %v825_v6  ;;  %v851_v23 = vadd.f32 %v850_v15, %v849_v7 }
  0xf5   :  { %v828_v18 = vpop.f32.mrf.mxu0  ;;  %v852_v19 = vpop.f32.mrf.mxu1 }
  0xf7   :  { %v829_v20 = vpop.f32.mrf.mxu0  ;;  %v853_v21 = vpop.f32.mrf.mxu1 }
  0xf8   :  { %v830_v24 = vadd.f32 %v829_v20, %v828_v18  ;;  %v854_v25 = vadd.f32 %v853_v21, %v852_v19 }
  0xfa   :  { %v748_v26 = vpack.c.bf16 %v830_v24, %v827_v22  ;;  %v768_v27 = vpack.c.bf16 %v854_v25, %v851_v23 }
  0xfb   :  { %v831_v28 = vpop.f32.mrf.mxu0  ;;  %v855_v29 = vpop.f32.mrf.mxu1 }
  0xfc   :  { %780 = vst [vmem:[%s1784_s4 + $0x8] sm:$0xff] %v748_v26   ;;  %784 = vst [vmem:[%s1784_s4 + $0x28] sm:$0xff] %v768_v27  }
  0xfd   :  { %v832_v30 = vpop.f32.mrf.mxu0  ;;  %v856_v31 = vpop.f32.mrf.mxu1 }
  0xfe   :  { %v833_v40 = vadd.f32 %v832_v30, %v831_v28  ;;  %v857_v41 = vadd.f32 %v856_v31, %v855_v29 }
 0x101   :  { %v834_v36 = vpop.f32.mrf.mxu0  ;;  %v858_v37 = vpop.f32.mrf.mxu1 }
 0x103   :  { %v835_v38 = vpop.f32.mrf.mxu0  ;;  %v859_v39 = vpop.f32.mrf.mxu1 }
 0x104   :  { %v836_v44 = vadd.f32 %v835_v38, %v834_v36  ;;  %v860_v45 = vadd.f32 %v859_v39, %v858_v37 }
 0x106   :  { %v753_v48 = vpack.c.bf16 %v836_v44, %v833_v40  ;;  %v773_v49 = vpack.c.bf16 %v860_v45, %v857_v41 }
 0x107   :  { %v837_v50 = vpop.f32.mrf.mxu0  ;;  %v861_v51 = vpop.f32.mrf.mxu1 }
 0x108   :  { %781 = vst [vmem:[%s1784_s4 + $0x10] sm:$0xff] %v753_v48   ;;  %785 = vst [vmem:[%s1784_s4 + $0x30] sm:$0xff] %v773_v49  }
 0x109   :  { %v838_v52 = vpop.f32.mrf.mxu0  ;;  %v862_v53 = vpop.f32.mrf.mxu1 }
 0x10a   :  { %v839_v62 = vadd.f32 %v838_v52, %v837_v50  ;;  %v863_v63 = vadd.f32 %v862_v53, %v861_v51 }
 0x10d   :  { %v840_v56 = vpop.f32.mrf.mxu0  ;;  %v864_v57 = vpop.f32.mrf.mxu1 }
 0x10f   :  { %v841_v60 = vpop.f32.mrf.mxu0  ;;  %v865_v61 = vpop.f32.mrf.mxu1 }
 0x110   :  { %v842_v0 = vadd.f32 %v841_v60, %v840_v56  ;;  %v866_v1 = vadd.f32 %v865_v61, %v864_v57 }
 0x112   :  { %v758_v4 = vpack.c.bf16 %v842_v0, %v839_v62  ;;  %v778_v5 = vpack.c.bf16 %v866_v1, %v863_v63 }
 0x113   :  { %v899_v8 = vpop.f32.mrf.mxu1  ;;  %v979_v9 = vpop.f32.mrf.mxu0 }
 0x114   :  { %782 = vst [vmem:[%s1784_s4 + $0x18] sm:$0xff] %v758_v4   ;;  %786 = vst [vmem:[%s1784_s4 + $0x38] sm:$0xff] %v778_v5  }
 0x115   :  { %v900_v10 = vpop.f32.mrf.mxu1  ;;  %v980_v11 = vpop.f32.mrf.mxu0 }
 0x116   :  { %v901_v12 = vadd.f32 %v900_v10, %v899_v8  ;;  %v981_v13 = vadd.f32 %v980_v11, %v979_v9 }
 0x117   :  { %v902_v16 = vpop.f32.mrf.mxu1  ;;  %v982_v17 = vpop.f32.mrf.mxu0 }
 0x118   :  { %487 = vst.msk [vmem:[%s1785_s5] sm:$0xff] %vm486_vm0, %v901_v12  ;;  %680 = vst.msk [vmem:[%s1786_s6] sm:$0xff] %vm486_vm0, %v981_v13 }
 0x119   :  { %v903_v32 = vpop.f32.mrf.mxu1  ;;  %v983_v33 = vpop.f32.mrf.mxu0 }
 0x11a   :  { %v904_v34 = vadd.f32 %v903_v32, %v902_v16  ;;  %v984_v35 = vadd.f32 %v983_v33, %v982_v17 }
 0x11b   :  { %v905_v42 = vpop.f32.mrf.mxu1  ;;  %v985_v43 = vpop.f32.mrf.mxu0 }
 0x11c   :  { %488 = vst.msk [vmem:[%s1785_s5 + $0x8] sm:$0xff] %vm486_vm0, %v904_v34  ;;  %681 = vst.msk [vmem:[%s1786_s6 + $0x8] sm:$0xff] %vm486_vm0, %v984_v35 }
 0x11d   :  { %v906_v46 = vpop.f32.mrf.mxu1  ;;  %v986_v47 = vpop.f32.mrf.mxu0 }
 0x11e   :  { %v907_v54 = vadd.f32 %v906_v46, %v905_v42  ;;  %v987_v55 = vadd.f32 %v986_v47, %v985_v43 }
 0x11f   :  { %v908_v58 = vpop.f32.mrf.mxu1  ;;  %v988_v59 = vpop.f32.mrf.mxu0 }
 0x120   :  { %489 = vst.msk [vmem:[%s1785_s5 + $0x10] sm:$0xff] %vm486_vm0, %v907_v54  ;;  %682 = vst.msk [vmem:[%s1786_s6 + $0x10] sm:$0xff] %vm486_vm0, %v987_v55 }
 0x121   :  { %v909_v2 = vpop.f32.mrf.mxu1  ;;  %v989_v3 = vpop.f32.mrf.mxu0 }
 0x122   :  { %v910_v6 = vadd.f32 %v909_v2, %v908_v58  ;;  %v990_v7 = vadd.f32 %v989_v3, %v988_v59 }
 0x123   :  { %v911_v14 = vpop.f32.mrf.mxu1  ;;  %v991_v15 = vpop.f32.mrf.mxu0 }
 0x124   :  { %490 = vst.msk [vmem:[%s1785_s5 + $0x18] sm:$0xff] %vm486_vm0, %v910_v6  ;;  %683 = vst.msk [vmem:[%s1786_s6 + $0x18] sm:$0xff] %vm486_vm0, %v990_v7 }
 0x125   :  { %v912_v18 = vpop.f32.mrf.mxu1  ;;  %v992_v19 = vpop.f32.mrf.mxu0 }
 0x126   :  { %v913_v20 = vadd.f32 %v912_v18, %v911_v14  ;;  %v993_v21 = vadd.f32 %v992_v19, %v991_v15 }
 0x127   :  { %v914_v22 = vpop.f32.mrf.mxu1  ;;  %v994_v23 = vpop.f32.mrf.mxu0 }
 0x128   :  { %491 = vst.msk [vmem:[%s1785_s5 + $0x20] sm:$0xff] %vm486_vm0, %v913_v20  ;;  %684 = vst.msk [vmem:[%s1786_s6 + $0x20] sm:$0xff] %vm486_vm0, %v993_v21 }
 0x129   :  { %v915_v24 = vpop.f32.mrf.mxu1  ;;  %v995_v25 = vpop.f32.mrf.mxu0 }
 0x12a   :  { %v916_v26 = vadd.f32 %v915_v24, %v914_v22  ;;  %v996_v27 = vadd.f32 %v995_v25, %v994_v23 }
 0x12b   :  { %v917_v28 = vpop.f32.mrf.mxu1  ;;  %v997_v29 = vpop.f32.mrf.mxu0 }
 0x12c   :  { %492 = vst.msk [vmem:[%s1785_s5 + $0x28] sm:$0xff] %vm486_vm0, %v916_v26  ;;  %685 = vst.msk [vmem:[%s1786_s6 + $0x28] sm:$0xff] %vm486_vm0, %v996_v27 }
 0x12d   :  { %v918_v30 = vpop.f32.mrf.mxu1  ;;  %v998_v31 = vpop.f32.mrf.mxu0 }
 0x12e   :  { %v919_v36 = vadd.f32 %v918_v30, %v917_v28  ;;  %v999_v37 = vadd.f32 %v998_v31, %v997_v29 }
 0x12f   :  { %v920_v38 = vpop.f32.mrf.mxu1  ;;  %v1000_v39 = vpop.f32.mrf.mxu0 }
 0x130   :  { %493 = vst.msk [vmem:[%s1785_s5 + $0x30] sm:$0xff] %vm486_vm0, %v919_v36  ;;  %686 = vst.msk [vmem:[%s1786_s6 + $0x30] sm:$0xff] %vm486_vm0, %v999_v37 }
 0x131   :  { %v921_v40 = vpop.f32.mrf.mxu1  ;;  %v1001_v41 = vpop.f32.mrf.mxu0 }
 0x132   :  { %v922_v44 = vadd.f32 %v921_v40, %v920_v38  ;;  %v1002_v45 = vadd.f32 %v1001_v41, %v1000_v39 }
 0x133   :  { %v923_v48 = vpop.f32.mrf.mxu1  ;;  %v1003_v49 = vpop.f32.mrf.mxu0 }
 0x134   :  { %494 = vst.msk [vmem:[%s1785_s5 + $0x38] sm:$0xff] %vm486_vm0, %v922_v44  ;;  %687 = vst.msk [vmem:[%s1786_s6 + $0x38] sm:$0xff] %vm486_vm0, %v1002_v45 }
 0x135   :  { %v924_v50 = vpop.f32.mrf.mxu1  ;;  %v1004_v51 = vpop.f32.mrf.mxu0 }
 0x136   :  { %v925_v52 = vadd.f32 %v924_v50, %v923_v48  ;;  %v1005_v53 = vadd.f32 %v1004_v51, %v1003_v49 }
 0x137   :  { %v926_v56 = vpop.f32.mrf.mxu1  ;;  %v1006_v57 = vpop.f32.mrf.mxu0 }
 0x138   :  { %495 = vst.msk [vmem:[%s1785_s5 + $0x40] sm:$0xff] %vm486_vm0, %v925_v52  ;;  %688 = vst.msk [vmem:[%s1786_s6 + $0x40] sm:$0xff] %vm486_vm0, %v1005_v53 }
 0x139   :  { %v927_v60 = vpop.f32.mrf.mxu1  ;;  %v1007_v61 = vpop.f32.mrf.mxu0 }
 0x13a   :  { %v928_v62 = vadd.f32 %v927_v60, %v926_v56  ;;  %v1008_v63 = vadd.f32 %v1007_v61, %v1006_v57 }
 0x13b   :  { %v929_v0 = vpop.f32.mrf.mxu1  ;;  %v1009_v1 = vpop.f32.mrf.mxu0 }
 0x13c   :  { %496 = vst.msk [vmem:[%s1785_s5 + $0x48] sm:$0xff] %vm486_vm0, %v928_v62  ;;  %689 = vst.msk [vmem:[%s1786_s6 + $0x48] sm:$0xff] %vm486_vm0, %v1008_v63 }
 0x13d   :  { %v930_v4 = vpop.f32.mrf.mxu1  ;;  %v1010_v5 = vpop.f32.mrf.mxu0 }
 0x13e   :  { %v931_v8 = vadd.f32 %v930_v4, %v929_v0  ;;  %v1011_v9 = vadd.f32 %v1010_v5, %v1009_v1 }
 0x13f   :  { %v932_v10 = vpop.f32.mrf.mxu1  ;;  %v1012_v11 = vpop.f32.mrf.mxu0 }
 0x140   :  { %497 = vst.msk [vmem:[%s1785_s5 + $0x50] sm:$0xff] %vm486_vm0, %v931_v8  ;;  %690 = vst.msk [vmem:[%s1786_s6 + $0x50] sm:$0xff] %vm486_vm0, %v1011_v9 }
 0x141   :  { %v933_v12 = vpop.f32.mrf.mxu1  ;;  %v1013_v13 = vpop.f32.mrf.mxu0 }
 0x142   :  { %v934_v16 = vadd.f32 %v933_v12, %v932_v10  ;;  %v1014_v17 = vadd.f32 %v1013_v13, %v1012_v11 }
 0x143   :  { %v935_v32 = vpop.f32.mrf.mxu1  ;;  %v1015_v33 = vpop.f32.mrf.mxu0 }
 0x144   :  { %498 = vst.msk [vmem:[%s1785_s5 + $0x58] sm:$0xff] %vm486_vm0, %v934_v16  ;;  %691 = vst.msk [vmem:[%s1786_s6 + $0x58] sm:$0xff] %vm486_vm0, %v1014_v17 }
 0x145   :  { %v936_v34 = vpop.f32.mrf.mxu1  ;;  %v1016_v35 = vpop.f32.mrf.mxu0 }
 0x146   :  { %v937_v42 = vadd.f32 %v936_v34, %v935_v32  ;;  %v1017_v43 = vadd.f32 %v1016_v35, %v1015_v33 }
 0x147   :  { %v938_v46 = vpop.f32.mrf.mxu1  ;;  %v1018_v47 = vpop.f32.mrf.mxu0 }
 0x148   :  { %499 = vst.msk [vmem:[%s1785_s5 + $0x60] sm:$0xff] %vm486_vm0, %v937_v42  ;;  %692 = vst.msk [vmem:[%s1786_s6 + $0x60] sm:$0xff] %vm486_vm0, %v1017_v43 }
 0x149   :  { %v939_v54 = vpop.f32.mrf.mxu1  ;;  %v1019_v55 = vpop.f32.mrf.mxu0 }
 0x14a   :  { %v940_v58 = vadd.f32 %v939_v54, %v938_v46  ;;  %v1020_v59 = vadd.f32 %v1019_v55, %v1018_v47 }
 0x14b   :  { %v941_v2 = vpop.f32.mrf.mxu1  ;;  %v1021_v3 = vpop.f32.mrf.mxu0 }
 0x14c   :  { %500 = vst.msk [vmem:[%s1785_s5 + $0x68] sm:$0xff] %vm486_vm0, %v940_v58  ;;  %693 = vst.msk [vmem:[%s1786_s6 + $0x68] sm:$0xff] %vm486_vm0, %v1020_v59 }
 0x14d   :  { %v942_v6 = vpop.f32.mrf.mxu1  ;;  %v1022_v7 = vpop.f32.mrf.mxu0 }
 0x14e   :  { %v943_v14 = vadd.f32 %v942_v6, %v941_v2  ;;  %v1023_v15 = vadd.f32 %v1022_v7, %v1021_v3 }
 0x14f   :  { %v944_v18 = vpop.f32.mrf.mxu1  ;;  %v1024_v19 = vpop.f32.mrf.mxu0 }
 0x150   :  { %501 = vst.msk [vmem:[%s1785_s5 + $0x70] sm:$0xff] %vm486_vm0, %v943_v14  ;;  %694 = vst.msk [vmem:[%s1786_s6 + $0x70] sm:$0xff] %vm486_vm0, %v1023_v15 }
 0x151   :  { %v945_v20 = vpop.f32.mrf.mxu1  ;;  %v1025_v21 = vpop.f32.mrf.mxu0 }
 0x152   :  { %v946_v22 = vadd.f32 %v945_v20, %v944_v18  ;;  %v1026_v23 = vadd.f32 %v1025_v21, %v1024_v19 }
 0x154   :  { %502 = vst.msk [vmem:[%s1785_s5 + $0x78] sm:$0xff] %vm486_vm0, %v946_v22  ;;  %695 = vst.msk [vmem:[%s1786_s6 + $0x78] sm:$0xff] %vm486_vm0, %v1026_v23 }

// kernel: gat_net_forward.7
= control target key start
LH: loop header
LB: loop body
LE: loop exit
PB: predicated region body
PF: predicated region fallthrough
CT: control target
= control target key end

     0   :  { %v796_v0 = vmov 0   ;;  %s1085_s1 = inlined_call_operand.vmem [shape: f32[128,1], index: 1, kind: input, shape index: {}]   ;;  %s1086_s0 = inlined_call_operand.vmem [shape: s8[128,128], index: 0, kind: input, shape index: {}]   ;;  %s1087_s2 = inlined_call_operand.vmem [shape: f32[1,128], index: 2, kind: input, shape index: {}]   ;;  %s1088_s3 = inlined_call_operand.vmem [shape: bf16[128,128], index: 3, kind: input, shape index: {}]   ;;  %s1089_s4 = inlined_call_operand.vmem [shape: f32[1,128], index: 4, kind: input, shape index: {}]   ;;  %s1090_s5 = inlined_call_operand.vmem [shape: f32[128,128], index: 5, kind: output, shape index: {}]  }
   0x1   :  { %723 = vset.pattern.permute.xlu1 %v796_v0  ;;  %722 = vset.pattern.permute.xlu0 %v796_v0  ;;  %v29_v1 = vld [vmem:[%s1085_s1 + $0x40] sm:$0xff]  ;;  %v30_v3 = vld [vmem:[%s1085_s1 + $0x48] sm:$0xff]  ;;  %v24_v5 = vld [vmem:[%s1085_s1 + $0x18] sm:$0xff] }
   0x2   :  { %v21_v2 = vld [vmem:[%s1085_s1] sm:$0xff]  ;;  %80 = vperm.xlu1 %723, %v29_v1   ;;  %v22_v4 = vld [vmem:[%s1085_s1 + $0x8] sm:$0xff]  ;;  %v23_v6 = vld [vmem:[%s1085_s1 + $0x10] sm:$0xff] }
   0x3   :  { %40 = vperm.xlu0 %722, %v21_v2   ;;  %v32_v7 = vld [vmem:[%s1085_s1 + $0x58] sm:$0xff]  ;;  %v31_v8 = vld [vmem:[%s1085_s1 + $0x50] sm:$0xff]  ;;  %v26_v9 = vld [vmem:[%s1085_s1 + $0x28] sm:$0xff] }
   0x4   :  { %v25_v10 = vld [vmem:[%s1085_s1 + $0x20] sm:$0xff]  ;;  %v34_v11 = vld [vmem:[%s1085_s1 + $0x68] sm:$0xff]  ;;  %v28_v13 = vld [vmem:[%s1085_s1 + $0x38] sm:$0xff] }
   0x5   :  { %v33_v12 = vld [vmem:[%s1085_s1 + $0x60] sm:$0xff]  ;;  %v27_v14 = vld [vmem:[%s1085_s1 + $0x30] sm:$0xff]  ;;  %v36_v15 = vld [vmem:[%s1085_s1 + $0x78] sm:$0xff] }
   0x6   :  { %85 = vperm.xlu1 %723, %v30_v3   ;;  %v35_v16 = vld [vmem:[%s1085_s1 + $0x70] sm:$0xff]  ;;  %v619_v17 = vld [vmem:[%s1086_s0] sm:$0xff]   ;;  %v893_v41 = vld [vmem:[%s1086_s0 + $0x8] sm:$0xff]  }
   0x7   :  { %45 = vperm.xlu0 %722, %v22_v4   ;;  %v717_v18 = vld [vmem:[%s1086_s0 + $0x10] sm:$0xff]   ;;  %v620_v19 = vunpack.c.0.s8 %v619_v17  ;;  %v884_v20 = vld [vmem:[%s1087_s2] ss:$0 sm:$0xff]  ;;  %v621_v25 = vunpack.c.1.s8 %v619_v17  ;;  %v624_v35 = vunpack.c.2.s8 %v619_v17  ;;  %v625_v36 = vunpack.c.3.s8 %v619_v17 }
   0x8   :  { %v636_v21 = vunpack.c.0.s8 %v717_v18  ;;  %v637_v28 = vunpack.c.1.s8 %v717_v18  ;;  %v640_v43 = vunpack.c.2.s8 %v717_v18  ;;  %v641_v44 = vunpack.c.3.s8 %v717_v18 }
   0x9   :  { %v204_v24 = vcvt.s32.f32 %v620_v19  ;;  %v205_v34 = vcvt.s32.f32 %v621_v25  ;;  %v206_v50 = vcvt.s32.f32 %v624_v35  ;;  %v207_v51 = vcvt.s32.f32 %v625_v36  ;;  %v725_v35 = vld [vmem:[%s1088_s3 + $0x30] sm:$0xff]  }
   0xa   :  { %55 = vperm.xlu1 %723, %v24_v5   ;;  %v212_v29 = vcvt.s32.f32 %v636_v21  ;;  %v213_v40 = vcvt.s32.f32 %v637_v28  ;;  %v628_v52 = vunpack.c.0.s8 %v893_v41  ;;  %v214_v58 = vcvt.s32.f32 %v640_v43 }
   0xb   :  { %50 = vperm.xlu0 %722, %v23_v6   ;;  %vm220_vm0 = vcmp.gt.f32.partialorder %v204_v24, 0.0  ;;  %vm221_vm2 = vcmp.gt.f32.partialorder %v205_v34, 0.0  ;;  %v215_v59 = vcvt.s32.f32 %v641_v44  ;;  %vm222_vm4 = vcmp.gt.f32.partialorder %v206_v50, 0.0 }
   0xc   :  { %vm228_vm1 = vcmp.gt.f32.partialorder %v212_v29, 0.0  ;;  %vm229_vm3 = vcmp.gt.f32.partialorder %v213_v40, 0.0  ;;  %vm223_vm5 = vcmp.gt.f32.partialorder %v207_v51, 0.0  ;;  %v208_v1 = vcvt.s32.f32 %v628_v52  ;;  %v726_v51 = vld [vmem:[%s1088_s3 + $0x28] sm:$0xff]  }
   0xd   :  { %v629_v2 = vunpack.c.1.s8 %v893_v41  ;;  %vm230_vm6 = vcmp.gt.f32.partialorder %v214_v58, 0.0  ;;  %vm231_vm7 = vcmp.gt.f32.partialorder %v215_v59, 0.0 }
   0xe   :  { %95 = vperm.xlu1 %723, %v32_v7   ;;  %v914_v7 = vld [vmem:[%s1086_s0 + $0x18] sm:$0xff]   ;;  %vm224_vm8 = vcmp.gt.f32.partialorder %v208_v1, 0.0 }
   0xf   :  { %90 = vperm.xlu0 %722, %v31_v8  }
  0x12   :  { %65 = vperm.xlu1 %723, %v26_v9  }
  0x13   :  { %60 = vperm.xlu0 %722, %v25_v10  }
  0x16   :  { %105 = vperm.xlu1 %723, %v34_v11  }
  0x17   :  { %100 = vperm.xlu0 %722, %v33_v12  }
  0x1a   :  { %75 = vperm.xlu1 %723, %v28_v13  }
  0x1b   :  { %70 = vperm.xlu0 %722, %v27_v14  }
  0x1e   :  { %115 = vperm.xlu1 %723, %v36_v15   ;;  %v644_v15 = vunpack.c.0.s8 %v914_v7 }
  0x1f   :  { %110 = vperm.xlu0 %722, %v35_v16   ;;  %v209_v16 = vcvt.s32.f32 %v629_v2  ;;  %v727_v2 = vld [vmem:[%s1088_s3 + $0x20] sm:$0xff]  }
  0x21   :  { %vm225_vm9 = vcmp.gt.f32.partialorder %v209_v16, 0.0  ;;  %v729_v16 = vld [vmem:[%s1088_s3 + $0x10] sm:$0xff]  }
  0x7d   :  { %v81_v22 = vpop.permute.xlu1 %80 }
  0x7e   :  { %v41_v23 = vpop.permute.xlu0 %40  ;;  %v132_v26 = vadd.f32 %v884_v20, %v81_v22  ;;  %v724_v22 = vld [vmem:[%s1088_s3 + $0x38] sm:$0xff]  }
  0x7f   :  { %v124_v27 = vadd.f32 %v884_v20, %v41_v23  ;;  %v645_v23 = vunpack.c.1.s8 %v914_v7  ;;  %666 = vmatprep.subr.bf16.mxu0 %v724_v22  ;;  %698 = vmatprep.subr.bf16.mxu1 %v724_v22 }
  0x80   :  { %v148_v30 = vmul.f32 0.2, %v132_v26  ;;  %667 = vmatpush3.bf16.msra.mxu0 %v724_v22  ;;  %706 = vmatpush3.bf16.msra.mxu1 %v724_v22 }
  0x81   :  { %v140_v31 = vmul.f32 0.2, %v124_v27  ;;  %v86_v32 = vpop.permute.xlu1 %85  ;;  %668 = vmatprep.subr.bf16.mxu0 %v725_v35  ;;  %699 = vmatprep.subr.bf16.mxu1 %v725_v35 }
  0x82   :  { %v46_v33 = vpop.permute.xlu0 %45  ;;  %v133_v37 = vadd.f32 %v884_v20, %v86_v32  ;;  %v164_v42 = vmax.f32 %v132_v26, %v148_v30  ;;  %v216_v30 = vcvt.s32.f32 %v644_v15 }
  0x83   :  { %v125_v38 = vadd.f32 %v884_v20, %v46_v33  ;;  %v156_v39 = vmax.f32 %v124_v27, %v140_v31  ;;  %v632_v31 = vunpack.c.2.s8 %v893_v41 }
  0x84   :  { %v149_v45 = vmul.f32 0.2, %v133_v37  ;;  %v902_v56 = vsel %vm228_vm1, %v164_v42, -1e+30  ;;  %vm232_vm10 = vcmp.gt.f32.partialorder %v216_v30, 0.0  ;;  %669 = vmatpush3.bf16.msra.mxu0 %v725_v35  ;;  %707 = vmatpush3.bf16.msra.mxu1 %v725_v35 }
  0x85   :  { %v141_v46 = vmul.f32 0.2, %v125_v38  ;;  %v895_v47 = vsel %vm220_vm0, %v156_v39, -1e+30  ;;  %v56_v48 = vpop.permute.xlu1 %55  ;;  %v210_v44 = vcvt.s32.f32 %v632_v31  ;;  %670 = vmatprep.subr.bf16.mxu0 %v726_v51  ;;  %700 = vmatprep.subr.bf16.mxu1 %v726_v51 }
  0x86   :  { %v51_v49 = vpop.permute.xlu0 %50  ;;  %252 = vmax.xlane.f32.xlu0 %v895_v47  ;;  %v127_v53 = vadd.f32 %v884_v20, %v56_v48  ;;  %v165_v57 = vmax.f32 %v133_v37, %v149_v45  ;;  %v217_v37 = vcvt.s32.f32 %v645_v23  ;;  %v648_v45 = vunpack.c.2.s8 %v914_v7 }
  0x87   :  { %v126_v54 = vadd.f32 %v884_v20, %v51_v49  ;;  %v157_v55 = vmax.f32 %v125_v38, %v141_v46  ;;  %v633_v46 = vunpack.c.3.s8 %v893_v41  ;;  %vm226_vm12 = vcmp.gt.f32.partialorder %v210_v44, 0.0 }
  0x88   :  { %v143_v60 = vmul.f32 0.2, %v127_v53  ;;  %v917_v8 = vsel %vm229_vm3, %v165_v57, -1e+30  ;;  %vm233_vm11 = vcmp.gt.f32.partialorder %v217_v37, 0.0  ;;  %v218_v59 = vcvt.s32.f32 %v648_v45  ;;  %671 = vmatpush3.bf16.msra.mxu0 %v726_v51  ;;  %708 = vmatpush3.bf16.msra.mxu1 %v726_v51 }
  0x89   :  { %v142_v61 = vmul.f32 0.2, %v126_v54  ;;  %v904_v62 = vsel %vm221_vm2, %v157_v55, -1e+30  ;;  %v96_v63 = vpop.permute.xlu1 %95  ;;  %672 = vmatprep.subr.bf16.mxu0 %v727_v2  ;;  %701 = vmatprep.subr.bf16.mxu1 %v727_v2 }
  0x8a   :  { %v91_v0 = vpop.permute.xlu0 %90  ;;  %254 = vmax.xlane.f32.xlu1 %v904_v62  ;;  %268 = vmax.xlane.f32.xlu0 %v902_v56  ;;  %v135_v3 = vadd.f32 %v884_v20, %v96_v63  ;;  %v159_v6 = vmax.f32 %v127_v53, %v143_v60  ;;  %v211_v60 = vcvt.s32.f32 %v633_v46  ;;  %vm234_vm13 = vcmp.gt.f32.partialorder %v218_v59, 0.0 }
  0x8b   :  { %v134_v4 = vadd.f32 %v884_v20, %v91_v0  ;;  %v158_v5 = vmax.f32 %v126_v54, %v142_v61  ;;  %v649_v61 = vunpack.c.3.s8 %v914_v7 }
  0x8c   :  { %v151_v9 = vmul.f32 0.2, %v135_v3  ;;  %v924_v14 = vsel %vm223_vm5, %v159_v6, -1e+30  ;;  %vm227_vm14 = vcmp.gt.f32.partialorder %v211_v60, 0.0  ;;  %673 = vmatpush3.bf16.msra.mxu0 %v727_v2  ;;  %709 = vmatpush3.bf16.msra.mxu1 %v727_v2 }
  0x8d   :  { %v150_v10 = vmul.f32 0.2, %v134_v4  ;;  %v919_v11 = vsel %vm222_vm4, %v158_v5, -1e+30  ;;  %v66_v12 = vpop.permute.xlu1 %65 }
  0x8e   :  { %v61_v13 = vpop.permute.xlu0 %60  ;;  %256 = vmax.xlane.f32.xlu1 %v919_v11  ;;  %270 = vmax.xlane.f32.xlu0 %v917_v8  ;;  %v129_v17 = vadd.f32 %v884_v20, %v66_v12  ;;  %v167_v21 = vmax.f32 %v135_v3, %v151_v9 }
  0x8f   :  { %v128_v18 = vadd.f32 %v884_v20, %v61_v13  ;;  %v166_v19 = vmax.f32 %v134_v4, %v150_v10  ;;  %v728_v10 = vld [vmem:[%s1088_s3 + $0x18] sm:$0xff]  }
  0x90   :  { %v145_v24 = vmul.f32 0.2, %v129_v17  ;;  %v939_v29 = vsel %vm231_vm7, %v167_v21, -1e+30  ;;  %674 = vmatprep.subr.bf16.mxu0 %v728_v10  ;;  %702 = vmatprep.subr.bf16.mxu1 %v728_v10 }
  0x91   :  { %v144_v25 = vmul.f32 0.2, %v128_v18  ;;  %v934_v26 = vsel %vm230_vm6, %v166_v19, -1e+30  ;;  %v106_v27 = vpop.permute.xlu1 %105  ;;  %675 = vmatpush3.bf16.msra.mxu0 %v728_v10  ;;  %710 = vmatpush3.bf16.msra.mxu1 %v728_v10  ;;  %v731_v19 = vld [vmem:[%s1088_s3] sm:$0xff]  }
  0x92   :  { %v101_v28 = vpop.permute.xlu0 %100  ;;  %272 = vmax.xlane.f32.xlu1 %v934_v26  ;;  %258 = vmax.xlane.f32.xlu0 %v924_v14  ;;  %v137_v32 = vadd.f32 %v884_v20, %v106_v27  ;;  %v161_v36 = vmax.f32 %v129_v17, %v145_v24 }
  0x93   :  { %v136_v33 = vadd.f32 %v884_v20, %v101_v28  ;;  %v160_v34 = vmax.f32 %v128_v18, %v144_v25  ;;  %676 = vmatprep.subr.bf16.mxu0 %v729_v16  ;;  %703 = vmatprep.subr.bf16.mxu1 %v729_v16  ;;  %v730_v18 = vld [vmem:[%s1088_s3 + $0x8] sm:$0xff]  }
  0x94   :  { %v153_v38 = vmul.f32 0.2, %v137_v32  ;;  %v960_v52 = vsel %vm225_vm9, %v161_v36, -1e+30 }
  0x95   :  { %v152_v39 = vmul.f32 0.2, %v136_v33  ;;  %v948_v40 = vsel %vm224_vm8, %v160_v34, -1e+30  ;;  %v76_v42 = vpop.permute.xlu1 %75  ;;  %677 = vmatpush3.bf16.msra.mxu0 %v729_v16  ;;  %711 = vmatpush3.bf16.msra.mxu1 %v729_v16 }
  0x96   :  { %v71_v43 = vpop.permute.xlu0 %70  ;;  %260 = vmax.xlane.f32.xlu1 %v948_v40  ;;  %274 = vmax.xlane.f32.xlu0 %v939_v29  ;;  %v131_v48 = vadd.f32 %v884_v20, %v76_v42  ;;  %v169_v53 = vmax.f32 %v137_v32, %v153_v38 }
  0x97   :  { %v130_v49 = vadd.f32 %v884_v20, %v71_v43  ;;  %v168_v50 = vmax.f32 %v136_v33, %v152_v39  ;;  %678 = vmatprep.subr.bf16.mxu0 %v730_v18  ;;  %704 = vmatprep.subr.bf16.mxu1 %v730_v18 }
  0x98   :  { %v147_v54 = vmul.f32 0.2, %v131_v48  ;;  %v973_v3 = vsel %vm233_vm11, %v169_v53, -1e+30 }
  0x99   :  { %v146_v55 = vmul.f32 0.2, %v130_v49  ;;  %v962_v57 = vsel %vm232_vm10, %v168_v50, -1e+30  ;;  %v116_v41 = vpop.permute.xlu1 %115  ;;  %679 = vmatpush3.bf16.msra.mxu0 %v730_v18  ;;  %712 = vmatpush3.bf16.msra.mxu1 %v730_v18 }
  0x9a   :  { %v111_v58 = vpop.permute.xlu0 %110  ;;  %276 = vmax.xlane.f32.xlu1 %v962_v57  ;;  %262 = vmax.xlane.f32.xlu0 %v960_v52  ;;  %v139_v63 = vadd.f32 %v884_v20, %v116_v41  ;;  %v163_v9 = vmax.f32 %v131_v48, %v147_v54 }
  0x9b   :  { %v138_v0 = vadd.f32 %v884_v20, %v111_v58  ;;  %v162_v1 = vmax.f32 %v130_v49, %v146_v55  ;;  %v219_v20 = vcvt.s32.f32 %v649_v61  ;;  %680 = vmatprep.subr.bf16.mxu0 %v731_v19  ;;  %705 = vmatprep.subr.bf16.mxu1 %v731_v19 }
  0x9c   :  { %v155_v4 = vmul.f32 0.2, %v139_v63  ;;  %v984_v13 = vsel %vm227_vm14, %v163_v9, -1e+30 }
  0x9d   :  { %v154_v5 = vmul.f32 0.2, %v138_v0  ;;  %v975_v6 = vsel %vm226_vm12, %v162_v1, -1e+30  ;;  %vm235_vm15 = vcmp.gt.f32.partialorder %v219_v20, 0.0  ;;  %681 = vmatpush3.bf16.msra.mxu0 %v731_v19  ;;  %713 = vmatpush3.bf16.msra.mxu1 %v731_v19 }
  0x9e   :  { %264 = vmax.xlane.f32.xlu1 %v975_v6  ;;  %278 = vmax.xlane.f32.xlu0 %v973_v3  ;;  %v171_v15 = vmax.f32 %v139_v63, %v155_v4 }
  0x9f   :  { %v170_v7 = vmax.f32 %v138_v0, %v154_v5 }
  0xa0   :  { %v991_v17 = vsel %vm235_vm15, %v171_v15, -1e+30 }
  0xa1   :  { %v982_v12 = vsel %vm234_vm13, %v170_v7, -1e+30 }
  0xa2   :  { %280 = vmax.xlane.f32.xlu1 %v982_v12  ;;  %266 = vmax.xlane.f32.xlu0 %v984_v13 }
  0xa6   :  { %282 = vmax.xlane.f32.xlu0 %v991_v17 }
 0x10f   :  { %v253_v21 = vpop.xlane.xlu0 %252 }
 0x110   :  { %v284_v22 = vsub.f32 %v895_v47, %v253_v21 }
 0x112   :  { %v300_v23 = vmul.f32 1.442695, %v284_v22 }
 0x113   :  { %v255_v24 = vpop.xlane.xlu1 %254  ;;  %v269_v25 = vpop.xlane.xlu0 %268 }
 0x114   :  { %732 = vpow2.f32 %v300_v23  ;;  %v285_v27 = vsub.f32 %v904_v62, %v255_v24  ;;  %v292_v28 = vsub.f32 %v902_v56, %v269_v25 }
 0x116   :  { %v302_v30 = vmul.f32 1.442695, %v285_v27  ;;  %v316_v31 = vmul.f32 1.442695, %v292_v28 }
 0x117   :  { %v257_v32 = vpop.xlane.xlu1 %256  ;;  %v271_v33 = vpop.xlane.xlu0 %270 }
 0x118   :  { %734 = vpow2.f32 %v302_v30  ;;  %v286_v34 = vsub.f32 %v919_v11, %v257_v32  ;;  %v293_v35 = vsub.f32 %v917_v8, %v271_v33 }
 0x119   :  { %736 = vpow2.f32 %v316_v31 }
 0x11a   :  { %v304_v36 = vmul.f32 1.442695, %v286_v34  ;;  %v318_v37 = vmul.f32 1.442695, %v293_v35 }
 0x11b   :  { %v273_v47 = vpop.xlane.xlu1 %272  ;;  %v259_v38 = vpop.xlane.xlu0 %258 }
 0x11c   :  { %738 = vpow2.f32 %v304_v36  ;;  %v294_v39 = vsub.f32 %v934_v26, %v273_v47  ;;  %v287_v62 = vsub.f32 %v924_v14, %v259_v38 }
 0x11d   :  { %740 = vpow2.f32 %v318_v37 }
 0x11e   :  { %v306_v56 = vmul.f32 1.442695, %v287_v62  ;;  %v320_v42 = vmul.f32 1.442695, %v294_v39 }
 0x11f   :  { %v261_v43 = vpop.xlane.xlu1 %260  ;;  %v275_v44 = vpop.xlane.xlu0 %274 }
 0x120   :  { %v288_v45 = vsub.f32 %v948_v40, %v261_v43  ;;  %v295_v11 = vsub.f32 %v939_v29, %v275_v44  ;;  %742 = vpow2.f32 %v306_v56 }
 0x121   :  { %v733_v8 = vpop.eup %732  ;;  %744 = vpow2.f32 %v320_v42 }
 0x122   :  { %v308_v46 = vmul.f32 1.442695, %v288_v45  ;;  %v322_v48 = vmul.f32 1.442695, %v295_v11  ;;  %332 = vadd.xlane.f32.xlu1 %v733_v8  ;;  %v1019_v45 = vld [vmem:[%s1089_s4] ss:$0 sm:$0xff] }
 0x123   :  { %v277_v49 = vpop.xlane.xlu1 %276  ;;  %v263_v50 = vpop.xlane.xlu0 %262 }
 0x124   :  { %746 = vpow2.f32 %v308_v46  ;;  %v296_v14 = vsub.f32 %v962_v57, %v277_v49  ;;  %v289_v26 = vsub.f32 %v960_v52, %v263_v50 }
 0x125   :  { %v735_v51 = vpop.eup %734  ;;  %748 = vpow2.f32 %v322_v48 }
 0x126   :  { %v310_v53 = vmul.f32 1.442695, %v289_v26  ;;  %334 = vadd.xlane.f32.xlu0 %v735_v51  ;;  %v364_v40 = vpack.c.bf16 %v735_v51, %v733_v8  ;;  %v324_v54 = vmul.f32 1.442695, %v296_v14  ;;  %v737_v41 = vpop.eup %736 }
 0x127   :  { %v265_v29 = vpop.xlane.xlu1 %264  ;;  %v279_v55 = vpop.xlane.xlu0 %278 }
 0x128   :  { %v290_v58 = vsub.f32 %v975_v6, %v265_v29  ;;  %v297_v59 = vsub.f32 %v973_v3, %v279_v55  ;;  %682 = vmatprep.mubr.bf16.mxu0 %v364_v40  ;;  %750 = vpow2.f32 %v310_v53 }
 0x129   :  { %v739_v60 = vpop.eup %738  ;;  %752 = vpow2.f32 %v324_v54 }
 0x12a   :  { %v741_v61 = vpop.eup %740  ;;  %v312_v57 = vmul.f32 1.442695, %v290_v58  ;;  %v326_v63 = vmul.f32 1.442695, %v297_v59  ;;  %336 = vadd.xlane.f32.xlu1 %v739_v60 }
 0x12b   :  { %v281_v52 = vpop.xlane.xlu1 %280  ;;  %v267_v0 = vpop.xlane.xlu0 %266  ;;  %v368_v1 = vpack.c.bf16 %v741_v61, %v737_v41 }
 0x12c   :  { %754 = vpow2.f32 %v312_v57  ;;  %v298_v2 = vsub.f32 %v982_v12, %v281_v52  ;;  %v291_v4 = vsub.f32 %v984_v13, %v267_v0 }
 0x12d   :  { %756 = vpow2.f32 %v326_v63  ;;  %690 = vmatprep.mubr.bf16.mxu1 %v368_v1  ;;  %v743_v5 = vpop.eup %742 }
 0x12e   :  { %v314_v3 = vmul.f32 1.442695, %v291_v4  ;;  %v328_v6 = vmul.f32 1.442695, %v298_v2  ;;  %338 = vadd.xlane.f32.xlu0 %v743_v5  ;;  %v365_v20 = vpack.c.bf16 %v743_v5, %v739_v60  ;;  %v745_v7 = vpop.eup %744 }
 0x12f   :  { %v283_v9 = vpop.xlane.xlu0 %282 }
 0x130   :  { %v299_v10 = vsub.f32 %v991_v17, %v283_v9  ;;  %758 = vpow2.f32 %v314_v3  ;;  %683 = vmatmul.mubr.bf16.vlgmr.msra.gmra.mxu0 %v365_v20 }
 0x131   :  { %v747_v15 = vpop.eup %746  ;;  %760 = vpow2.f32 %v328_v6 }
 0x132   :  { %v749_v16 = vpop.eup %748  ;;  %v330_v18 = vmul.f32 1.442695, %v299_v10  ;;  %340 = vadd.xlane.f32.xlu1 %v747_v15 }
 0x133   :  { %v369_v12 = vpack.c.bf16 %v749_v16, %v745_v7 }
 0x134   :  { %762 = vpow2.f32 %v330_v18 }
 0x135   :  { %691 = vmatmul.mubr.bf16.vlgmr.msra.gmra.mxu1 %v369_v12  ;;  %v751_v13 = vpop.eup %750 }
 0x136   :  { %342 = vadd.xlane.f32.xlu0 %v751_v13  ;;  %v366_v19 = vpack.c.bf16 %v751_v13, %v747_v15  ;;  %v753_v21 = vpop.eup %752 }
 0x138   :  { %686 = vmatprep.mubr.bf16.mxu0 %v366_v19 }
 0x139   :  { %v755_v22 = vpop.eup %754 }
 0x13a   :  { %v757_v23 = vpop.eup %756  ;;  %344 = vadd.xlane.f32.xlu1 %v755_v22 }
 0x13b   :  { %v370_v24 = vpack.c.bf16 %v757_v23, %v753_v21 }
 0x13d   :  { %694 = vmatprep.mubr.bf16.mxu1 %v370_v24  ;;  %v759_v17 = vpop.eup %758 }
 0x13e   :  { %348 = vadd.xlane.f32.xlu1 %v737_v41  ;;  %346 = vadd.xlane.f32.xlu0 %v759_v17  ;;  %v367_v25 = vpack.c.bf16 %v759_v17, %v755_v22  ;;  %v761_v27 = vpop.eup %760 }
 0x140   :  { %687 = vmatmul.mubr.bf16.gmra.mxu0 %v367_v25 }
 0x141   :  { %v763_v28 = vpop.eup %762 }
 0x142   :  { %352 = vadd.xlane.f32.xlu1 %v745_v7  ;;  %v371_v30 = vpack.c.bf16 %v763_v28, %v761_v27  ;;  %350 = vadd.xlane.f32.xlu0 %v741_v61 }
 0x144   :  { %695 = vmatmul.mubr.bf16.gmra.mxu1 %v371_v30 }
 0x146   :  { %356 = vadd.xlane.f32.xlu1 %v753_v21  ;;  %354 = vadd.xlane.f32.xlu0 %v749_v16 }
 0x14a   :  { %360 = vadd.xlane.f32.xlu1 %v761_v27  ;;  %358 = vadd.xlane.f32.xlu0 %v757_v23 }
 0x14e   :  { %362 = vadd.xlane.f32.xlu0 %v763_v28 }
 0x1ab   :  { %v333_v31 = vpop.xlane.xlu1 %332 }
 0x1af   :  { %v335_v32 = vpop.xlane.xlu0 %334 }
 0x1b3   :  { %v337_v33 = vpop.xlane.xlu1 %336 }
 0x1b4   :  { %764 = vrcp.f32 %v337_v33 }
 0x1b5   :  { %766 = vrcp.f32 %v333_v31 }
 0x1b7   :  { %v339_v34 = vpop.xlane.xlu0 %338 }
 0x1b8   :  { %768 = vrcp.f32 %v339_v34 }
 0x1bb   :  { %v341_v35 = vpop.xlane.xlu1 %340 }
 0x1bf   :  { %v343_v36 = vpop.xlane.xlu0 %342 }
 0x1c1   :  { %v765_v43 = vpop.eup %764 }
 0x1c2   :  { %v767_v46 = vpop.eup %766 }
 0x1c3   :  { %v345_v37 = vpop.xlane.xlu1 %344 }
 0x1c5   :  { %v769_v49 = vpop.eup %768 }
 0x1c7   :  { %v347_v47 = vpop.xlane.xlu0 %346  ;;  %v349_v38 = vpop.xlane.xlu1 %348 }
 0x1cb   :  { %v351_v39 = vpop.xlane.xlu0 %350  ;;  %v353_v62 = vpop.xlane.xlu1 %352 }
 0x1cc   :  { %770 = vrcp.f32 %v353_v62 }
 0x1cd   :  { %772 = vrcp.f32 %v335_v32 }
 0x1ce   :  { %774 = vrcp.f32 %v349_v38 }
 0x1cf   :  { %v355_v56 = vpop.xlane.xlu0 %354  ;;  %v357_v42 = vpop.xlane.xlu1 %356 }
 0x1d0   :  { %776 = vrcp.f32 %v355_v56 }
 0x1d1   :  { %778 = vrcp.f32 %v351_v39 }
 0x1d2   :  { %780 = vrcp.f32 %v345_v37 }
 0x1d3   :  { %v359_v11 = vpop.xlane.xlu0 %358  ;;  %v361_v50 = vpop.xlane.xlu1 %360  ;;  %782 = vrcp.f32 %v341_v35 }
 0x1d4   :  { %784 = vrcp.f32 %v347_v47 }
 0x1d5   :  { %786 = vrcp.f32 %v361_v50 }
 0x1d6   :  { %788 = vrcp.f32 %v357_v42 }
 0x1d7   :  { %v363_v61 = vpop.xlane.xlu0 %362  ;;  %790 = vrcp.f32 %v343_v36 }
 0x1d8   :  { %792 = vrcp.f32 %v363_v61 }
 0x1d9   :  { %v771_v51 = vpop.eup %770  ;;  %794 = vrcp.f32 %v359_v11 }
 0x1da   :  { %v773_v54 = vpop.eup %772 }
 0x1db   :  { %v775_v58 = vpop.eup %774 }
 0x1dd   :  { %v777_v1 = vpop.eup %776 }
 0x1de   :  { %v779_v6 = vpop.eup %778 }
 0x1df   :  { %v781_v15 = vpop.eup %780 }
 0x1e0   :  { %v783_v18 = vpop.eup %782 }
 0x1e1   :  { %v785_v13 = vpop.eup %784 }
 0x1e2   :  { %v787_v21 = vpop.eup %786 }
 0x1e3   :  { %v789_v27 = vpop.eup %788 }
 0x1e4   :  { %v791_v32 = vpop.eup %790 }
 0x1e5   :  { %v793_v36 = vpop.eup %792 }
 0x1e6   :  { %v795_v56 = vpop.eup %794 }
 0x1f0   :  { %v684_v44 = vpop.f32.mrf.mxu0 }
 0x1f1   :  { %v551_v8 = vmul.f32 %v765_v43, %v684_v44 }
 0x1f2   :  { %v470_v48 = vpop.f32.mrf.mxu0 }
 0x1f3   :  { %v574_v14 = vadd.f32 %v1019_v45, %v551_v8  ;;  %v549_v26 = vmul.f32 %v767_v46, %v470_v48 }
 0x1f4   :  { %v685_v53 = vpop.f32.mrf.mxu0 }
 0x1f5   :  { %v692_v40 = vpop.f32.mrf.mxu1  ;;  %590 = vst [vmem:[%s1090_s5 + $0x10] sm:$0xff] %v574_v14  ;;  %v572_v29 = vadd.f32 %v1019_v45, %v549_v26  ;;  %v552_v55 = vmul.f32 %v769_v49, %v685_v53 }
 0x1f6   :  { %v559_v41 = vmul.f32 %v771_v51, %v692_v40  ;;  %v473_v59 = vpop.f32.mrf.mxu0 }
 0x1f7   :  { %v502_v60 = vpop.f32.mrf.mxu1  ;;  %588 = vst [vmem:[%s1090_s5] sm:$0xff] %v572_v29  ;;  %v575_v57 = vadd.f32 %v1019_v45, %v552_v55  ;;  %v550_v52 = vmul.f32 %v773_v54, %v473_v59 }
 0x1f8   :  { %v582_v63 = vadd.f32 %v1019_v45, %v559_v41  ;;  %v557_v0 = vmul.f32 %v775_v58, %v502_v60 }
 0x1f9   :  { %v693_v2 = vpop.f32.mrf.mxu1  ;;  %591 = vst [vmem:[%s1090_s5 + $0x18] sm:$0xff] %v575_v57  ;;  %v573_v4 = vadd.f32 %v1019_v45, %v550_v52 }
 0x1fa   :  { %598 = vst [vmem:[%s1090_s5 + $0x50] sm:$0xff] %v582_v63  ;;  %v580_v5 = vadd.f32 %v1019_v45, %v557_v0  ;;  %v560_v3 = vmul.f32 %v777_v1, %v693_v2 }
 0x1fb   :  { %v505_v9 = vpop.f32.mrf.mxu1  ;;  %589 = vst [vmem:[%s1090_s5 + $0x8] sm:$0xff] %v573_v4 }
 0x1fc   :  { %596 = vst [vmem:[%s1090_s5 + $0x40] sm:$0xff] %v580_v5  ;;  %v583_v20 = vadd.f32 %v1019_v45, %v560_v3  ;;  %v558_v7 = vmul.f32 %v779_v6, %v505_v9 }
 0x1fe   :  { %599 = vst [vmem:[%s1090_s5 + $0x58] sm:$0xff] %v583_v20  ;;  %v581_v10 = vadd.f32 %v1019_v45, %v558_v7 }
 0x200   :  { %597 = vst [vmem:[%s1090_s5 + $0x48] sm:$0xff] %v581_v10  ;;  %v688_v16 = vpop.f32.mrf.mxu0 }
 0x201   :  { %v555_v12 = vmul.f32 %v781_v15, %v688_v16 }
 0x202   :  { %v486_v19 = vpop.f32.mrf.mxu0 }
 0x203   :  { %v578_v22 = vadd.f32 %v1019_v45, %v555_v12  ;;  %v553_v23 = vmul.f32 %v783_v18, %v486_v19 }
 0x204   :  { %v696_v24 = vpop.f32.mrf.mxu1  ;;  %v689_v17 = vpop.f32.mrf.mxu0 }
 0x205   :  { %v563_v25 = vmul.f32 %v787_v21, %v696_v24  ;;  %594 = vst [vmem:[%s1090_s5 + $0x30] sm:$0xff] %v578_v22  ;;  %v576_v28 = vadd.f32 %v1019_v45, %v553_v23  ;;  %v556_v30 = vmul.f32 %v785_v13, %v689_v17 }
 0x206   :  { %v518_v31 = vpop.f32.mrf.mxu1  ;;  %v489_v34 = vpop.f32.mrf.mxu0 }
 0x207   :  { %v586_v33 = vadd.f32 %v1019_v45, %v563_v25  ;;  %v561_v35 = vmul.f32 %v789_v27, %v518_v31  ;;  %592 = vst [vmem:[%s1090_s5 + $0x20] sm:$0xff] %v576_v28  ;;  %v579_v37 = vadd.f32 %v1019_v45, %v556_v30  ;;  %v554_v47 = vmul.f32 %v791_v32, %v489_v34 }
 0x208   :  { %v697_v38 = vpop.f32.mrf.mxu1 }
 0x209   :  { %602 = vst [vmem:[%s1090_s5 + $0x70] sm:$0xff] %v586_v33  ;;  %v584_v39 = vadd.f32 %v1019_v45, %v561_v35  ;;  %v564_v62 = vmul.f32 %v793_v36, %v697_v38  ;;  %595 = vst [vmem:[%s1090_s5 + $0x38] sm:$0xff] %v579_v37  ;;  %v577_v42 = vadd.f32 %v1019_v45, %v554_v47 }
 0x20a   :  { %v521_v43 = vpop.f32.mrf.mxu1 }
 0x20b   :  { %600 = vst [vmem:[%s1090_s5 + $0x60] sm:$0xff] %v584_v39  ;;  %v587_v44 = vadd.f32 %v1019_v45, %v564_v62  ;;  %v562_v11 = vmul.f32 %v795_v56, %v521_v43  ;;  %593 = vst [vmem:[%s1090_s5 + $0x28] sm:$0xff] %v577_v42 }
 0x20d   :  { %603 = vst [vmem:[%s1090_s5 + $0x78] sm:$0xff] %v587_v44  ;;  %v585_v8 = vadd.f32 %v1019_v45, %v562_v11 }
 0x20f   :  { %601 = vst [vmem:[%s1090_s5 + $0x68] sm:$0xff] %v585_v8 }

</bundles_post_ra>
